<compile_context>
chip_gen: v6e
topology: v6e:2x2x1
jax: 0.10.0
libtpu: 0.0.40
codegen_flags: <defaults>
</compile_context>

<pallas_src>
import jax
import jax.numpy as jnp
from jax.experimental import pallas as pl
from jax.experimental.pallas import tpu as pltpu

# ---- stand-ins for the external `config` module referenced by ResGAT.py ----
DNN_LAYERS = 2
DNN_HIDDEN_DIM = [64, 32]

# ---- model hyper-params (small, consistent with the module's ctor) ----
IN_FEATS = 16
HIDDEN_DIM = 8        # out_feats per head
N_LAYERS = 2
NUM_HEADS = 4
N_NODES = 32
N_BLOCKS = 2          # independent sampled blocks (minibatches) per pallas_call
FANOUTS = [10, 10]    # unused in forward compute
N_CLASSES = 5         # unused in forward compute (DNN has no final classifier)

GAT_LEAKY_SLOPE = 0.2   # dglnn.GATConv default negative_slope
DNN_LEAKY_SLOPE = 0.01  # nn.LeakyReLU default negative_slope
NEG_INF = -1e30

H = NUM_HEADS
D = HIDDEN_DIM
HD = H * D
DNN0, DNN1 = DNN_HIDDEN_DIM

# ------------------------- parameter slab layout (f32) ------------------------
# All weights / attention vectors / biases are packed into ONE (rows, 128) f32
# slab so the kernel does a single parameter DMA (resident across the grid).
SLAB_COLS = 128
_R_W0    = 0                       # (IN_FEATS, HD)  GAT0 fc
_R_WRES0 = _R_W0 + IN_FEATS        # (IN_FEATS, HD)  GAT0 res_fc (Linear)
_R_W1    = _R_WRES0 + IN_FEATS     # (HD, HD)        GAT1 fc
_R_WD0   = _R_W1 + HD              # (HD, DNN0)      DNN linear 0
_R_WD1   = _R_WD0 + HD             # (DNN0, DNN1)    DNN linear 1
_R_AL0   = _R_WD1 + DNN0           # one (1, .) vector per row below
_R_AR0   = _R_AL0 + 1
_R_AL1   = _R_AR0 + 1
_R_AR1   = _R_AL1 + 1
_R_B0    = _R_AR1 + 1
_R_B1    = _R_B0 + 1
_R_BD0   = _R_B1 + 1
_R_BD1   = _R_BD0 + 1
SLAB_ROWS = pl.cdiv(_R_BD1 + 1, 8) * 8


# ----------------------------- fused Pallas kernel ---------------------------

def _gat_layer(h, w, al, ar, adj_bias, res, bias):
    """One head-fused GATConv layer, fully resident in VMEM/vregs.

    h: (N, Fin) f32; w: (Fin, H*D) f32; al/ar: (1, H*D) f32 (DGL column order
    head*D + d); adj_bias: (N, N) additive mask (0 / -1e30); res: (N, H*D);
    bias: (1, H*D).  Returns relu(GATConv(h)).flatten(1) as (N, H*D) f32.
    """
    N = h.shape[0]

    # 1) fc: one flat lane-dense MXU matmul (bf16 in, f32 accumulate).
    z = jnp.dot(h.astype(jnp.bfloat16), w.astype(jnp.bfloat16),
                preferred_element_type=jnp.float32)                  # (N, HD)

    # 2) per-head attention logits on the VPU (no narrow MXU dots).
    er = jnp.sum((z * ar).reshape(N, H, D), axis=-1)                 # (N, H) dst
    el = jnp.sum((z * al).reshape(N, H, D), axis=-1)                 # (N, H) src
    e = er[:, :, None] + jnp.transpose(el)[None, :, :]               # (N, H, N)
    e = jnp.where(e >= 0.0, e, GAT_LEAKY_SLOPE * e)                  # LeakyReLU(0.2)
    e = e + adj_bias[:, None, :]                                     # mask non-edges

    # 3) softmax over incoming edges (src axis = lanes); reciprocal on the EUP.
    # TODO(synk): for large N, stream the src axis with an online softmax so the
    # O(N^2) score tensor is never materialized (size for v7x's 64 MiB VMEM).
    m = jnp.max(e, axis=-1, keepdims=True)
    p = jnp.exp(e - m)
    denom = jnp.maximum(jnp.sum(p, axis=-1, keepdims=True), 1e-30)
    alpha = p * pl.reciprocal(denom, approx=True)                    # (N, H, N)

    # 4) aggregation as ONE lane-wide matmul that directly yields the flat
    #    (N, H*D) output: (N, H*N) @ block_diag(z per head) (H*N, H*D).
    alpha_flat = alpha.reshape(N, H * N)
    col = jax.lax.broadcasted_iota(jnp.int32, (H, 1, HD), 2)
    hid = jax.lax.broadcasted_iota(jnp.int32, (H, 1, HD), 0)
    head_mask = (col >= hid * D) & (col < (hid + 1) * D)             # (H, 1, HD)
    z_blk = jnp.where(head_mask, z[None, :, :], 0.0).reshape(H * N, HD)
    out = jnp.dot(alpha_flat.astype(jnp.bfloat16), z_blk.astype(jnp.bfloat16),
                  preferred_element_type=jnp.float32)                # (N, HD)

    out = out + res + bias                                           # residual + GAT bias
    return jnp.maximum(out, 0.0)                                     # activation=relu


def _fused_forward_kernel(x_ref, adjm_ref, slab_ref, o_ref):
    h = x_ref[0]                                                     # (N, Fin)

    # int8 {0,1} adjacency masks -> additive softmax bias, expanded on the VPU.
    mf = adjm_ref[0].astype(jnp.float32)                             # (L, N, N)
    adj_b = jnp.where(mf > 0.5, 0.0, NEG_INF)

    # packed parameter slab (single resident DMA) -> static-offset views.
    w0    = slab_ref[_R_W0:_R_W0 + IN_FEATS, 0:HD]
    wres0 = slab_ref[_R_WRES0:_R_WRES0 + IN_FEATS, 0:HD]
    w1    = slab_ref[_R_W1:_R_W1 + HD, 0:HD]
    wd0   = slab_ref[_R_WD0:_R_WD0 + HD, 0:DNN0]
    wd1   = slab_ref[_R_WD1:_R_WD1 + DNN0, 0:DNN1]
    al0   = slab_ref[_R_AL0:_R_AL0 + 1, 0:HD]
    ar0   = slab_ref[_R_AR0:_R_AR0 + 1, 0:HD]
    al1   = slab_ref[_R_AL1:_R_AL1 + 1, 0:HD]
    ar1   = slab_ref[_R_AR1:_R_AR1 + 1, 0:HD]
    b0    = slab_ref[_R_B0:_R_B0 + 1, 0:HD]
    b1    = slab_ref[_R_B1:_R_B1 + 1, 0:HD]
    bd0   = slab_ref[_R_BD0:_R_BD0 + 1, 0:DNN0]
    bd1   = slab_ref[_R_BD1:_R_BD1 + 1, 0:DNN1]

    # GAT layer 0: in_feats != H*D -> res_fc is a Linear projection.
    res0 = jnp.dot(h.astype(jnp.bfloat16), wres0.astype(jnp.bfloat16),
                   preferred_element_type=jnp.float32)
    h = _gat_layer(h, w0, al0, ar0, adj_b[0], res0, b0)

    # GAT layer 1: in_feats == H*D -> res_fc is Identity (residual = h itself).
    h = _gat_layer(h, w1, al1, ar1, adj_b[1], h, b1)

    # DNN: [Linear -> LeakyReLU(0.01) -> Dropout(identity in eval)] x 2
    y = jnp.dot(h.astype(jnp.bfloat16), wd0.astype(jnp.bfloat16),
                preferred_element_type=jnp.float32) + bd0
    y = jnp.where(y >= 0.0, y, DNN_LEAKY_SLOPE * y)
    y = jnp.dot(y.astype(jnp.bfloat16), wd1.astype(jnp.bfloat16),
                preferred_element_type=jnp.float32) + bd1
    y = jnp.where(y >= 0.0, y, DNN_LEAKY_SLOPE * y)

    # TODO(synk): final out_dim (32) < 128 lanes -> masked stores; pad/batch node
    # blocks into a lane-dense slab if shapes grow beyond toy size.
    o_ref[0] = y


# ---------------------------------- wrapper ----------------------------------

def resgat_forward(x, adj_mask, param_slab):
    """x: (B, N, Fin) f32; adj_mask: (B, L, N, N) int8 {0,1} (self loops set);
    param_slab: (SLAB_ROWS, 128) f32 packed parameters."""
    B, N, fin = x.shape
    out_dim = DNN_HIDDEN_DIM[-1]
    return pl.pallas_call(
        _fused_forward_kernel,
        out_shape=jax.ShapeDtypeStruct((B, N, out_dim), jnp.float32),
        grid=(B,),
        in_specs=[
            pl.BlockSpec((1, N, fin), lambda b: (b, 0, 0)),
            pl.BlockSpec((1, N_LAYERS, N, N), lambda b: (b, 0, 0, 0)),
            pl.BlockSpec((SLAB_ROWS, SLAB_COLS), lambda b: (0, 0)),   # resident params
        ],
        out_specs=pl.BlockSpec((1, N, out_dim), lambda b: (b, 0, 0)),
        compiler_params=pltpu.CompilerParams(
            dimension_semantics=("parallel",)),
    )(x, adj_mask, param_slab)


def pack_param_slab(W0, Wres0, W1, al0, ar0, al1, ar1, b0, b1, Wd0, bd0, Wd1, bd1):
    slab = jnp.zeros((SLAB_ROWS, SLAB_COLS), jnp.float32)

    def put(s, row, a):
        r, c = a.shape
        return s.at[row:row + r, 0:c].set(a.astype(jnp.float32))

    for row, a in ((_R_W0, W0), (_R_WRES0, Wres0), (_R_W1, W1),
                   (_R_WD0, Wd0), (_R_WD1, Wd1),
                   (_R_AL0, al0), (_R_AR0, ar0), (_R_AL1, al1), (_R_AR1, ar1),
                   (_R_B0, b0), (_R_B1, b1), (_R_BD0, bd0), (_R_BD1, bd1)):
        slab = put(slab, row, a)
    return slab


# ----------------------------------- main -------------------------------------

if __name__ == "__main__":
    # Structural assumptions baked into the kernel (fail loudly if hyper-params change).
    assert IN_FEATS != HD            # layer-0 res_fc must be a Linear projection
    assert N_LAYERS == 2             # layer-1 res_fc is Identity (in_feats == H*D)
    assert HD <= SLAB_COLS and DNN0 <= SLAB_COLS and DNN1 <= SLAB_COLS

    key = jax.random.PRNGKey(0)
    keys = jax.random.split(key, 64)
    _ki = iter(keys)
    nk = lambda: next(_ki)

    B, N = N_BLOCKS, N_NODES

    # node features for B independent sampled blocks
    x = jax.random.normal(nk(), (B, N, IN_FEATS), jnp.float32)

    # TODO(synk): DGL neighbor-sampled bipartite blocks are represented by dense
    # per-layer (N_dst, N_src) adjacency masks with self loops; shipped as int8
    # {0,1} and expanded to the -1e30 additive softmax bias inside the kernel.
    adj = jax.random.uniform(nk(), (B, N_LAYERS, N, N)) < 0.3
    eye = jnp.eye(N, dtype=bool)[None, None]
    adj_mask = jnp.logical_or(adj, eye).astype(jnp.int8)

    # GAT parameters (deterministic synthetic init, DGL fc column order head*D + d)
    W0 = jax.random.normal(nk(), (IN_FEATS, HD), jnp.float32) * 0.2
    al0 = jax.random.normal(nk(), (1, HD), jnp.float32) * 0.2
    ar0 = jax.random.normal(nk(), (1, HD), jnp.float32) * 0.2
    Wres0 = jax.random.normal(nk(), (IN_FEATS, HD), jnp.float32) * 0.2
    b0 = jnp.zeros((1, HD), jnp.float32)                   # GATConv bias (init 0)

    W1 = jax.random.normal(nk(), (HD, HD), jnp.float32) * 0.2
    al1 = jax.random.normal(nk(), (1, HD), jnp.float32) * 0.2
    ar1 = jax.random.normal(nk(), (1, HD), jnp.float32) * 0.2
    b1 = jnp.zeros((1, HD), jnp.float32)

    # DNN parameters: Linear + LeakyReLU + Dropout(identity in eval)
    Wd0 = jax.random.normal(nk(), (HD, DNN0), jnp.float32) * 0.1
    bd0 = jax.random.normal(nk(), (1, DNN0), jnp.float32) * 0.1
    Wd1 = jax.random.normal(nk(), (DNN0, DNN1), jnp.float32) * 0.1
    bd1 = jax.random.normal(nk(), (1, DNN1), jnp.float32) * 0.1

    slab = pack_param_slab(W0, Wres0, W1, al0, ar0, al1, ar1, b0, b1,
                           Wd0, bd0, Wd1, bd1)

    forward = jax.jit(resgat_forward)
    out = forward(x, adj_mask, slab)
    jax.block_until_ready(out)
    assert out.shape == (B, N, DNN_HIDDEN_DIM[-1]), out.shape
    assert bool(jnp.all(jnp.isfinite(out)))
    print("KERNEL_OK")
</pallas_src>

<mosaic_0001>
module attributes {stable_mosaic.version = 11 : i64} {
  func.func @_fused_forward_kernel(%arg0: i32, %arg1: memref<1x32x16xf32, #tpu.memory_space<vmem>>, %arg2: memref<1x2x32x32xi8, #tpu.memory_space<vmem>>, %arg3: memref<168x128xf32, #tpu.memory_space<vmem>>, %arg4: memref<1x32x32xf32, #tpu.memory_space<vmem>>) attributes {dimension_semantics = [#tpu.dimension_semantics<parallel>], iteration_bounds = array<i64: 2>, scalar_prefetch = 0 : i64, scratch_operands = 0 : i64, tpu.core_type = #tpu.core_type<tc>, window_params = [{transform_indices = @transform_0, window_bounds = array<i64: 1, 32, 16>}, {transform_indices = @transform_1, window_bounds = array<i64: 1, 2, 32, 32>}, {pipeline_mode = #tpu.pipeline_mode<synchronous>, transform_indices = @transform_2, window_bounds = array<i64: 168, 128>}, {transform_indices = @transform_3, window_bounds = array<i64: 1, 32, 32>}]} {
    %c0 = arith.constant 0 : index
    %c0_0 = arith.constant 0 : index
    %c0_1 = arith.constant 0 : index
    %0 = vector.load %arg1[%c0, %c0_0, %c0_1] : memref<1x32x16xf32, #tpu.memory_space<vmem>>, vector<1x32x16xf32>
    %1 = vector.shape_cast %0 : vector<1x32x16xf32> to vector<32x16xf32>
    %c0_2 = arith.constant 0 : index
    %c0_3 = arith.constant 0 : index
    %c0_4 = arith.constant 0 : index
    %c0_5 = arith.constant 0 : index
    %2 = vector.load %arg2[%c0_2, %c0_3, %c0_4, %c0_5] : memref<1x2x32x32xi8, #tpu.memory_space<vmem>>, vector<1x2x32x32xi8>
    %3 = vector.shape_cast %2 : vector<1x2x32x32xi8> to vector<2x32x32xi8>
    %4 = arith.sitofp %3 : vector<2x32x32xi8> to vector<2x32x32xf32>
    %cst = arith.constant 5.000000e-01 : f32
    %5 = vector.broadcast %cst : f32 to vector<2x32x32xf32>
    %6 = arith.cmpf ogt, %4, %5 : vector<2x32x32xf32>
    %cst_6 = arith.constant 0.000000e+00 : f32
    %cst_7 = arith.constant -1.000000e+30 : f32
    %7 = vector.broadcast %cst_6 : f32 to vector<2x32x32xf32>
    %8 = vector.broadcast %cst_7 : f32 to vector<2x32x32xf32>
    %9 = arith.select %6, %7, %8 : vector<2x32x32xi1>, vector<2x32x32xf32>
    %c0_8 = arith.constant 0 : index
    %c0_9 = arith.constant 0 : index
    %10 = vector.load %arg3[%c0_8, %c0_9] : memref<168x128xf32, #tpu.memory_space<vmem>>, vector<16x32xf32>
    %c16 = arith.constant 16 : index
    %c0_10 = arith.constant 0 : index
    %11 = vector.load %arg3[%c16, %c0_10] : memref<168x128xf32, #tpu.memory_space<vmem>>, vector<16x32xf32>
    %c32 = arith.constant 32 : index
    %c0_11 = arith.constant 0 : index
    %12 = vector.load %arg3[%c32, %c0_11] : memref<168x128xf32, #tpu.memory_space<vmem>>, vector<32x32xf32>
    %c64 = arith.constant 64 : index
    %c0_12 = arith.constant 0 : index
    %13 = vector.load %arg3[%c64, %c0_12] : memref<168x128xf32, #tpu.memory_space<vmem>>, vector<32x64xf32>
    %c96 = arith.constant 96 : index
    %c0_13 = arith.constant 0 : index
    %14 = vector.load %arg3[%c96, %c0_13] : memref<168x128xf32, #tpu.memory_space<vmem>>, vector<64x32xf32>
    %c160 = arith.constant 160 : index
    %c0_14 = arith.constant 0 : index
    %15 = vector.load %arg3[%c160, %c0_14] : memref<168x128xf32, #tpu.memory_space<vmem>>, vector<1x32xf32>
    %c161 = arith.constant 161 : index
    %c0_15 = arith.constant 0 : index
    %16 = vector.load %arg3[%c161, %c0_15] : memref<168x128xf32, #tpu.memory_space<vmem>>, vector<1x32xf32>
    %c162 = arith.constant 162 : index
    %c0_16 = arith.constant 0 : index
    %17 = vector.load %arg3[%c162, %c0_16] : memref<168x128xf32, #tpu.memory_space<vmem>>, vector<1x32xf32>
    %c163 = arith.constant 163 : index
    %c0_17 = arith.constant 0 : index
    %18 = vector.load %arg3[%c163, %c0_17] : memref<168x128xf32, #tpu.memory_space<vmem>>, vector<1x32xf32>
    %c164 = arith.constant 164 : index
    %c0_18 = arith.constant 0 : index
    %19 = vector.load %arg3[%c164, %c0_18] : memref<168x128xf32, #tpu.memory_space<vmem>>, vector<1x32xf32>
    %c165 = arith.constant 165 : index
    %c0_19 = arith.constant 0 : index
    %20 = vector.load %arg3[%c165, %c0_19] : memref<168x128xf32, #tpu.memory_space<vmem>>, vector<1x32xf32>
    %c166 = arith.constant 166 : index
    %c0_20 = arith.constant 0 : index
    %21 = vector.load %arg3[%c166, %c0_20] : memref<168x128xf32, #tpu.memory_space<vmem>>, vector<1x64xf32>
    %c167 = arith.constant 167 : index
    %c0_21 = arith.constant 0 : index
    %22 = vector.load %arg3[%c167, %c0_21] : memref<168x128xf32, #tpu.memory_space<vmem>>, vector<1x32xf32>
    %23 = arith.truncf %1 : vector<32x16xf32> to vector<32x16xbf16>
    %24 = arith.truncf %11 : vector<16x32xf32> to vector<16x32xbf16>
    %cst_22 = arith.constant dense<0.000000e+00> : vector<32x32xf32>
    %25 = tpu.matmul %23, %24, %cst_22 {dimension_numbers = #tpu.dot_dimension_numbers<[1], [0], [0], [1], [0, 0, 1, 1], [], []>} : vector<32x16xbf16>, vector<16x32xbf16>, vector<32x32xf32> -> vector<32x32xf32>
    %26 = vector.extract_strided_slice %9 {offsets = [0, 0, 0], sizes = [1, 32, 32], strides = [1, 1, 1]} : vector<2x32x32xf32> to vector<1x32x32xf32>
    %27 = vector.shape_cast %26 : vector<1x32x32xf32> to vector<32x32xf32>
    %28 = arith.truncf %1 : vector<32x16xf32> to vector<32x16xbf16>
    %29 = arith.truncf %10 : vector<16x32xf32> to vector<16x32xbf16>
    %cst_23 = arith.constant dense<0.000000e+00> : vector<32x32xf32>
    %30 = tpu.matmul %28, %29, %cst_23 {dimension_numbers = #tpu.dot_dimension_numbers<[1], [0], [0], [1], [0, 0, 1, 1], [], []>} : vector<32x16xbf16>, vector<16x32xbf16>, vector<32x32xf32> -> vector<32x32xf32>
    %31 = vector.broadcast %16 : vector<1x32xf32> to vector<32x32xf32>
    %32 = arith.mulf %30, %31 : vector<32x32xf32>
    %33 = vector.shape_cast %32 : vector<32x32xf32> to vector<32x4x8xf32>
    %cst_24 = arith.constant dense<0.000000e+00> : vector<32x4xf32>
    %34 = vector.multi_reduction <add>, %33, %cst_24 [2] : vector<32x4x8xf32> to vector<32x4xf32>
    %35 = vector.broadcast %15 : vector<1x32xf32> to vector<32x32xf32>
    %36 = arith.mulf %30, %35 : vector<32x32xf32>
    %37 = vector.shape_cast %36 : vector<32x32xf32> to vector<32x4x8xf32>
    %cst_25 = arith.constant dense<0.000000e+00> : vector<32x4xf32>
    %38 = vector.multi_reduction <add>, %37, %cst_25 [2] : vector<32x4x8xf32> to vector<32x4xf32>
    %39 = vector.shape_cast %34 : vector<32x4xf32> to vector<32x4x1xf32>
    %40 = tpu.transpose %38, [1, 0] : vector<32x4xf32> -> vector<4x32xf32>
    %41 = vector.shape_cast %40 : vector<4x32xf32> to vector<1x4x32xf32>
    %42 = vector.broadcast %39 : vector<32x4x1xf32> to vector<32x4x32xf32>
    %43 = vector.broadcast %41 : vector<1x4x32xf32> to vector<32x4x32xf32>
    %44 = arith.addf %42, %43 : vector<32x4x32xf32>
    %cst_26 = arith.constant 0.000000e+00 : f32
    %45 = vector.broadcast %cst_26 : f32 to vector<32x4x32xf32>
    %46 = arith.cmpf oge, %44, %45 : vector<32x4x32xf32>
    %cst_27 = arith.constant 2.000000e-01 : f32
    %47 = vector.broadcast %cst_27 : f32 to vector<32x4x32xf32>
    %48 = arith.mulf %47, %44 : vector<32x4x32xf32>
    %49 = arith.select %46, %44, %48 : vector<32x4x32xi1>, vector<32x4x32xf32>
    %50 = vector.shape_cast %27 : vector<32x32xf32> to vector<32x1x32xf32>
    %51 = vector.broadcast %50 : vector<32x1x32xf32> to vector<32x4x32xf32>
    %52 = arith.addf %49, %51 : vector<32x4x32xf32>
    %cst_28 = arith.constant dense<0xFF800000> : vector<32x4xf32>
    %53 = vector.multi_reduction <maximumf>, %52, %cst_28 [2] : vector<32x4x32xf32> to vector<32x4xf32>
    %54 = vector.shape_cast %53 : vector<32x4xf32> to vector<32x4x1xf32>
    %55 = vector.broadcast %54 : vector<32x4x1xf32> to vector<32x4x32xf32>
    %56 = arith.subf %52, %55 : vector<32x4x32xf32>
    %57 = math.exp %56 : vector<32x4x32xf32>
    %cst_29 = arith.constant dense<0.000000e+00> : vector<32x4xf32>
    %58 = vector.multi_reduction <add>, %57, %cst_29 [2] : vector<32x4x32xf32> to vector<32x4xf32>
    %59 = vector.shape_cast %58 : vector<32x4xf32> to vector<32x4x1xf32>
    %cst_30 = arith.constant 1.000000e-30 : f32
    %60 = vector.broadcast %cst_30 : f32 to vector<32x4x1xf32>
    %61 = arith.maximumf %59, %60 : vector<32x4x1xf32>
    %62 = tpu.reciprocal %61 {approx = true} : vector<32x4x1xf32> -> vector<32x4x1xf32>
    %63 = vector.broadcast %62 : vector<32x4x1xf32> to vector<32x4x32xf32>
    %64 = arith.mulf %57, %63 : vector<32x4x32xf32>
    %65 = vector.shape_cast %64 : vector<32x4x32xf32> to vector<32x128xf32>
    %66 = tpu.iota {dimensions = array<i32: 2>} : vector<4x1x32xi32>
    %67 = tpu.iota {dimensions = array<i32: 0>} : vector<4x1x32xi32>
    %c8_i32 = arith.constant 8 : i32
    %68 = vector.broadcast %c8_i32 : i32 to vector<4x1x32xi32>
    %69 = arith.muli %67, %68 : vector<4x1x32xi32>
    %70 = arith.cmpi sge, %66, %69 : vector<4x1x32xi32>
    %c1_i32 = arith.constant 1 : i32
    %71 = vector.broadcast %c1_i32 : i32 to vector<4x1x32xi32>
    %72 = arith.addi %67, %71 : vector<4x1x32xi32>
    %c8_i32_31 = arith.constant 8 : i32
    %73 = vector.broadcast %c8_i32_31 : i32 to vector<4x1x32xi32>
    %74 = arith.muli %72, %73 : vector<4x1x32xi32>
    %75 = arith.cmpi slt, %66, %74 : vector<4x1x32xi32>
    %76 = arith.andi %70, %75 : vector<4x1x32xi1>
    %77 = vector.shape_cast %30 : vector<32x32xf32> to vector<1x32x32xf32>
    %cst_32 = arith.constant 0.000000e+00 : f32
    %78 = vector.shape_cast %76 : vector<4x1x32xi1> to vector<4x1x32xi1>
    %79 = vector.broadcast %78 : vector<4x1x32xi1> to vector<4x32x32xi1>
    %80 = vector.shape_cast %77 : vector<1x32x32xf32> to vector<1x32x32xf32>
    %81 = vector.broadcast %80 : vector<1x32x32xf32> to vector<4x32x32xf32>
    %82 = vector.broadcast %cst_32 : f32 to vector<4x32x32xf32>
    %83 = arith.select %79, %81, %82 : vector<4x32x32xi1>, vector<4x32x32xf32>
    %84 = vector.shape_cast %83 : vector<4x32x32xf32> to vector<128x32xf32>
    %85 = arith.truncf %65 : vector<32x128xf32> to vector<32x128xbf16>
    %86 = arith.truncf %84 : vector<128x32xf32> to vector<128x32xbf16>
    %cst_33 = arith.constant dense<0.000000e+00> : vector<32x32xf32>
    %87 = tpu.matmul %85, %86, %cst_33 {dimension_numbers = #tpu.dot_dimension_numbers<[1], [0], [0], [1], [0, 0, 1, 1], [], []>} : vector<32x128xbf16>, vector<128x32xbf16>, vector<32x32xf32> -> vector<32x32xf32>
    %88 = arith.addf %87, %25 : vector<32x32xf32>
    %89 = vector.broadcast %19 : vector<1x32xf32> to vector<32x32xf32>
    %90 = arith.addf %88, %89 : vector<32x32xf32>
    %cst_34 = arith.constant 0.000000e+00 : f32
    %91 = vector.broadcast %cst_34 : f32 to vector<32x32xf32>
    %92 = arith.maximumf %90, %91 : vector<32x32xf32>
    %93 = vector.extract_strided_slice %9 {offsets = [1, 0, 0], sizes = [1, 32, 32], strides = [1, 1, 1]} : vector<2x32x32xf32> to vector<1x32x32xf32>
    %94 = vector.shape_cast %93 : vector<1x32x32xf32> to vector<32x32xf32>
    %95 = arith.truncf %92 : vector<32x32xf32> to vector<32x32xbf16>
    %96 = arith.truncf %12 : vector<32x32xf32> to vector<32x32xbf16>
    %cst_35 = arith.constant dense<0.000000e+00> : vector<32x32xf32>
    %97 = tpu.matmul %95, %96, %cst_35 {dimension_numbers = #tpu.dot_dimension_numbers<[1], [0], [0], [1], [0, 0, 1, 1], [], []>} : vector<32x32xbf16>, vector<32x32xbf16>, vector<32x32xf32> -> vector<32x32xf32>
    %98 = vector.broadcast %18 : vector<1x32xf32> to vector<32x32xf32>
    %99 = arith.mulf %97, %98 : vector<32x32xf32>
    %100 = vector.shape_cast %99 : vector<32x32xf32> to vector<32x4x8xf32>
    %cst_36 = arith.constant dense<0.000000e+00> : vector<32x4xf32>
    %101 = vector.multi_reduction <add>, %100, %cst_36 [2] : vector<32x4x8xf32> to vector<32x4xf32>
    %102 = vector.broadcast %17 : vector<1x32xf32> to vector<32x32xf32>
    %103 = arith.mulf %97, %102 : vector<32x32xf32>
    %104 = vector.shape_cast %103 : vector<32x32xf32> to vector<32x4x8xf32>
    %cst_37 = arith.constant dense<0.000000e+00> : vector<32x4xf32>
    %105 = vector.multi_reduction <add>, %104, %cst_37 [2] : vector<32x4x8xf32> to vector<32x4xf32>
    %106 = vector.shape_cast %101 : vector<32x4xf32> to vector<32x4x1xf32>
    %107 = tpu.transpose %105, [1, 0] : vector<32x4xf32> -> vector<4x32xf32>
    %108 = vector.shape_cast %107 : vector<4x32xf32> to vector<1x4x32xf32>
    %109 = vector.broadcast %106 : vector<32x4x1xf32> to vector<32x4x32xf32>
    %110 = vector.broadcast %108 : vector<1x4x32xf32> to vector<32x4x32xf32>
    %111 = arith.addf %109, %110 : vector<32x4x32xf32>
    %cst_38 = arith.constant 0.000000e+00 : f32
    %112 = vector.broadcast %cst_38 : f32 to vector<32x4x32xf32>
    %113 = arith.cmpf oge, %111, %112 : vector<32x4x32xf32>
    %cst_39 = arith.constant 2.000000e-01 : f32
    %114 = vector.broadcast %cst_39 : f32 to vector<32x4x32xf32>
    %115 = arith.mulf %114, %111 : vector<32x4x32xf32>
    %116 = arith.select %113, %111, %115 : vector<32x4x32xi1>, vector<32x4x32xf32>
    %117 = vector.shape_cast %94 : vector<32x32xf32> to vector<32x1x32xf32>
    %118 = vector.broadcast %117 : vector<32x1x32xf32> to vector<32x4x32xf32>
    %119 = arith.addf %116, %118 : vector<32x4x32xf32>
    %cst_40 = arith.constant dense<0xFF800000> : vector<32x4xf32>
    %120 = vector.multi_reduction <maximumf>, %119, %cst_40 [2] : vector<32x4x32xf32> to vector<32x4xf32>
    %121 = vector.shape_cast %120 : vector<32x4xf32> to vector<32x4x1xf32>
    %122 = vector.broadcast %121 : vector<32x4x1xf32> to vector<32x4x32xf32>
    %123 = arith.subf %119, %122 : vector<32x4x32xf32>
    %124 = math.exp %123 : vector<32x4x32xf32>
    %cst_41 = arith.constant dense<0.000000e+00> : vector<32x4xf32>
    %125 = vector.multi_reduction <add>, %124, %cst_41 [2] : vector<32x4x32xf32> to vector<32x4xf32>
    %126 = vector.shape_cast %125 : vector<32x4xf32> to vector<32x4x1xf32>
    %cst_42 = arith.constant 1.000000e-30 : f32
    %127 = vector.broadcast %cst_42 : f32 to vector<32x4x1xf32>
    %128 = arith.maximumf %126, %127 : vector<32x4x1xf32>
    %129 = tpu.reciprocal %128 {approx = true} : vector<32x4x1xf32> -> vector<32x4x1xf32>
    %130 = vector.broadcast %129 : vector<32x4x1xf32> to vector<32x4x32xf32>
    %131 = arith.mulf %124, %130 : vector<32x4x32xf32>
    %132 = vector.shape_cast %131 : vector<32x4x32xf32> to vector<32x128xf32>
    %133 = tpu.iota {dimensions = array<i32: 2>} : vector<4x1x32xi32>
    %134 = tpu.iota {dimensions = array<i32: 0>} : vector<4x1x32xi32>
    %c8_i32_43 = arith.constant 8 : i32
    %135 = vector.broadcast %c8_i32_43 : i32 to vector<4x1x32xi32>
    %136 = arith.muli %134, %135 : vector<4x1x32xi32>
    %137 = arith.cmpi sge, %133, %136 : vector<4x1x32xi32>
    %c1_i32_44 = arith.constant 1 : i32
    %138 = vector.broadcast %c1_i32_44 : i32 to vector<4x1x32xi32>
    %139 = arith.addi %134, %138 : vector<4x1x32xi32>
    %c8_i32_45 = arith.constant 8 : i32
    %140 = vector.broadcast %c8_i32_45 : i32 to vector<4x1x32xi32>
    %141 = arith.muli %139, %140 : vector<4x1x32xi32>
    %142 = arith.cmpi slt, %133, %141 : vector<4x1x32xi32>
    %143 = arith.andi %137, %142 : vector<4x1x32xi1>
    %144 = vector.shape_cast %97 : vector<32x32xf32> to vector<1x32x32xf32>
    %cst_46 = arith.constant 0.000000e+00 : f32
    %145 = vector.shape_cast %143 : vector<4x1x32xi1> to vector<4x1x32xi1>
    %146 = vector.broadcast %145 : vector<4x1x32xi1> to vector<4x32x32xi1>
    %147 = vector.shape_cast %144 : vector<1x32x32xf32> to vector<1x32x32xf32>
    %148 = vector.broadcast %147 : vector<1x32x32xf32> to vector<4x32x32xf32>
    %149 = vector.broadcast %cst_46 : f32 to vector<4x32x32xf32>
    %150 = arith.select %146, %148, %149 : vector<4x32x32xi1>, vector<4x32x32xf32>
    %151 = vector.shape_cast %150 : vector<4x32x32xf32> to vector<128x32xf32>
    %152 = arith.truncf %132 : vector<32x128xf32> to vector<32x128xbf16>
    %153 = arith.truncf %151 : vector<128x32xf32> to vector<128x32xbf16>
    %cst_47 = arith.constant dense<0.000000e+00> : vector<32x32xf32>
    %154 = tpu.matmul %152, %153, %cst_47 {dimension_numbers = #tpu.dot_dimension_numbers<[1], [0], [0], [1], [0, 0, 1, 1], [], []>} : vector<32x128xbf16>, vector<128x32xbf16>, vector<32x32xf32> -> vector<32x32xf32>
    %155 = arith.addf %154, %92 : vector<32x32xf32>
    %156 = vector.broadcast %20 : vector<1x32xf32> to vector<32x32xf32>
    %157 = arith.addf %155, %156 : vector<32x32xf32>
    %cst_48 = arith.constant 0.000000e+00 : f32
    %158 = vector.broadcast %cst_48 : f32 to vector<32x32xf32>
    %159 = arith.maximumf %157, %158 : vector<32x32xf32>
    %160 = arith.truncf %159 : vector<32x32xf32> to vector<32x32xbf16>
    %161 = arith.truncf %13 : vector<32x64xf32> to vector<32x64xbf16>
    %cst_49 = arith.constant dense<0.000000e+00> : vector<32x64xf32>
    %162 = tpu.matmul %160, %161, %cst_49 {dimension_numbers = #tpu.dot_dimension_numbers<[1], [0], [0], [1], [0, 0, 1, 1], [], []>} : vector<32x32xbf16>, vector<32x64xbf16>, vector<32x64xf32> -> vector<32x64xf32>
    %163 = vector.broadcast %21 : vector<1x64xf32> to vector<32x64xf32>
    %164 = arith.addf %162, %163 : vector<32x64xf32>
    %cst_50 = arith.constant 0.000000e+00 : f32
    %165 = vector.broadcast %cst_50 : f32 to vector<32x64xf32>
    %166 = arith.cmpf oge, %164, %165 : vector<32x64xf32>
    %cst_51 = arith.constant 0.00999999977 : f32
    %167 = vector.broadcast %cst_51 : f32 to vector<32x64xf32>
    %168 = arith.mulf %167, %164 : vector<32x64xf32>
    %169 = arith.select %166, %164, %168 : vector<32x64xi1>, vector<32x64xf32>
    %170 = arith.truncf %169 : vector<32x64xf32> to vector<32x64xbf16>
    %171 = arith.truncf %14 : vector<64x32xf32> to vector<64x32xbf16>
    %cst_52 = arith.constant dense<0.000000e+00> : vector<32x32xf32>
    %172 = tpu.matmul %170, %171, %cst_52 {dimension_numbers = #tpu.dot_dimension_numbers<[1], [0], [0], [1], [0, 0, 1, 1], [], []>} : vector<32x64xbf16>, vector<64x32xbf16>, vector<32x32xf32> -> vector<32x32xf32>
    %173 = vector.broadcast %22 : vector<1x32xf32> to vector<32x32xf32>
    %174 = arith.addf %172, %173 : vector<32x32xf32>
    %cst_53 = arith.constant 0.000000e+00 : f32
    %175 = vector.broadcast %cst_53 : f32 to vector<32x32xf32>
    %176 = arith.cmpf oge, %174, %175 : vector<32x32xf32>
    %cst_54 = arith.constant 0.00999999977 : f32
    %177 = vector.broadcast %cst_54 : f32 to vector<32x32xf32>
    %178 = arith.mulf %177, %174 : vector<32x32xf32>
    %179 = arith.select %176, %174, %178 : vector<32x32xi1>, vector<32x32xf32>
    %c0_55 = arith.constant 0 : index
    %c0_56 = arith.constant 0 : index
    %c0_57 = arith.constant 0 : index
    %180 = vector.load %arg4[%c0_55, %c0_56, %c0_57] : memref<1x32x32xf32, #tpu.memory_space<vmem>>, vector<1x32x32xf32>
    %181 = vector.shape_cast %180 : vector<1x32x32xf32> to vector<32x32xf32>
    %182 = vector.shape_cast %179 : vector<32x32xf32> to vector<1x32x32xf32>
    tpu.vector_store %arg4[%c0_55, %c0_56, %c0_57], %182 {strides = array<i32>} : memref<1x32x32xf32, #tpu.memory_space<vmem>>, vector<1x32x32xf32>,
    return
  }
  func.func @transform_0(%arg0: i32) -> (i32, i32, i32) {
    %c0_i32 = arith.constant 0 : i32
    %c0_i32_0 = arith.constant 0 : i32
    %c0_i32_1 = arith.constant 0 : i32
    return %arg0, %c0_i32, %c0_i32_0 : i32, i32, i32
  }
  func.func @transform_1(%arg0: i32) -> (i32, i32, i32, i32) {
    %c0_i32 = arith.constant 0 : i32
    %c0_i32_0 = arith.constant 0 : i32
    %c0_i32_1 = arith.constant 0 : i32
    %c0_i32_2 = arith.constant 0 : i32
    return %arg0, %c0_i32, %c0_i32_0, %c0_i32_1 : i32, i32, i32, i32
  }
  func.func @transform_2(%arg0: i32) -> (i32, i32) {
    %c0_i32 = arith.constant 0 : i32
    %c0_i32_0 = arith.constant 0 : i32
    %c0_i32_1 = arith.constant 0 : i32
    return %c0_i32, %c0_i32_0 : i32, i32
  }
  func.func @transform_3(%arg0: i32) -> (i32, i32, i32) {
    %c0_i32 = arith.constant 0 : i32
    %c0_i32_0 = arith.constant 0 : i32
    %c0_i32_1 = arith.constant 0 : i32
    return %arg0, %c0_i32, %c0_i32_0 : i32, i32, i32
  }
}

</mosaic_0001>

<bundles_post_ra>
// kernel: resgat_forward.1
= control target key start
LH: loop header
LB: loop body
LE: loop exit
PB: predicated region body
PF: predicated region fallthrough
CT: control target
= control target key end

     0   :  { %8 = vsyncpa [#allocation3], 0  ;;  %s8539_s0 = inlined_call_operand.vmem [shape: f32[2,32,16], index: 0, kind: input, shape index: {}]   ;;  %s8540_s1 = inlined_call_operand.vmem [shape: s8[2,2,32,32], index: 1, kind: input, shape index: {}]   ;;  %s8541_s2 = inlined_call_operand.hbm [shape: f32[168,128], index: 2, kind: input, shape index: {}]   ;;  %s8542_s3 = inlined_call_operand.hbm [shape: f32[2,32,32], index: 3, kind: output, shape index: {}]  }
   0x1   :  { %9 = vsyncpa [#allocation4], 0 }
   0x2   :  { %11 = vsyncpa [#allocation4 + $0x1], 0  ;;  %s6202_s12 = smov 0   ;;  %s6204_s13 = smov 0  }
   0x3   :  { %s6206_s14 = smov 0   ;;  %s6208_s15 = smov 0  }
   0x4 LB: > { %s6223_s16 = sadd.s32 4294967295, %s6163_s15   ;;  %s5487_s17 = sadd.s32 4294967294, %s6163_s15   ;;  %s6163_s15 = sphi %s6208_s15, %s8622_s15   ;;  %s6159_s14 = sphi %s6206_s14, %s8621_s14   ;;  %s6155_s13 = sphi %s6204_s13, %s8620_s13   ;;  %s6151_s12 = sphi %s6202_s12, %s8619_s12  }
   0x5   : > { %s6227_s18 = sadd.s32 1, %s6163_s15   ;;  %s97_s19 = sadd.s32 1, %s6159_s14 }
   0x6   : > { %s94_s20 = ssub.s32 %s6163_s15, %s6227_s18  ;;  %p107_p0 = scmp.ne.s32.totalorder %s6159_s14, %s6155_s13 }
   0x7   : > { %p95_p1 = scmp.eq.s32.totalorder %s94_s20, 0  ;;  %p108_p2 = scmp.eq.s32.totalorder %s6223_s16, 1 }
   0x8   : > { %p113_p3 = scmp.ne.s32.totalorder %s6155_s13, %s6151_s12  ;;  %p114_p4 = scmp.eq.s32.totalorder %s5487_s17, 1 }
   0x9   : > { %s6238_s21 = scalar_select %p95_p1, %s6159_s14, %s97_s19  }
   0xa   : > { %p6240_p5 = por %p108_p2, %p107_p0  ;;  %p6244_p6 = por %p114_p4, %p113_p3 }
   0xb   : > { %p5488_p7 = scmp.ge.s32.totalorder %s6163_s15, 1  ;;  %p121_p8 = scmp.lt.s32.totalorder %s6163_s15, 3 }
   0xc   : > { %s8571_s23 = scalar_select %p6244_p6, 1, 0 }
   0xd   : > { %p5706_p9 = scmp.eq.s32.totalorder %s6223_s16, 0  ;;  %p6251_p10 = pnand %p5488_p7, %p121_p8 }
   0xe   : > { %s6165_s25 = smov [#allocation2]  }
   0xf   : > { %s133_s26 = sshll.u32 %s6165_s25, 4  ;;  %p5698_p11 = pneg %p6251_p10  ;;  %s134_s26 = int_to_ptr.vmem [resolvable:$true] %s133_s26 }
  0x10   : > { %s6084_s27 = scalar_lea.vmem %s134_s26, 2688  ;;  %p6092_p3 = scmp.lt.s32.totalorder %s134_s26, %s134_s26 }
  0x11   : > { %p5699_p12 = pnand %p5706_p9, %p5698_p11  ;;  %p6085_p0 = scmp.ne.s32.totalorder %s134_s26, %s6084_s27 }
  0x12   : > { %p6093_p4 = scmp.lt.s32.totalorder %s6084_s27, %s6084_s27 }
  0x13   : > { %p6075_p13 = pneg %p5699_p12 }
  0x14   : > { %p6094_p6 = por %p6093_p4, %p6092_p3 }
  0x15   : > { %p6087_p1 = pnand %p6085_p0, %p6075_p13 }
  0x17   : > { %p6088_p2 = pneg %p6087_p1 }
  0x19   : > { %p6095_p7 = pnand %p6094_p6, %p6088_p2 }
  0x1b   : > { %6098 = shalt.err (!%p6095_p7)
}
  0x1c   : > { %s6166_s28 = smov 128   ;;  %s6167_s29 = smov 8  }
  0x1d   : > { %5701 = dma.hbm_to_vmem [thread:$0]  (!%p5699_p12), %s8541_s2, 2688, %s134_s26, [#allocation3], %s6166_s28, %s6166_s28, %s6167_s29  }
  0x1e   : > { %165 = sbr.rel (%p6251_p10) target bundleno = 3451 (0xd7b), region = 32 }
  0x23   : > { %6142 = dma.done.wait (%p5706_p9), [#allocation3], 2688  }
  0x24   : > { %6144 = vsyncadd (%p5706_p9), [#allocation3], 4294964608  ;;  %p194_p8 = scmp.lt.s32.totalorder %s6223_s16, 1  ;;  %v243_v0 = vld [vmem:[#allocation2] sm:$0xff]  ;;  %v244_v1 = vld [vmem:[#allocation2 + $0x8] sm:$0xff]  ;;  %vm274_vm0 = vcmask 130048   ;;  %v433_v12 = vlaneseq }
  0x25   : > { %v330_v3 = vpack.c.bf16 %v244_v1, %v243_v0  ;;  %v245_v9 = vld [vmem:[#allocation2 + $0x10] sm:$0xff]  ;;  %v246_v10 = vld [vmem:[#allocation2 + $0x18] sm:$0xff]  ;;  %v5503_v16 = vld [vmem:[#allocation2 + $0xa0] ss:$0 sm:$0xff]  ;;  %s6168_s10 = smov 112   ;;  %s6169_s11 = smov 120  }
  0x26   : > { %s6270_s5 = scalar_select %p194_p8, %s6223_s16, 1  ;;  %v273_v11 = vpack.c.bf16 %v246_v10, %v245_v9  ;;  %v6279_v13 = vshrl.u32 %v433_v12, 7  ;;  %v1246_v14 = vand.u32 127, %v433_v12  ;;  %v8574_v23 = vmov 0  ;;  %v5502_v24 = vld [vmem:[#allocation2 + $0xa1] ss:$0 sm:$0xff] }
  0x27   : > { %5618 = vmatprep.subr.bf16.mxu1 %v330_v3  ;;  %s6170_s17 = smov 104   ;;  %v8577_v29 = vmov 0  ;;  %v8580_v31 = vmov 0  ;;  %v8583_v32 = vmov 0  ;;  %v6171_v36 = vmov 1983009808  }
  0x28   : > { %s5569_s6 = sshll.u32 %s6270_s5, 5  ;;  %5619 = vmatpush3.bf16.msra.mxu1 %v330_v3  ;;  %5612 = vmatprep.subr.bf16.mxu0 %v273_v11  ;;  %v6283_v15 = vsub.s32 %v1246_v14, %v6279_v13  ;;  %vm2689_vm1 = vcmp.ge.s32.totalorder %v1246_v14, 24  ;;  %vm2693_vm2 = vcmp.lt.s32.totalorder %v1246_v14, 32  ;;  %vm2688_vm5 = vcmp.ge.s32.totalorder %v1246_v14, 16  ;;  %s5570_s19 = sshll.u32 %s6270_s5, 4 }
  0x29   : > { %s198_s9 = scalar_lea.vmem %s8539_s0, %s5569_s6  ;;  %5613 = vmatpush3.bf16.msra.mxu0 %v273_v11  ;;  %vm2697_vm3 = vmand %vm2689_vm1, %vm2693_vm2  ;;  %vm2692_vm6 = vcmp.lt.s32.totalorder %v1246_v14, 24  ;;  %vm2687_vm9 = vcmp.ge.s32.totalorder %v1246_v14, 8  ;;  %vm2691_vm10 = vcmp.lt.s32.totalorder %v1246_v14, 16  ;;  %vm2690_vm13 = vcmp.lt.s32.totalorder %v1246_v14, 8  ;;  %s6789_s25 = scalar_lea.vmem %s8540_s1, %s5570_s19 }
  0x2a   : > { %v205_v2 = vld [vmem:[%s198_s9] sm:$0xff]  ;;  %v206_v4 = vld [vmem:[%s198_s9 + $0x8] sm:$0xff]  ;;  %v207_v6 = vld [vmem:[%s198_s9 + $0x10] sm:$0xff]  ;;  %8573 = vst [vmem:[#allocation8_spill] sm:$0xff] %v6283_v15  ;;  %v431_v37 = vunpack.c.l.s4 %v6171_v36  ;;  %v6172_v38 = vmov 1934713408  }
  0x2b   : > { %v271_v5 = vpack.c.bf16 %v206_v4, %v205_v2  ;;  %v208_v7 = vld [vmem:[%s198_s9 + $0x18] sm:$0xff]  ;;  %vm6293_vm4 = vmpackc.low %vm2697_vm3, %vm2697_vm3  ;;  %v463_v39 = vunpack.c.l.s4 %v6172_v38  ;;  %vm700_vm15 = vcmask 60416   ;;  %vm1377_vm1 = vcmask 1042434   ;;  %s6176_s26 = smov 32   ;;  %s6177_s27 = smov 64  }
  0x2c   : > { %v272_v8 = vpack.c.bf16 %v208_v7, %v207_v6  ;;  %v8575_v23 = vsel %vm6293_vm4, 4294967295, %v8574_v23  ;;  %vm2696_vm7 = vmand %vm2688_vm5, %vm2692_vm6  ;;  %v432_v40 = vunpack.c.0.s8 %v431_v37  ;;  %vm1379_vm2 = vcmask 1043459   ;;  %s6178_s28 = smov 96   ;;  %s191_s29 = sand.u32 1, %s6155_s13  }
  0x2d   : > { %5620 = vmatprep.mubr.msk.bf16.mxu1 %vm274_vm0, %v271_v5  ;;  %5614 = vmatprep.mubr.msk.bf16.mxu0 %vm274_vm0, %v271_v5  ;;  %8576 = vst [vmem:[#allocation9_spill] sm:$0xff] %v8575_v23  ;;  %vm6315_vm8 = vmpackc.low %vm2696_vm7, %vm2696_vm7  ;;  %v464_v43 = vunpack.c.0.s8 %v463_v39  ;;  %vm1381_vm3 = vcmask 1044484   ;;  %vm8555_vm5 = vcmask 1045509   ;;  %vm8548_vm6 = vcmask 1046534   ;;  %s5493_s30 = sshll.u32 %s191_s29, 5  ;;  %s5571_s6 = sshll.u32 %s6223_s16, 9 }
  0x2e   : > { %5621 = vmatmul.mubr.msk.bf16.vlgmr.msra.gmra.mxu1 %vm274_vm0, %v272_v8  ;;  %5615 = vmatmul.mubr.msk.bf16.vlgmr.msra.gmra.mxu0 %vm274_vm0, %v272_v8  ;;  %v8578_v29 = vsel %vm6315_vm8, 4294967295, %v8577_v29  ;;  %vm2695_vm11 = vmand %vm2687_vm9, %vm2691_vm10  ;;  %v6398_v44 = vsub.s32 %v432_v40, %v6279_v13  ;;  %vm1375_vm0 = vcmask 1041409   ;;  %vm8545_vm7 = vcmask 1047559   ;;  %s193_s4 = scalar_lea.vmem [#allocation5], %s5493_s30  ;;  %s8494_s9 = scalar_lea.hbm %s8542_s3, %s5571_s6 }
  0x2f   : > { %8579 = vst [vmem:[#allocation10_spill] sm:$0xff] %v8578_v29  ;;  %vm6337_vm12 = vmpackc.low %vm2695_vm11, %vm2695_vm11  ;;  %v6403_v50 = vsub.s32 %v464_v43, %v6279_v13  ;;  %s5401_s5 = sshll.u32 %s193_s4, 4  ;;  %s8499_s16 = scalar_lea.sflag [#allocation4], %s191_s29  ;;  %s8488_s5 = int_to_ptr.vmem [resolvable:$true] %s5401_s5 }
  0x30   : > { %v8581_v31 = vsel %vm6337_vm12, 4294967295, %v8580_v31  ;;  %vm6357_vm14 = vmpackc.low %vm2690_vm13, %vm2690_vm13  ;;  %vm1966_vm13 = vcmask 257024  }
  0x31   : > { %8582 = vst [vmem:[#allocation11_spill] sm:$0xff] %v8581_v31  ;;  %v8584_v32 = vsel %vm6357_vm14, 4294967295, %v8583_v32  ;;  %8586 = vst [vmem:[#allocation13_spill] sm:$0xff] %v6403_v50 }
  0x32   : > { %8585 = vst [vmem:[#allocation12_spill] sm:$0xff] %v8584_v32 }
  0xee   : > { %v5622_v17 = vpop.f32.mrf.mxu1 }
  0xef   : > { %v6285_v18 = vmul.f32 %v5622_v17, %v5503_v16  ;;  %v6303_v27 = vmul.f32 %v5622_v17, %v5502_v24 }
  0xf0   : > { %v365_v19 = vpop.f32.mrf.mxu1 }
  0xf1   : > { %825 = vrot.lane.b32.xlu1 %v6285_v18, %s6168_s10  ;;  %813 = vrot.lane.b32.xlu0 %v6285_v18, %s6169_s11  ;;  %v6291_v21 = vmul.f32 %v5503_v16, %v365_v19  ;;  %v6361_v33 = vmul.f32 %v5502_v24, %v365_v19 }
  0xf2   : > { %v5623_v20 = vpop.f32.mrf.mxu1 }
  0xf3   : > { %v5505_v22 = vpack.c.bf16 %v5623_v20, %v5622_v17  ;;  %v6305_v28 = vmul.f32 %v5623_v20, %v5503_v16  ;;  %v6327_v30 = vmul.f32 %v5623_v20, %v5502_v24 }
  0xf4   : > { %v368_v25 = vpop.f32.mrf.mxu1 }
  0xf5   : > { %v5508_v26 = vpack.c.bf16 %v368_v25, %v365_v19  ;;  %837 = vrot.lane.b32.xlu0 %v6285_v18, %s6170_s17  ;;  %833 = vrot.lane.b32.xlu1 %v6291_v21, %s6170_s17  ;;  %v6363_v34 = vmul.f32 %v5503_v16, %v368_v25  ;;  %v6381_v35 = vmul.f32 %v5502_v24, %v368_v25 }
  0xf6   : > { %5624 = vmatprep.subr.msk.bf16.mxu0 %vm6293_vm4, %v5505_v22 }
  0xf7   : > { %5625 = vmatpush3.bf16.msk.msra.mxu0 %vm6293_vm4, %v5505_v22 }
  0xf8   : > { %5626 = vmatprep.subr.msk.bf16.mxu0 %vm6293_vm4, %v5508_v26 }
  0xf9   : > { %396 = vrot.lane.b32.xlu0 %v6303_v27, %s6169_s11  ;;  %815 = vrot.lane.b32.xlu1 %v6305_v28, %s6169_s11 }
  0xfb   : > { %5627 = vmatpush3.bf16.msk.msra.mxu0 %vm6293_vm4, %v5508_v26 }
  0xfc   : > { %5628 = vmatprep.subr.msk.bf16.mxu0 %vm6315_vm8, %v5505_v22 }
  0xfd   : > { %408 = vrot.lane.b32.xlu0 %v6303_v27, %s6168_s10  ;;  %839 = vrot.lane.b32.xlu1 %v6305_v28, %s6170_s17 }
  0xff   : > { %5629 = vmatpush3.bf16.msk.msra.mxu0 %vm6315_vm8, %v5505_v22 }
 0x100   : > { %5630 = vmatprep.subr.msk.bf16.mxu0 %vm6315_vm8, %v5508_v26 }
 0x101   : > { %420 = vrot.lane.b32.xlu0 %v6303_v27, %s6170_s17  ;;  %398 = vrot.lane.b32.xlu1 %v6327_v30, %s6169_s11 }
 0x103   : > { %5631 = vmatpush3.bf16.msk.msra.mxu0 %vm6315_vm8, %v5508_v26 }
 0x104   : > { %5632 = vmatprep.subr.msk.bf16.mxu0 %vm6337_vm12, %v5505_v22 }
 0x105   : > { %809 = vrot.lane.b32.xlu0 %v6291_v21, %s6169_s11  ;;  %410 = vrot.lane.b32.xlu1 %v6327_v30, %s6168_s10 }
 0x107   : > { %5633 = vmatpush3.bf16.msk.msra.mxu0 %vm6337_vm12, %v5505_v22 }
 0x108   : > { %5634 = vmatprep.subr.msk.bf16.mxu0 %vm6337_vm12, %v5508_v26 }
 0x109   : > { %821 = vrot.lane.b32.xlu0 %v6291_v21, %s6168_s10  ;;  %422 = vrot.lane.b32.xlu1 %v6327_v30, %s6170_s17 }
 0x10b   : > { %5635 = vmatpush3.bf16.msk.msra.mxu0 %vm6337_vm12, %v5508_v26 }
 0x10c   : > { %5636 = vmatprep.subr.msk.bf16.mxu0 %vm6357_vm14, %v5505_v22 }
 0x10d   : > { %392 = vrot.lane.b32.xlu0 %v6361_v33, %s6169_s11  ;;  %811 = vrot.lane.b32.xlu1 %v6363_v34, %s6169_s11 }
 0x10f   : > { %5637 = vmatpush3.bf16.msk.msra.mxu0 %vm6357_vm14, %v5505_v22 }
 0x110   : > { %5638 = vmatprep.subr.msk.bf16.mxu0 %vm6357_vm14, %v5508_v26 }
 0x111   : > { %404 = vrot.lane.b32.xlu0 %v6361_v33, %s6168_s10  ;;  %835 = vrot.lane.b32.xlu1 %v6363_v34, %s6170_s17 }
 0x113   : > { %5639 = vmatpush3.bf16.msk.msra.mxu0 %vm6357_vm14, %v5508_v26 }
 0x115   : > { %416 = vrot.lane.b32.xlu0 %v6361_v33, %s6170_s17  ;;  %394 = vrot.lane.b32.xlu1 %v6381_v35, %s6169_s11 }
 0x119   : > { %827 = vrot.lane.b32.xlu0 %v6305_v28, %s6168_s10  ;;  %406 = vrot.lane.b32.xlu1 %v6381_v35, %s6168_s10 }
 0x11d   : > { %823 = vrot.lane.b32.xlu0 %v6363_v34, %s6168_s10  ;;  %418 = vrot.lane.b32.xlu1 %v6381_v35, %s6170_s17 }
 0x163   : > { %v826_v41 = vpop.permute.xlu1 %825  ;;  %v814_v42 = vpop.permute.xlu0 %813 }
 0x164   : > { %v981_v45 = vcombine.low %v6285_v18, %v826_v41  ;;  %v982_v46 = vcombine.high %v6285_v18, %v826_v41 }
 0x166   : > { %v989_v51 = vrot.slane %v981_v45, %v6398_v44  ;;  %v996_v52 = vrot.slane %v982_v46, %v6398_v44 }
 0x167   : > { %v838_v47 = vpop.permute.xlu0 %837  ;;  %v834_v12 = vpop.permute.xlu1 %833 }
 0x168   : > { %v997_v48 = vcombine.low %v814_v42, %v838_v47  ;;  %v998_v49 = vcombine.high %v814_v42, %v838_v47 }
 0x16a   : > { %v1005_v53 = vrot.slane %v997_v48, %v6398_v44  ;;  %v1012_v54 = vrot.slane %v998_v49, %v6398_v44 }
 0x16b   : > { %v397_v55 = vpop.permute.xlu0 %396 }
 0x16c   : > { %v1029_v56 = vcombine.low %v996_v52, %v1012_v54  ;;  %v1013_v57 = vcombine.low %v989_v51, %v1005_v53  ;;  %v1014_v60 = vcombine.high %v989_v51, %v1005_v53  ;;  %v1030_v1 = vcombine.high %v996_v52, %v1012_v54 }
 0x16e   : > { %v6410_v58 = vrot.slane %v1029_v56, %v6403_v50  ;;  %v1021_v59 = vrot.slane %v1013_v57, %v6403_v50  ;;  %v1028_v0 = vrot.slane %v1014_v60, %v6403_v50  ;;  %v6421_v8 = vrot.slane %v1030_v1, %v6403_v50  ;;  %v6450_v57 = vpop.permute.xlu1 %815 }
 0x16f   : > { %v409_v61 = vpop.permute.xlu0 %408 }
 0x170   : > { %v1177_v62 = vsel %vm700_vm15, %v6410_v58, 0.0  ;;  %v1165_v63 = vsel %vm700_vm15, %v1021_v59, 0.0  ;;  %v564_v2 = vcombine.low %v6303_v27, %v409_v61  ;;  %v1171_v7 = vsel %vm700_vm15, %v1028_v0, 0.0 }
 0x171   : > { %1178 = vadd.xlane.f32.xlu0 %v1177_v62  ;;  %1166 = vadd.xlane.f32.xlu1 %v1165_v63  ;;  %v565_v9 = vcombine.high %v6303_v27, %v409_v61  ;;  %v1183_v18 = vsel %vm700_vm15, %v6421_v8, 0.0  ;;  %v8543_v61 = vmov 0.0  }
 0x172   : > { %v572_v10 = vrot.slane %v564_v2, %v6398_v44  ;;  %v1045_v62 = vcombine.high %v1021_v59, %v8543_v61 }
 0x173   : > { %v421_v3 = vpop.permute.xlu0 %420  ;;  %v579_v20 = vrot.slane %v565_v9, %v6398_v44  ;;  %v6464_v9 = vpop.permute.xlu1 %839 }
 0x174   : > { %v580_v4 = vcombine.low %v397_v55, %v421_v3  ;;  %v581_v5 = vcombine.high %v397_v55, %v421_v3 }
 0x175   : > { %1172 = vadd.xlane.f32.xlu1 %v1171_v7 }
 0x176   : > { %v588_v6 = vrot.slane %v580_v4, %v6398_v44  ;;  %v595_v14 = vrot.slane %v581_v5, %v6398_v44  ;;  %v1168_v4 = vsel %vm700_vm15, %v1045_v62, 0.0  ;;  %v1046_v5 = vcombine.high %v1028_v0, %v8543_v61 }
 0x177   : > { %v810_v11 = vpop.permute.xlu0 %809 }
 0x178   : > { %v596_v16 = vcombine.low %v572_v10, %v588_v6  ;;  %v861_v17 = vcombine.low %v810_v11, %v834_v12  ;;  %v597_v19 = vcombine.high %v572_v10, %v588_v6  ;;  %v612_v27 = vcombine.low %v579_v20, %v595_v14 }
 0x179   : > { %1184 = vadd.xlane.f32.xlu1 %v1183_v18  ;;  %v862_v41 = vcombine.high %v810_v11, %v834_v12  ;;  %v613_v45 = vcombine.high %v579_v20, %v595_v14  ;;  %v1174_v11 = vsel %vm700_vm15, %v1046_v5, 0.0  ;;  %v6474_v18 = vpop.permute.xlu1 %398 }
 0x17a   : > { %v604_v24 = vrot.slane %v596_v16, %v6403_v50  ;;  %v869_v36 = vrot.slane %v861_v17, %v6398_v44  ;;  %v611_v39 = vrot.slane %v597_v19, %v6403_v50  ;;  %v620_v49 = vrot.slane %v612_v27, %v6403_v50 }
 0x17b   : > { %v822_v22 = vpop.permute.xlu0 %821  ;;  %v627_v55 = vrot.slane %v613_v45, %v6403_v50  ;;  %v1047_v16 = vcombine.high %v6410_v58, %v8543_v61 }
 0x17c   : > { %v845_v25 = vcombine.low %v6291_v21, %v822_v22  ;;  %v749_v26 = vsel %vm700_vm15, %v604_v24, 0.0  ;;  %v846_v37 = vcombine.high %v6291_v21, %v822_v22  ;;  %v755_v47 = vsel %vm700_vm15, %v611_v39, 0.0 }
 0x17d   : > { %750 = vadd.xlane.f32.xlu1 %v749_v26  ;;  %v876_v21 = vrot.slane %v862_v41, %v6398_v44  ;;  %v761_v54 = vsel %vm700_vm15, %v620_v49, 0.0  ;;  %v767_v63 = vsel %vm700_vm15, %v627_v55, 0.0  ;;  %v628_v12 = vcombine.high %v604_v24, %v8543_v61 }
 0x17e   : > { %v853_v38 = vrot.slane %v845_v25, %v6398_v44  ;;  %v860_v46 = vrot.slane %v846_v37, %v6398_v44  ;;  %v629_v20 = vcombine.high %v611_v39, %v8543_v61  ;;  %v1180_v24 = vsel %vm700_vm15, %v1047_v16, 0.0 }
 0x17f   : > { %v393_v40 = vpop.permute.xlu0 %392  ;;  %v752_v19 = vsel %vm700_vm15, %v628_v12, 0.0  ;;  %v1048_v25 = vcombine.high %v6421_v8, %v8543_v61  ;;  %v631_v45 = vcombine.high %v627_v55, %v8543_v61 }
 0x180   : > { %v877_v42 = vcombine.low %v853_v38, %v869_v36  ;;  %v878_v43 = vcombine.high %v853_v38, %v869_v36  ;;  %v893_v56 = vcombine.low %v860_v46, %v876_v21  ;;  %v894_v2 = vcombine.high %v860_v46, %v876_v21 }
 0x181   : > { %756 = vadd.xlane.f32.xlu1 %v755_v47  ;;  %v758_v27 = vsel %vm700_vm15, %v629_v20, 0.0  ;;  %v630_v36 = vcombine.high %v620_v49, %v8543_v61  ;;  %v1186_v39 = vsel %vm700_vm15, %v1048_v25, 0.0  ;;  %v1066_v21 = vcombine.high %v6450_v57, %v6464_v9 }
 0x182   : > { %v6439_v48 = vrot.slane %v877_v42, %v6403_v50  ;;  %v6446_v53 = vrot.slane %v878_v43, %v6403_v50  ;;  %v6457_v1 = vrot.slane %v893_v56, %v6403_v50  ;;  %v908_v59 = vrot.slane %v894_v2, %v6403_v50  ;;  %v6487_v42 = vpop.permute.xlu1 %410 }
 0x183   : > { %v405_v51 = vpop.permute.xlu0 %404  ;;  %v764_v43 = vsel %vm700_vm15, %v630_v36, 0.0 }
 0x184   : > { %v1117_v52 = vsel %vm700_vm15, %v6439_v48, 0.0  ;;  %v1123_v60 = vsel %vm700_vm15, %v6446_v53, 0.0  ;;  %v1129_v7 = vsel %vm700_vm15, %v6457_v1, 0.0  ;;  %v428_v10 = vcombine.low %v6361_v33, %v405_v51 }
 0x185   : > { %1118 = vadd.xlane.f32.xlu0 %v1117_v52  ;;  %762 = vadd.xlane.f32.xlu1 %v761_v54  ;;  %v1135_v0 = vsel %vm700_vm15, %v908_v59, 0.0  ;;  %v429_v58 = vcombine.high %v6361_v33, %v405_v51  ;;  %v770_v54 = vsel %vm700_vm15, %v631_v45, 0.0  ;;  %v910_v55 = vcombine.high %v6446_v53, %v8543_v61 }
 0x186   : > { %v436_v17 = vrot.slane %v428_v10, %v6398_v44  ;;  %v6497_v51 = vpop.permute.xlu1 %422  ;;  %v1065_v10 = vcombine.low %v6450_v57, %v6464_v9  ;;  %v911_v20 = vcombine.high %v6457_v1, %v8543_v61  ;;  %v632_v1 = vcombine.low %v6327_v30, %v6487_v42 }
 0x187   : > { %v417_v3 = vpop.permute.xlu0 %416  ;;  %v443_v8 = vrot.slane %v429_v58, %v6398_v44  ;;  %v1126_v2 = vsel %vm700_vm15, %v910_v55, 0.0 }
 0x188   : > { %v444_v6 = vcombine.low %v393_v40, %v417_v3  ;;  %v445_v22 = vcombine.high %v393_v40, %v417_v3  ;;  %v912_v3 = vcombine.high %v908_v59, %v8543_v61  ;;  %v1132_v58 = vsel %vm700_vm15, %v911_v20, 0.0 }
 0x189   : > { %1124 = vadd.xlane.f32.xlu0 %v1123_v60  ;;  %768 = vadd.xlane.f32.xlu1 %v767_v63  ;;  %v1080_v63 = vrot.slane %v1066_v21, %v6398_v44 }
 0x18a   : > { %v452_v14 = vrot.slane %v444_v6, %v6398_v44  ;;  %v459_v37 = vrot.slane %v445_v22, %v6398_v44 }
 0x18b   : > { %v828_v38 = vpop.permute.xlu0 %827 }
 0x18c   : > { %v460_v26 = vcombine.low %v436_v17, %v452_v14  ;;  %v461_v41 = vcombine.high %v436_v17, %v452_v14  ;;  %v1050_v33 = vcombine.high %v6305_v28, %v828_v38  ;;  %v476_v49 = vcombine.low %v443_v8, %v459_v37 }
 0x18d   : > { %1169 = vadd.xlane.f32.xlu0 %v1168_v4  ;;  %1130 = vadd.xlane.f32.xlu1 %v1129_v7  ;;  %v477_v62 = vcombine.high %v443_v8, %v459_v37  ;;  %v1049_v5 = vcombine.low %v6305_v28, %v828_v38  ;;  %v812_v7 = vpop.permute.xlu1 %811  ;;  %v909_v14 = vcombine.high %v6439_v48, %v8543_v61 }
 0x18e   : > { %v468_v40 = vrot.slane %v460_v26, %v6403_v50  ;;  %v475_v47 = vrot.slane %v461_v41, %v6403_v50  ;;  %v6500_v52 = vrot.slane %v1050_v33, %v6398_v44  ;;  %v484_v60 = vrot.slane %v476_v49, %v6403_v50 }
 0x18f   : > { %v491_v6 = vrot.slane %v477_v62, %v6403_v50  ;;  %v1057_v59 = vrot.slane %v1049_v5, %v6398_v44  ;;  %v824_v17 = vpop.permute.xlu0 %823  ;;  %v648_v26 = vcombine.low %v6474_v18, %v6497_v51 }
 0x190   : > { %v701_v46 = vsel %vm700_vm15, %v468_v40, 0.0  ;;  %v707_v56 = vsel %vm700_vm15, %v475_v47, 0.0  ;;  %v1097_v4 = vcombine.low %v6500_v52, %v1080_v63  ;;  %v713_v53 = vsel %vm700_vm15, %v484_v60, 0.0 }
 0x191   : > { %1175 = vadd.xlane.f32.xlu0 %v1174_v11  ;;  %1136 = vadd.xlane.f32.xlu1 %v1135_v0  ;;  %v1138_v11 = vsel %vm700_vm15, %v912_v3, 0.0  ;;  %v719_v28 = vsel %vm700_vm15, %v491_v6, 0.0  ;;  %v1073_v0 = vrot.slane %v1065_v10, %v6398_v44  ;;  %v836_v16 = vpop.permute.xlu1 %835  ;;  %v492_v9 = vcombine.high %v468_v40, %v8543_v61 }
 0x192   : > { %v6518_v12 = vrot.slane %v1097_v4, %v6403_v50  ;;  %v913_v48 = vcombine.low %v6363_v34, %v824_v17  ;;  %v493_v25 = vcombine.high %v475_v47, %v8543_v61  ;;  %v929_v37 = vcombine.low %v812_v7, %v836_v16 }
 0x193   : > { %v1081_v22 = vcombine.low %v1057_v59, %v1073_v0  ;;  %v1082_v36 = vcombine.high %v1057_v59, %v1073_v0  ;;  %v494_v8 = vcombine.high %v484_v60, %v8543_v61  ;;  %v656_v33 = vrot.slane %v648_v26, %v6398_v44 }
 0x194   : > { %v1201_v57 = vsel %vm700_vm15, %v6518_v12, 0.0  ;;  %v921_v40 = vrot.slane %v913_v48, %v6398_v44  ;;  %v710_v41 = vsel %vm700_vm15, %v493_v25, 0.0  ;;  %v930_v47 = vcombine.high %v812_v7, %v836_v16 }
 0x195   : > { %753 = vadd.xlane.f32.xlu0 %v752_v19  ;;  %1181 = vadd.xlane.f32.xlu1 %v1180_v24  ;;  %v1120_v19 = vsel %vm700_vm15, %v909_v14, 0.0  ;;  %v704_v24 = vsel %vm700_vm15, %v492_v9, 0.0  ;;  %v6538_v38 = vpop.permute.xlu1 %394  ;;  %v1096_v45 = vrot.slane %v1082_v36, %v6403_v50  ;;  %v937_v49 = vrot.slane %v929_v37, %v6398_v44 }
 0x196   : > { %v716_v55 = vsel %vm700_vm15, %v494_v8, 0.0 }
 0x197   : > { %v946_v60 = vcombine.high %v921_v40, %v937_v49  ;;  %v1195_v62 = vsel %vm700_vm15, %v1096_v45, 0.0  ;;  %v945_v16 = vcombine.low %v921_v40, %v937_v49  ;;  %v1114_v26 = vcombine.high %v1096_v45, %v8543_v61 }
 0x198   : > { %v1115_v40 = vcombine.high %v6518_v12, %v8543_v61  ;;  %v649_v49 = vcombine.high %v6474_v18, %v6497_v51 }
 0x199   : > { %759 = vadd.xlane.f32.xlu0 %v758_v27  ;;  %1187 = vadd.xlane.f32.xlu1 %v1186_v39  ;;  %v1089_v27 = vrot.slane %v1081_v22, %v6403_v50  ;;  %v914_v39 = vcombine.high %v6363_v34, %v824_v17  ;;  %v640_v34 = vrot.slane %v632_v1, %v6398_v44  ;;  %v407_v21 = vpop.permute.xlu1 %406 }
 0x19a   : > { %v6560_v4 = vrot.slane %v946_v60, %v6403_v50  ;;  %v953_v22 = vrot.slane %v945_v16, %v6403_v50  ;;  %v497_v1 = vcombine.high %v6381_v35, %v407_v21  ;;  %v1204_v45 = vsel %vm700_vm15, %v1115_v40, 0.0 }
 0x19b   : > { %v665_v7 = vcombine.high %v640_v34, %v656_v33  ;;  %v1113_v17 = vcombine.high %v1089_v27, %v8543_v61  ;;  %v633_v60 = vcombine.high %v6327_v30, %v6487_v42 }
 0x19d   : > { %765 = vadd.xlane.f32.xlu0 %v764_v43  ;;  %702 = vadd.xlane.f32.xlu1 %v701_v46  ;;  %v1189_v43 = vsel %vm700_vm15, %v1089_v27, 0.0  ;;  %v1098_v46 = vcombine.high %v6500_v52, %v1080_v63  ;;  %v664_v52 = vcombine.low %v640_v34, %v656_v33  ;;  %v944_v63 = vrot.slane %v930_v47, %v6398_v44  ;;  %v419_v10 = vpop.permute.xlu1 %418 }
 0x19e   : > { %v679_v0 = vrot.slane %v665_v7, %v6403_v50  ;;  %v1192_v25 = vsel %vm700_vm15, %v1113_v17, 0.0  ;;  %v1141_v27 = vsel %vm700_vm15, %v953_v22, 0.0  ;;  %v978_v7 = vcombine.high %v6560_v4, %v8543_v61 }
 0x1a0   : > { %v779_v20 = vsel %vm700_vm15, %v679_v0, 0.0  ;;  %v697_v18 = vcombine.high %v679_v0, %v8543_v61 }
 0x1a1   : > { %771 = vadd.xlane.f32.xlu0 %v770_v54  ;;  %708 = vadd.xlane.f32.xlu1 %v707_v56  ;;  %v928_v54 = vrot.slane %v914_v39, %v6398_v44  ;;  %v495_v56 = vcombine.high %v491_v6, %v8543_v61  ;;  %v672_v6 = vrot.slane %v664_v52, %v6403_v50  ;;  %v1198_v39 = vsel %vm700_vm15, %v1114_v26, 0.0 }
 0x1a3   : > { %v722_v3 = vsel %vm700_vm15, %v495_v56, 0.0  ;;  %v961_v5 = vcombine.low %v928_v54, %v944_v63  ;;  %v773_v14 = vsel %vm700_vm15, %v672_v6, 0.0  ;;  %v962_v48 = vcombine.high %v928_v54, %v944_v63 }
 0x1a4   : > { %v647_v63 = vrot.slane %v633_v60, %v6398_v44 }
 0x1a5   : > { %1127 = vadd.xlane.f32.xlu0 %v1126_v2  ;;  %714 = vadd.xlane.f32.xlu1 %v713_v53  ;;  %v1112_v2 = vrot.slane %v1098_v46, %v6403_v50  ;;  %v6567_v59 = vrot.slane %v961_v5, %v6403_v50  ;;  %v6585_v36 = vrot.slane %v962_v48, %v6403_v50 }
 0x1a6   : > { %v977_v5 = vcombine.high %v953_v22, %v8543_v61 }
 0x1a7   : > { %v1207_v53 = vsel %vm700_vm15, %v1112_v2, 0.0  ;;  %v1153_v9 = vsel %vm700_vm15, %v6567_v59, 0.0 }
 0x1a9   : > { %1139 = vadd.xlane.f32.xlu0 %v1138_v11  ;;  %720 = vadd.xlane.f32.xlu1 %v719_v28  ;;  %v1147_v11 = vsel %vm700_vm15, %v6560_v4, 0.0  ;;  %v512_v28 = vcombine.low %v6538_v38, %v419_v10 }
 0x1ad   : > { %1202 = vadd.xlane.f32.xlu0 %v1201_v57  ;;  %1121 = vadd.xlane.f32.xlu1 %v1120_v19  ;;  %v496_v57 = vcombine.low %v6381_v35, %v407_v21  ;;  %v520_v19 = vrot.slane %v512_v28, %v6398_v44  ;;  %v1116_v35 = vcombine.high %v1112_v2, %v8543_v61 }
 0x1ae   : > { %v696_v21 = vcombine.high %v672_v6, %v8543_v61  ;;  %v1144_v6 = vsel %vm700_vm15, %v977_v5, 0.0 }
 0x1af   : > { %v1210_v34 = vsel %vm700_vm15, %v1116_v35, 0.0 }
 0x1b0   : > { %v776_v2 = vsel %vm700_vm15, %v696_v21, 0.0 }
 0x1b1   : > { %705 = vadd.xlane.f32.xlu0 %v704_v24  ;;  %1133 = vadd.xlane.f32.xlu1 %v1132_v58  ;;  %v504_v24 = vrot.slane %v496_v57, %v6398_v44  ;;  %v513_v58 = vcombine.high %v6538_v38, %v419_v10  ;;  %v1159_v38 = vsel %vm700_vm15, %v6585_v36, 0.0 }
 0x1b3   : > { %v528_v37 = vcombine.low %v504_v24, %v520_v19  ;;  %v529_v33 = vcombine.high %v504_v24, %v520_v19  ;;  %v980_v19 = vcombine.high %v6585_v36, %v8543_v61 }
 0x1b5   : > { %711 = vadd.xlane.f32.xlu0 %v710_v41  ;;  %1190 = vadd.xlane.f32.xlu1 %v1189_v43  ;;  %v527_v41 = vrot.slane %v513_v58, %v6398_v44  ;;  %v536_v8 = vrot.slane %v528_v37, %v6403_v50  ;;  %v511_v43 = vrot.slane %v497_v1, %v6398_v44 }
 0x1b6   : > { %v543_v12 = vrot.slane %v529_v33, %v6403_v50 }
 0x1b7   : > { %v725_v46 = vsel %vm700_vm15, %v536_v8, 0.0  ;;  %v544_v47 = vcombine.low %v511_v43, %v527_v41  ;;  %v545_v56 = vcombine.high %v511_v43, %v527_v41  ;;  %v560_v22 = vcombine.high %v536_v8, %v8543_v61 }
 0x1b8   : > { %v731_v54 = vsel %vm700_vm15, %v543_v12, 0.0  ;;  %v561_v24 = vcombine.high %v543_v12, %v8543_v61 }
 0x1b9   : > { %717 = vadd.xlane.f32.xlu0 %v716_v55  ;;  %1196 = vadd.xlane.f32.xlu1 %v1195_v62  ;;  %v552_v55 = vrot.slane %v544_v47, %v6403_v50  ;;  %v663_v62 = vrot.slane %v649_v49, %v6398_v44  ;;  %v559_v52 = vrot.slane %v545_v56, %v6403_v50  ;;  %v728_v48 = vsel %vm700_vm15, %v560_v22, 0.0 }
 0x1bb   : > { %v737_v51 = vsel %vm700_vm15, %v552_v55, 0.0  ;;  %v680_v30 = vcombine.low %v647_v63, %v663_v62  ;;  %v743_v42 = vsel %vm700_vm15, %v559_v52, 0.0  ;;  %v562_v26 = vcombine.high %v552_v55, %v8543_v61 }
 0x1bc   : > { %v563_v36 = vcombine.high %v559_v52, %v8543_v61 }
 0x1bd   : > { %723 = vadd.xlane.f32.xlu0 %v722_v3  ;;  %1208 = vadd.xlane.f32.xlu1 %v1207_v53  ;;  %v782_v3 = vsel %vm700_vm15, %v697_v18, 0.0  ;;  %v979_v53 = vcombine.high %v6567_v59, %v8543_v61  ;;  %v688_v10 = vrot.slane %v680_v30, %v6403_v50 }
 0x1be   : > { %v746_v1 = vsel %vm700_vm15, %v563_v36, 0.0 }
 0x1bf   : > { %v1156_v28 = vsel %vm700_vm15, %v979_v53, 0.0  ;;  %v698_v0 = vcombine.high %v688_v10, %v8543_v61  ;;  %v785_v59 = vsel %vm700_vm15, %v688_v10, 0.0 }
 0x1c1   : > { %1148 = vadd.xlane.f32.xlu0 %v1147_v11  ;;  %774 = vadd.xlane.f32.xlu1 %v773_v14  ;;  %v681_v11 = vcombine.high %v647_v63, %v663_v62  ;;  %v1150_v14 = vsel %vm700_vm15, %v978_v7, 0.0  ;;  %v788_v57 = vsel %vm700_vm15, %v698_v0, 0.0 }
 0x1c3   : > { %v695_v16 = vrot.slane %v681_v11, %v6403_v50 }
 0x1c5   : > { %1154 = vadd.xlane.f32.xlu0 %v1153_v9  ;;  %780 = vadd.xlane.f32.xlu1 %v779_v20  ;;  %v699_v4 = vcombine.high %v695_v16, %v8543_v61  ;;  %v791_v9 = vsel %vm700_vm15, %v695_v16, 0.0  ;;  %v1162_v20 = vsel %vm700_vm15, %v980_v19, 0.0 }
 0x1c7   : > { %v794_v17 = vsel %vm700_vm15, %v699_v4, 0.0 }
 0x1c9   : > { %1193 = vadd.xlane.f32.xlu0 %v1192_v25  ;;  %1142 = vadd.xlane.f32.xlu1 %v1141_v27  ;;  %v734_v25 = vsel %vm700_vm15, %v561_v24, 0.0  ;;  %v740_v27 = vsel %vm700_vm15, %v562_v26, 0.0 }
 0x1cd   : > { %1199 = vadd.xlane.f32.xlu0 %v1198_v39  ;;  %1160 = vadd.xlane.f32.xlu1 %v1159_v38 }
 0x1d1   : > { %1205 = vadd.xlane.f32.xlu0 %v1204_v45  ;;  %726 = vadd.xlane.f32.xlu1 %v725_v46 }
 0x1d5   : > { %1211 = vadd.xlane.f32.xlu0 %v1210_v34  ;;  %732 = vadd.xlane.f32.xlu1 %v731_v54 }
 0x1d9   : > { %777 = vadd.xlane.f32.xlu0 %v776_v2  ;;  %738 = vadd.xlane.f32.xlu1 %v737_v51 }
 0x1dd   : > { %783 = vadd.xlane.f32.xlu0 %v782_v3  ;;  %744 = vadd.xlane.f32.xlu1 %v743_v42 }
 0x1e1   : > { %1145 = vadd.xlane.f32.xlu0 %v1144_v6  ;;  %1157 = vadd.xlane.f32.xlu1 %v1156_v28 }
 0x1e5   : > { %1151 = vadd.xlane.f32.xlu0 %v1150_v14  ;;  %786 = vadd.xlane.f32.xlu1 %v785_v59 }
 0x1e9   : > { %789 = vadd.xlane.f32.xlu0 %v788_v57  ;;  %792 = vadd.xlane.f32.xlu1 %v791_v9 }
 0x1ed   : > { %795 = vadd.xlane.f32.xlu0 %v794_v17 }
 0x1f1   : > { %1163 = vadd.xlane.f32.xlu0 %v1162_v20 }
 0x1f5   : > { %729 = vadd.xlane.f32.xlu0 %v728_v48 }
 0x1f9   : > { %735 = vadd.xlane.f32.xlu0 %v734_v25 }
 0x1fa   : > { %v6640_v58 = vpop.xlane.xlu1 %1166  ;;  %v6651_v41 = vpop.xlane.xlu0 %1178 }
 0x1fd   : > { %741 = vadd.xlane.f32.xlu0 %v740_v27 }
 0x1fe   : > { %v6644_v37 = vpop.xlane.xlu1 %1172 }
 0x201   : > { %747 = vadd.xlane.f32.xlu0 %v746_v1 }
 0x202   : > { %v6647_v39 = vpop.xlane.xlu1 %1184 }
 0x206   : > { %v6649_v40 = vpop.xlane.xlu1 %750 }
 0x20a   : > { %v6653_v38 = vpop.xlane.xlu1 %756 }
 0x20e   : > { %v1119_v8 = vpop.xlane.xlu0 %1118  ;;  %v6655_v33 = vpop.xlane.xlu1 %762 }
 0x20f   : > { %v1250_v5 = vrot.slane %v1119_v8, %v6283_v15 }
 0x212   : > { %v1125_v43 = vpop.xlane.xlu0 %1124  ;;  %v6657_v45 = vpop.xlane.xlu1 %768 }
 0x213   : > { %v1258_v42 = vrot.slane %v1125_v43, %v6283_v15 }
 0x216   : > { %v6659_v35 = vpop.xlane.xlu0 %1169  ;;  %v1131_v46 = vpop.xlane.xlu1 %1130 }
 0x217   : > { %v1266_v10 = vrot.slane %v1131_v46, %v6283_v15 }
 0x21a   : > { %v6661_v12 = vpop.xlane.xlu0 %1175  ;;  %v1137_v47 = vpop.xlane.xlu1 %1136 }
 0x21b   : > { %v1274_v16 = vrot.slane %v1137_v47, %v6283_v15 }
 0x21e   : > { %v6663_v49 = vpop.xlane.xlu0 %753  ;;  %v6665_v34 = vpop.xlane.xlu1 %1181 }
 0x222   : > { %v6667_v21 = vpop.xlane.xlu0 %759  ;;  %v6669_v54 = vpop.xlane.xlu1 %1187 }
 0x226   : > { %v6671_v55 = vpop.xlane.xlu0 %765  ;;  %v6673_v56 = vpop.xlane.xlu1 %702 }
 0x22a   : > { %v6675_v60 = vpop.xlane.xlu0 %771  ;;  %v6677_v62 = vpop.xlane.xlu1 %708 }
 0x22e   : > { %v1128_v2 = vpop.xlane.xlu0 %1127  ;;  %v6679_v18 = vpop.xlane.xlu1 %714 }
 0x22f   : > { %v1262_v53 = vrot.slane %v1128_v2, %v6283_v15 }
 0x232   : > { %v1140_v51 = vpop.xlane.xlu0 %1139  ;;  %v6681_v52 = vpop.xlane.xlu1 %720 }
 0x233   : > { %v1278_v57 = vrot.slane %v1140_v51, %v6283_v15 }
 0x236   : > { %v6683_v63 = vpop.xlane.xlu0 %1202  ;;  %v1122_v3 = vpop.xlane.xlu1 %1121 }
 0x237   : > { %v1254_v30 = vrot.slane %v1122_v3, %v6283_v15 }
 0x239   : > { %v1376_v6 = vsel %vm1375_vm0, %v1254_v30, %v1250_v5 }
 0x23a   : > { %v6690_v7 = vpop.xlane.xlu0 %705  ;;  %v1378_v11 = vsel %vm1377_vm1, %v1258_v42, %v1376_v6  ;;  %v1134_v28 = vpop.xlane.xlu1 %1133 }
 0x23b   : > { %v1270_v14 = vrot.slane %v1134_v28, %v6283_v15  ;;  %v1380_v0 = vsel %vm1379_vm2, %v1262_v53, %v1378_v11 }
 0x23c   : > { %v1382_v59 = vsel %vm1381_vm3, %v1266_v10, %v1380_v0 }
 0x23d   : > { %v1384_v9 = vsel %vm8555_vm5, %v1270_v14, %v1382_v59  ;;  %v1318_v59 = vrot.slane %v6659_v35, %v6283_v15  ;;  %v1322_v35 = vrot.slane %v6644_v37, %v6283_v15  ;;  %v1330_v37 = vrot.slane %v6651_v41, %v6283_v15 }
 0x23e   : > { %v6699_v4 = vpop.xlane.xlu0 %711  ;;  %v1191_v17 = vpop.xlane.xlu1 %1190  ;;  %v1386_v19 = vsel %vm8548_vm6, %v1274_v16, %v1384_v9  ;;  %v1314_v9 = vrot.slane %v6640_v58, %v6283_v15 }
 0x23f   : > { %v1388_v20 = vsel %vm8545_vm7, %v1278_v57, %v1386_v19 }
 0x240   : > { %1414 = vxpose.xlu1.b32.start [1/4] (short) (narrow) %v1388_v20, 8 }
 0x242   : > { %v6704_v22 = vpop.xlane.xlu0 %717  ;;  %v1197_v48 = vpop.xlane.xlu1 %1196 }
 0x246   : > { %v6706_v24 = vpop.xlane.xlu0 %723  ;;  %v6708_v25 = vpop.xlane.xlu1 %1208 }
 0x24a   : > { %v1149_v26 = vpop.xlane.xlu0 %1148  ;;  %v6710_v27 = vpop.xlane.xlu1 %774 }
 0x24b   : > { %v1290_v57 = vrot.slane %v1149_v26, %v6283_v15 }
 0x24e   : > { %v1155_v36 = vpop.xlane.xlu0 %1154  ;;  %v6712_v1 = vpop.xlane.xlu1 %780 }
 0x252   : > { %v1194_v8 = vpop.xlane.xlu0 %1193  ;;  %v1143_v43 = vpop.xlane.xlu1 %1142 }
 0x253   : > { %v1282_v11 = vrot.slane %v1143_v43, %v6283_v15  ;;  %v1350_v26 = vrot.slane %v1194_v8, %v6283_v15 }
 0x256   : > { %v1200_v46 = vpop.xlane.xlu0 %1199  ;;  %v1161_v47 = vpop.xlane.xlu1 %1160 }
 0x25a   : > { %v1206_v2 = vpop.xlane.xlu0 %1205  ;;  %v6714_v51 = vpop.xlane.xlu1 %726 }
 0x25e   : > { %v1212_v3 = vpop.xlane.xlu0 %1211  ;;  %v6716_v5 = vpop.xlane.xlu1 %732 }
 0x262   : > { %v6718_v30 = vpop.xlane.xlu0 %777  ;;  %v6722_v53 = vpop.xlane.xlu1 %738 }
 0x266   : > { %v6720_v42 = vpop.xlane.xlu0 %783  ;;  %v6726_v28 = vpop.xlane.xlu1 %744 }
 0x26a   : > { %v1146_v6 = vpop.xlane.xlu0 %1145 }
 0x26b   : > { %v1286_v10 = vrot.slane %v1146_v6, %v6283_v15  ;;  %v1396_v6 = vsel %vm1375_vm0, %v1318_v59, %v1314_v9  ;;  %v1358_v9 = vrot.slane %v1200_v46, %v6283_v15  ;;  %v1342_v46 = vrot.slane %v6669_v54, %v6283_v15 }
 0x26c   : > { %v1374_v54 = vrot.slane %v1212_v3, %v6283_v15 }
 0x26d   : > { %v1389_v0 = vsel %vm1375_vm0, %v1286_v10, %v1282_v11  ;;  %v1326_v10 = vrot.slane %v6661_v12, %v6283_v15  ;;  %v1298_v11 = vrot.slane %v1155_v36, %v6283_v15  ;;  %v1334_v36 = vrot.slane %v6665_v34, %v6283_v15 }
 0x26e   : > { %v1152_v14 = vpop.xlane.xlu0 %1151  ;;  %v1390_v19 = vsel %vm1377_vm1, %v1290_v57, %v1389_v0  ;;  %v1397_v57 = vsel %vm1377_vm1, %v1322_v35, %v1396_v6 }
 0x26f   : > { %v1294_v16 = vrot.slane %v1152_v14, %v6283_v15  ;;  %v1158_v14 = vpop.xlane.xlu1 %1157  ;;  %v1398_v12 = vsel %vm1379_vm2, %v1326_v10, %v1397_v57 }
 0x270   : > { %v1302_v59 = vrot.slane %v1158_v14, %v6283_v15  ;;  %v1399_v10 = vsel %vm1381_vm3, %v1330_v37, %v1398_v12  ;;  %v6174_v37 = vmov 1966171168  }
 0x271   : > { %v1391_v43 = vsel %vm1379_vm2, %v1294_v16, %v1390_v19  ;;  %v1346_v16 = vrot.slane %v1191_v17, %v6283_v15  ;;  %v1306_v17 = vrot.slane %v1161_v47, %v6283_v15  ;;  %v1400_v41 = vsel %vm8555_vm5, %v1334_v36, %v1399_v10 }
 0x272   : > { %v6736_v20 = vpop.xlane.xlu0 %789  ;;  %v1392_v0 = vsel %vm1381_vm3, %v1298_v11, %v1391_v43  ;;  %v1354_v43 = vrot.slane %v1197_v48, %v6283_v15  ;;  %v1366_v48 = vrot.slane %v1206_v2, %v6283_v15  ;;  %v1370_v2 = vrot.slane %v6708_v25, %v6283_v15 }
 0x273   : > { %v1403_v8 = vsel %vm1375_vm0, %v1350_v26, %v1346_v16  ;;  %v1393_v19 = vsel %vm8555_vm5, %v1302_v59, %v1392_v0  ;;  %v1338_v26 = vrot.slane %v6647_v39, %v6283_v15  ;;  %v1362_v0 = vrot.slane %v6683_v63, %v6283_v15  ;;  %v6792_v63 = vld [vmem:[%s6789_s25] sm:$0xff] }
 0x274   : > { %v1404_v34 = vsel %vm1377_vm1, %v1354_v43, %v1403_v8  ;;  %v1394_v14 = vsel %vm8548_vm6, %v1306_v17, %v1393_v19  ;;  %v214_v3 = vunpack.c.3.s8 %v6792_v63  ;;  %v1580_v8 = vunpack.c.l.s4 %v6174_v37 }
 0x275   : > { %v1405_v35 = vsel %vm1379_vm2, %v1358_v9, %v1404_v34  ;;  %v1401_v57 = vsel %vm8548_vm6, %v1338_v26, %v1400_v41  ;;  %v211_v25 = vunpack.c.0.s8 %v6792_v63  ;;  %v213_v17 = vunpack.c.2.s8 %v6792_v63 }
 0x276   : > { %v6746_v58 = vpop.xlane.xlu0 %795  ;;  %v1406_v16 = vsel %vm1381_vm3, %v1362_v0, %v1405_v35  ;;  %v1402_v59 = vsel %vm8545_vm7, %v1342_v46, %v1401_v57  ;;  %v222_v9 = vcvt.s32.f32 %v214_v3  ;;  %v1581_v19 = vunpack.c.0.s8 %v1580_v8  ;;  %v787_v46 = vpop.xlane.xlu1 %786 }
 0x277   : > { %v1407_v12 = vsel %vm8555_vm5, %v1366_v48, %v1406_v16  ;;  %v219_v43 = vcvt.s32.f32 %v211_v25  ;;  %v8546_v10 = vmov -1e+30  }
 0x278   : > { %v1408_v39 = vsel %vm8548_vm6, %v1370_v2, %v1407_v12  ;;  %vm230_vm9 = vcmp.gt.f32.partialorder %v222_v9, 0.5 }
 0x279   : > { %v1409_v36 = vsel %vm8545_vm7, %v1374_v54, %v1408_v39  ;;  %vm227_vm10 = vcmp.gt.f32.partialorder %v219_v43, 0.5  ;;  %v238_v34 = vsel %vm230_vm9, 0.0, %v8546_v10  ;;  %v6818_v54 = vsub.s32 0, %v6279_v13 }
 0x27a   : > { %v1164_v6 = vpop.xlane.xlu0 %1163  ;;  %v1725_v48 = vcombine.high %v238_v34, %v238_v34  ;;  %v793_v2 = vpop.xlane.xlu1 %792 }
 0x27b   : > { %v1310_v11 = vrot.slane %v1164_v6, %v6283_v15  ;;  %v6798_v6 = vsub.s32 %v1581_v19, %v6279_v13 }
 0x27d   : > { %v1395_v47 = vsel %vm8545_vm7, %v1310_v11, %v1394_v14  ;;  %v221_v11 = vcvt.s32.f32 %v213_v17  ;;  %v235_v14 = vsel %vm227_vm10, 0.0, %v8546_v10  ;;  %v6803_v41 = vrot.slane %v238_v34, %v6798_v6 }
 0x27e   : > { %1415 = vxpose.xlu1.b32.cont [2/4] (short) (narrow) %v1395_v47, 8  ;;  %v1585_v35 = vrot.slane %v235_v14, %v6798_v6  ;;  %v6815_v16 = vrot.slane %v1725_v48, %v6798_v6  ;;  %v1578_v8 = vcombine.high %v235_v14, %v235_v14 }
 0x27f   : > { %vm229_vm11 = vcmp.gt.f32.partialorder %v221_v11, 0.5  ;;  %v6808_v47 = vrot.slane %v6803_v41, %v6798_v6 }
 0x280   : > { %v1601_v26 = vrot.slane %v1585_v35, %v6798_v6  ;;  %v6812_v0 = vsel %vm229_vm11, 0.0, %v8546_v10  ;;  %v1593_v57 = vcombine.high %v1585_v35, %v1585_v35  ;;  %v1755_v39 = vrot.slane %v6815_v16, %v6798_v6 }
 0x281   : > { %v1770_v12 = vcombine.high %v6808_v47, %v6808_v47  ;;  %v1592_v29 = vrot.slane %v1578_v8, %v6798_v6 }
 0x282   : > { %1416 = vxpose.xlu1.b32.cont [3/4] (short) (narrow) %v1402_v59, 8  ;;  %v6822_v59 = vrot.slane %v6812_v0, %v6798_v6  ;;  %v1615_v13 = vrot.slane %v1593_v57, %v6798_v6  ;;  %v1777_v25 = vrot.slane %v1601_v26, %v6818_v54  ;;  %v1889_v17 = vrot.slane %v1755_v39, %v6818_v54 }
 0x283   : > { %v1881_v9 = vrot.slane %v1770_v12, %v6818_v54  ;;  %v1771_v34 = vcombine.high %v1755_v39, %v1755_v39 }
 0x284   : > { %v6830_v3 = vrot.slane %v6822_v59, %v6798_v6  ;;  %v1781_v43 = vrot.slane %v1615_v13, %v6818_v54 }
 0x286   : > { %1417 = vxpose.xlu1.b32.end [4/4] (short) (narrow) %v1409_v36, 8  ;;  %v1623_v36 = vcombine.high %v1601_v26, %v1601_v26  ;;  %v1841_v37 = vrot.slane %v6830_v3, %v6818_v54 }
 0x288   : > { %v1785_v11 = vrot.slane %v1623_v36, %v6818_v54 }
 0x2f6   : > { %v6837_v19 = vpop.trf.xlu1 }
 0x2f7   : > { %v1462_v35 = vadd.f32 %v6837_v19, %v6649_v40  ;;  %v1446_v48 = vadd.f32 %v6837_v19, %v6673_v56  ;;  %v1472_v14 = vadd.f32 %v6837_v19, %v6712_v1  ;;  %v1447_v26 = vadd.f32 %v6837_v19, %v6690_v7 }
 0x2f8   : > { %v1474_v57 = vadd.f32 %v6837_v19, %v787_v46  ;;  %v1448_v12 = vadd.f32 %v6837_v19, %v6677_v62  ;;  %v1476_v36 = vadd.f32 %v6837_v19, %v793_v2  ;;  %v1449_v39 = vadd.f32 %v6837_v19, %v6699_v4 }
 0x2f9   : > { %vm1494_vm9 = vcmp.ge.f32.partialorder %v1462_v35, 0.0  ;;  %v1526_v40 = vmul.f32 0.2, %v1462_v35  ;;  %vm1478_vm10 = vcmp.ge.f32.partialorder %v1446_v48, 0.0  ;;  %v1510_v56 = vmul.f32 0.2, %v1446_v48 }
 0x2fa   : > { %vm1504_vm11 = vcmp.ge.f32.partialorder %v1472_v14, 0.0  ;;  %v1536_v61 = vmul.f32 0.2, %v1472_v14  ;;  %vm1479_vm7 = vcmp.ge.f32.partialorder %v1447_v26, 0.0  ;;  %v1511_v1 = vmul.f32 0.2, %v1447_v26 }
 0x2fb   : > { %v1558_v10 = vsel %vm1494_vm9, %v1462_v35, %v1526_v40  ;;  %v1542_v7 = vsel %vm1478_vm10, %v1446_v48, %v1510_v56  ;;  %vm1506_vm6 = vcmp.ge.f32.partialorder %v1474_v57, 0.0  ;;  %v1538_v46 = vmul.f32 0.2, %v1474_v57 }
 0x2fc   : > { %v6856_v15 = vadd.f32 %v1841_v37, %v1558_v10  ;;  %v6858_v62 = vadd.f32 %v1777_v25, %v1542_v7  ;;  %v1568_v2 = vsel %vm1504_vm11, %v1472_v14, %v1536_v61  ;;  %v1543_v32 = vsel %vm1479_vm7, %v1447_v26, %v1511_v1 }
 0x2fd   : > { %v6860_v31 = vadd.f32 %v1881_v9, %v1568_v2  ;;  %vm1480_vm5 = vcmp.ge.f32.partialorder %v1448_v12, 0.0  ;;  %v1625_v4 = vcombine.high %v1615_v13, %v1615_v13  ;;  %v6867_v48 = vadd.f32 %v1781_v43, %v1543_v32 }
 0x2fe   : > { %v2015_v23 = vsel %vm1966_vm13, %v6856_v15, -inf  ;;  %v1967_v35 = vsel %vm1966_vm13, %v6858_v62, -inf  ;;  %v1512_v10 = vmul.f32 0.2, %v1448_v12  ;;  %v1570_v61 = vsel %vm1506_vm6, %v1474_v57, %v1538_v46 }
 0x2ff   : > { %2016 = vmax.xlane.f32.xlu1 %v2015_v23  ;;  %1968 = vmax.xlane.f32.xlu0 %v1967_v35  ;;  %v1540_v37 = vmul.f32 0.2, %v1476_v36  ;;  %v1897_v25 = vrot.slane %v1771_v34, %v6818_v54  ;;  %vm1508_vm7 = vcmp.ge.f32.partialorder %v1476_v36, 0.0  ;;  %vm1481_vm9 = vcmp.ge.f32.partialorder %v1449_v39, 0.0 }
 0x300   : > { %v1544_v9 = vsel %vm1480_vm5, %v1448_v12, %v1512_v10  ;;  %v1513_v13 = vmul.f32 0.2, %v1449_v39  ;;  %v1789_v8 = vrot.slane %v1625_v4, %v6818_v54  ;;  %v1450_v14 = vadd.f32 %v6837_v19, %v6679_v18 }
 0x301   : > { %v1608_v32 = vrot.slane %v1592_v29, %v6798_v6  ;;  %v1594_v43 = vcombine.high %v1592_v29, %v1592_v29  ;;  %v2045_v23 = vsel %vm1966_vm13, %v6860_v31, -inf  ;;  %v1970_v26 = vsel %vm1966_vm13, %v6867_v48, -inf }
 0x302   : > { %v6879_v57 = vadd.f32 %v1889_v17, %v1570_v61  ;;  %v6881_v34 = vadd.f32 %v1785_v11, %v1544_v9  ;;  %v1572_v12 = vsel %vm1508_vm7, %v1476_v36, %v1540_v37  ;;  %v1545_v40 = vsel %vm1481_vm9, %v1449_v39, %v1513_v13 }
 0x303   : > { %2046 = vmax.xlane.f32.xlu1 %v2045_v23  ;;  %1971 = vmax.xlane.f32.xlu0 %v1970_v26  ;;  %v1514_v56 = vmul.f32 0.2, %v1450_v14  ;;  %v1451_v18 = vadd.f32 %v6837_v19, %v6704_v22  ;;  %vm1482_vm5 = vcmp.ge.f32.partialorder %v1450_v14, 0.0  ;;  %v212_v29 = vunpack.c.1.s8 %v6792_v63 }
 0x304   : > { %v1793_v1 = vrot.slane %v1608_v32, %v6818_v54  ;;  %v2051_v7 = vsel %vm1966_vm13, %v6879_v57, -inf  ;;  %v1973_v17 = vsel %vm1966_vm13, %v6881_v34, -inf  ;;  %v6891_v11 = vadd.f32 %v1897_v25, %v1572_v12 }
 0x305   : > { %v6893_v46 = vadd.f32 %v1789_v8, %v1545_v40  ;;  %v1546_v36 = vsel %vm1482_vm5, %v1450_v14, %v1514_v56  ;;  %v1515_v39 = vmul.f32 0.2, %v1451_v18  ;;  %v1622_v22 = vrot.slane %v1594_v43, %v6798_v6  ;;  %v730_v56 = vpop.xlane.xlu0 %729 }
 0x306   : > { %v1452_v63 = vadd.f32 %v6837_v19, %v6681_v52  ;;  %vm1483_vm6 = vcmp.ge.f32.partialorder %v1451_v18, 0.0  ;;  %v220_v2 = vcvt.s32.f32 %v212_v29  ;;  %v2057_v35 = vsel %vm1966_vm13, %v6891_v11, -inf }
 0x307   : > { %2052 = vmax.xlane.f32.xlu1 %v2051_v7  ;;  %1974 = vmax.xlane.f32.xlu0 %v1973_v17  ;;  %v1797_v4 = vrot.slane %v1622_v22, %v6818_v54  ;;  %v1976_v10 = vsel %vm1966_vm13, %v6893_v46, -inf  ;;  %v6903_v61 = vadd.f32 %v1793_v1, %v1546_v36  ;;  %v1624_v37 = vcombine.high %v1608_v32, %v1608_v32 }
 0x308   : > { %v1547_v25 = vsel %vm1483_vm6, %v1451_v18, %v1515_v39  ;;  %v1516_v9 = vmul.f32 0.2, %v1452_v63  ;;  %v1453_v52 = vadd.f32 %v6837_v19, %v6706_v24  ;;  %vm1484_vm10 = vcmp.ge.f32.partialorder %v1452_v63, 0.0 }
 0x309   : > { %vm228_vm11 = vcmp.gt.f32.partialorder %v220_v2, 0.5  ;;  %v1979_v13 = vsel %vm1966_vm13, %v6903_v61, -inf  ;;  %v6909_v8 = vadd.f32 %v1797_v4, %v1547_v25  ;;  %v1801_v14 = vrot.slane %v1624_v37, %v6818_v54  ;;  %v736_v25 = vpop.xlane.xlu0 %735 }
 0x30a   : > { %v1626_v43 = vcombine.high %v1622_v22, %v1622_v22  ;;  %v1548_v23 = vsel %vm1484_vm10, %v1452_v63, %v1516_v9  ;;  %v1517_v32 = vmul.f32 0.2, %v1453_v52  ;;  %v8587_v26 = vmov -1e+30  }
 0x30b   : > { %2058 = vmax.xlane.f32.xlu1 %v2057_v35  ;;  %1977 = vmax.xlane.f32.xlu0 %v1976_v10  ;;  %v236_v12 = vsel %vm228_vm11, 0.0, %v8587_v26  ;;  %v1454_v40 = vadd.f32 %v6837_v19, %v6714_v51  ;;  %vm1485_vm7 = vcmp.ge.f32.partialorder %v1453_v52, 0.0  ;;  %v1982_v18 = vsel %vm1966_vm13, %v6909_v8, -inf }
 0x30c   : > { %v1634_v24 = vrot.slane %v236_v12, %v6798_v6  ;;  %v6918_v29 = vadd.f32 %v1801_v14, %v1548_v23  ;;  %v1805_v1 = vrot.slane %v1626_v43, %v6818_v54  ;;  %v1549_v7 = vsel %vm1485_vm7, %v1453_v52, %v1517_v32 }
 0x30d   : > { %v1518_v17 = vmul.f32 0.2, %v1454_v40  ;;  %v1455_v36 = vadd.f32 %v6837_v19, %v730_v56  ;;  %vm1486_vm9 = vcmp.ge.f32.partialorder %v1454_v40, 0.0  ;;  %v1456_v10 = vadd.f32 %v6837_v19, %v6716_v5 }
 0x30e   : > { %v1650_v39 = vrot.slane %v1634_v24, %v6798_v6  ;;  %v1642_v51 = vcombine.high %v1634_v24, %v1634_v24  ;;  %v1985_v22 = vsel %vm1966_vm13, %v6918_v29, -inf  ;;  %v6925_v63 = vadd.f32 %v1805_v1, %v1549_v7 }
 0x30f   : > { %1980 = vmax.xlane.f32.xlu0 %v1979_v13  ;;  %v1550_v4 = vsel %vm1486_vm9, %v1454_v40, %v1518_v17  ;;  %v1519_v35 = vmul.f32 0.2, %v1455_v36  ;;  %vm1487_vm5 = vcmp.ge.f32.partialorder %v1455_v36, 0.0  ;;  %v1520_v23 = vmul.f32 0.2, %v1456_v10 }
 0x310   : > { %v1809_v2 = vrot.slane %v1650_v39, %v6818_v54  ;;  %v1664_v37 = vrot.slane %v1642_v51, %v6798_v6  ;;  %v1988_v9 = vsel %vm1966_vm13, %v6925_v63, -inf  ;;  %v1672_v14 = vcombine.high %v1650_v39, %v1650_v39  ;;  %v742_v39 = vpop.xlane.xlu0 %741 }
 0x311   : > { %v1551_v43 = vsel %vm1487_vm5, %v1455_v36, %v1519_v35  ;;  %v1457_v32 = vadd.f32 %v6837_v19, %v736_v25  ;;  %vm1488_vm6 = vcmp.ge.f32.partialorder %v1456_v10, 0.0  ;;  %v1627_v40 = vcombine.high %v236_v12, %v236_v12 }
 0x312   : > { %v6933_v52 = vadd.f32 %v1809_v2, %v1550_v4  ;;  %v1813_v13 = vrot.slane %v1664_v37, %v6818_v54  ;;  %v1817_v56 = vrot.slane %v1672_v14, %v6818_v54  ;;  %v1552_v1 = vsel %vm1488_vm6, %v1456_v10, %v1520_v23 }
 0x313   : > { %1983 = vmax.xlane.f32.xlu0 %v1982_v18  ;;  %v1674_v18 = vcombine.high %v1664_v37, %v1664_v37  ;;  %v1521_v7 = vmul.f32 0.2, %v1457_v32  ;;  %v1458_v17 = vadd.f32 %v6837_v19, %v6722_v53  ;;  %vm1489_vm10 = vcmp.ge.f32.partialorder %v1457_v32, 0.0 }
 0x314   : > { %v1991_v5 = vsel %vm1966_vm13, %v6933_v52, -inf  ;;  %v6939_v24 = vadd.f32 %v1813_v13, %v1551_v43  ;;  %v1641_v36 = vrot.slane %v1627_v40, %v6798_v6  ;;  %v6947_v51 = vadd.f32 %v1817_v56, %v1552_v1 }
 0x315   : > { %v1553_v2 = vsel %vm1489_vm10, %v1457_v32, %v1521_v7  ;;  %v1522_v4 = vmul.f32 0.2, %v1458_v17  ;;  %v1459_v35 = vadd.f32 %v6837_v19, %v742_v39  ;;  %vm1490_vm11 = vcmp.ge.f32.partialorder %v1458_v17, 0.0  ;;  %v748_v32 = vpop.xlane.xlu0 %747 }
 0x316   : > { %v1994_v12 = vsel %vm1966_vm13, %v6939_v24, -inf  ;;  %v1657_v10 = vrot.slane %v1641_v36, %v6798_v6  ;;  %v1643_v53 = vcombine.high %v1641_v36, %v1641_v36  ;;  %v1997_v37 = vsel %vm1966_vm13, %v6947_v51, -inf }
 0x317   : > { %1986 = vmax.xlane.f32.xlu0 %v1985_v22  ;;  %v1821_v22 = vrot.slane %v1674_v18, %v6818_v54  ;;  %v1554_v13 = vsel %vm1490_vm11, %v1458_v17, %v1522_v4  ;;  %v1523_v14 = vmul.f32 0.2, %v1459_v35  ;;  %v1460_v43 = vadd.f32 %v6837_v19, %v6726_v28 }
 0x318   : > { %vm1491_vm7 = vcmp.ge.f32.partialorder %v1459_v35, 0.0  ;;  %v1671_v23 = vrot.slane %v1643_v53, %v6798_v6  ;;  %v1673_v18 = vcombine.high %v1657_v10, %v1657_v10  ;;  %v1461_v17 = vadd.f32 %v6837_v19, %v748_v32 }
 0x319   : > { %v6954_v25 = vadd.f32 %v1821_v22, %v1553_v2  ;;  %v1555_v1 = vsel %vm1491_vm7, %v1459_v35, %v1523_v14  ;;  %v1524_v7 = vmul.f32 0.2, %v1460_v43  ;;  %vm1492_vm9 = vcmp.ge.f32.partialorder %v1460_v43, 0.0 }
 0x31a   : > { %v1829_v56 = vrot.slane %v1671_v23, %v6818_v54  ;;  %v1833_v39 = vrot.slane %v1673_v18, %v6818_v54  ;;  %v1525_v2 = vmul.f32 0.2, %v1461_v17  ;;  %v1463_v4 = vadd.f32 %v6837_v19, %v6663_v49 }
 0x31b   : > { %1989 = vmax.xlane.f32.xlu0 %v1988_v9  ;;  %v1825_v9 = vrot.slane %v1657_v10, %v6818_v54  ;;  %v2000_v40 = vsel %vm1966_vm13, %v6954_v25, -inf  ;;  %v1556_v22 = vsel %vm1492_vm9, %v1460_v43, %v1524_v7  ;;  %vm1493_vm5 = vcmp.ge.f32.partialorder %v1461_v17, 0.0 }
 0x31c   : > { %v6968_v36 = vadd.f32 %v1829_v56, %v1555_v1  ;;  %v1691_v35 = vcombine.high %v6822_v59, %v6822_v59  ;;  %v6977_v53 = vadd.f32 %v1833_v39, %v1556_v22  ;;  %v1464_v14 = vadd.f32 %v6837_v19, %v6653_v38 }
 0x31d   : > { %vm1495_vm6 = vcmp.ge.f32.partialorder %v1463_v4, 0.0  ;;  %v1721_v32 = vcombine.high %v6830_v3, %v6830_v3  ;;  %v1465_v18 = vadd.f32 %v6837_v19, %v6667_v21  ;;  %v1676_v38 = vcombine.high %v6812_v0, %v6812_v0 }
 0x31e   : > { %v2006_v10 = vsel %vm1966_vm13, %v6968_v36, -inf  ;;  %v1713_v49 = vrot.slane %v1691_v35, %v6798_v6  ;;  %v2009_v43 = vsel %vm1966_vm13, %v6977_v53, -inf  ;;  %v1528_v56 = vmul.f32 0.2, %v1464_v14 }
 0x31f   : > { %1992 = vmax.xlane.f32.xlu0 %v1991_v5  ;;  %v6962_v5 = vadd.f32 %v1825_v9, %v1554_v13  ;;  %v1557_v9 = vsel %vm1493_vm5, %v1461_v17, %v1525_v2  ;;  %v1527_v13 = vmul.f32 0.2, %v1463_v4  ;;  %vm1496_vm10 = vcmp.ge.f32.partialorder %v1464_v14, 0.0 }
 0x320   : > { %v1849_v17 = vrot.slane %v1721_v32, %v6818_v54  ;;  %v1560_v3 = vsel %vm1496_vm10, %v1464_v14, %v1528_v56  ;;  %v1529_v39 = vmul.f32 0.2, %v1465_v18  ;;  %vm1497_vm11 = vcmp.ge.f32.partialorder %v1465_v18, 0.0 }
 0x321   : > { %v2003_v28 = vsel %vm1966_vm13, %v6962_v5, -inf  ;;  %v1690_v21 = vrot.slane %v1676_v38, %v6798_v6 }
 0x322   : > { %v7004_v22 = vadd.f32 %v1849_v17, %v1560_v3  ;;  %v1469_v17 = vadd.f32 %v6837_v19, %v6675_v60 }
 0x323   : > { %1995 = vmax.xlane.f32.xlu0 %v1994_v12  ;;  %v1675_v12 = vcombine.high %v1671_v23, %v1671_v23  ;;  %v1845_v23 = vrot.slane %v1713_v49, %v6818_v54 }
 0x327   : > { %1998 = vmax.xlane.f32.xlu0 %v1997_v37  ;;  %v1837_v37 = vrot.slane %v1675_v12, %v6818_v54  ;;  %v1466_v12 = vadd.f32 %v6837_v19, %v6655_v33  ;;  %v1692_v33 = vcombine.high %v1690_v21, %v1690_v21 }
 0x329   : > { %v6985_v59 = vadd.f32 %v1837_v37, %v1557_v9  ;;  %v1530_v35 = vmul.f32 0.2, %v1466_v12  ;;  %vm1498_vm7 = vcmp.ge.f32.partialorder %v1466_v12, 0.0  ;;  %v1706_v37 = vrot.slane %v1690_v21, %v6798_v6 }
 0x32a   : > { %v2021_v9 = vsel %vm1966_vm13, %v7004_v22, -inf  ;;  %v1533_v21 = vmul.f32 0.2, %v1469_v17 }
 0x32b   : > { %2001 = vmax.xlane.f32.xlu0 %v2000_v40  ;;  %v1559_v40 = vsel %vm1495_vm6, %v1463_v4, %v1527_v13  ;;  %v2012_v1 = vsel %vm1966_vm13, %v6985_v59, -inf  ;;  %v1561_v4 = vsel %vm1497_vm11, %v1465_v18, %v1529_v39  ;;  %v1857_v14 = vrot.slane %v1706_v37, %v6818_v54 }
 0x32c   : > { %v6996_v7 = vadd.f32 %v1845_v23, %v1559_v40  ;;  %v1468_v23 = vadd.f32 %v6837_v19, %v6657_v45  ;;  %v1722_v18 = vcombine.high %v1706_v37, %v1706_v37  ;;  %vm1501_vm6 = vcmp.ge.f32.partialorder %v1469_v17, 0.0 }
 0x32e   : > { %v2018_v0 = vsel %vm1966_vm13, %v6996_v7, -inf  ;;  %vm1500_vm5 = vcmp.ge.f32.partialorder %v1468_v23, 0.0  ;;  %v1865_v3 = vrot.slane %v1722_v18, %v6818_v54 }
 0x32f   : > { %2004 = vmax.xlane.f32.xlu0 %v2003_v28  ;;  %v1723_v28 = vcombine.high %v1713_v49, %v1713_v49  ;;  %v1562_v49 = vsel %vm1498_vm7, %v1466_v12, %v1530_v35  ;;  %v1740_v35 = vcombine.high %v6803_v41, %v6803_v41 }
 0x330   : > { %v7020_v40 = vadd.f32 %v1857_v14, %v1562_v49  ;;  %v1873_v14 = vrot.slane %v6808_v47, %v6818_v54 }
 0x331   : > { %v1853_v2 = vrot.slane %v1723_v28, %v6818_v54  ;;  %v1762_v49 = vrot.slane %v1740_v35, %v6798_v6 }
 0x332   : > { %v2027_v45 = vsel %vm1966_vm13, %v7020_v40, -inf }
 0x333   : > { %2007 = vmax.xlane.f32.xlu0 %v2006_v10  ;;  %v1467_v10 = vadd.f32 %v6837_v19, %v6671_v55  ;;  %v7012_v13 = vadd.f32 %v1853_v2, %v1561_v4  ;;  %v1720_v55 = vrot.slane %v1692_v33, %v6798_v6  ;;  %v1471_v33 = vadd.f32 %v6837_v19, %v6718_v30 }
 0x334   : > { %v1741_v30 = vcombine.high %v6815_v16, %v6815_v16  ;;  %v1772_v47 = vcombine.high %v1762_v49, %v1762_v49 }
 0x335   : > { %vm1499_vm9 = vcmp.ge.f32.partialorder %v1467_v10, 0.0  ;;  %v2024_v32 = vsel %vm1966_vm13, %v7012_v13, -inf  ;;  %v1861_v56 = vrot.slane %v1720_v55, %v6818_v54  ;;  %v1724_v39 = vcombine.high %v1720_v55, %v1720_v55 }
 0x336   : > { %v1535_v41 = vmul.f32 0.2, %v1471_v33  ;;  %vm1503_vm11 = vcmp.ge.f32.partialorder %v1471_v33, 0.0  ;;  %v1885_v16 = vrot.slane %v1772_v47, %v6818_v54 }
 0x337   : > { %2010 = vmax.xlane.f32.xlu0 %v2009_v43  ;;  %v1531_v43 = vmul.f32 0.2, %v1467_v10  ;;  %v1869_v4 = vrot.slane %v1724_v39, %v6818_v54 }
 0x338   : > { %v1567_v18 = vsel %vm1503_vm11, %v1471_v33, %v1535_v41  ;;  %vm2681_vm11 = vcmask 785408  }
 0x339   : > { %v1563_v38 = vsel %vm1499_vm9, %v1467_v10, %v1531_v43  ;;  %v1565_v10 = vsel %vm1501_vm6, %v1469_v17, %v1533_v21  ;;  %vm2671_vm6 = vcmask 261120  }
 0x33a   : > { %v7027_v28 = vadd.f32 %v1861_v56, %v1563_v38  ;;  %v1877_v56 = vrot.slane %v1762_v49, %v6818_v54 }
 0x33b   : > { %2013 = vmax.xlane.f32.xlu0 %v2012_v1  ;;  %v1532_v1 = vmul.f32 0.2, %v1468_v23 }
 0x33c   : > { %v2030_v2 = vsel %vm1966_vm13, %v7027_v28, -inf  ;;  %v7061_v17 = vadd.f32 %v1877_v56, %v1567_v18 }
 0x33d   : > { %v1564_v12 = vsel %vm1500_vm5, %v1468_v23, %v1532_v1  ;;  %v1473_v23 = vadd.f32 %v6837_v19, %v6720_v42  ;;  %v1475_v1 = vadd.f32 %v6837_v19, %v6736_v20 }
 0x33e   : > { %v7034_v60 = vadd.f32 %v1865_v3, %v1564_v12  ;;  %v1477_v12 = vadd.f32 %v6837_v19, %v6746_v58  ;;  %v2042_v20 = vsel %vm1966_vm13, %v7061_v17, -inf }
 0x33f   : > { %2019 = vmax.xlane.f32.xlu0 %v2018_v0  ;;  %v1470_v0 = vadd.f32 %v6837_v19, %v6710_v27  ;;  %v1537_v38 = vmul.f32 0.2, %v1473_v23  ;;  %vm1505_vm7 = vcmp.ge.f32.partialorder %v1473_v23, 0.0  ;;  %v1539_v39 = vmul.f32 0.2, %v1475_v1 }
 0x340   : > { %v2033_v27 = vsel %vm1966_vm13, %v7034_v60, -inf  ;;  %vm1507_vm9 = vcmp.ge.f32.partialorder %v1475_v1, 0.0  ;;  %v1541_v35 = vmul.f32 0.2, %v1477_v12  ;;  %vm1509_vm5 = vcmp.ge.f32.partialorder %v1477_v12, 0.0 }
 0x341   : > { %v1534_v37 = vmul.f32 0.2, %v1470_v0  ;;  %vm1502_vm10 = vcmp.ge.f32.partialorder %v1470_v0, 0.0  ;;  %v1569_v3 = vsel %vm1505_vm7, %v1473_v23, %v1537_v38 }
 0x342   : > { %v7069_v21 = vadd.f32 %v1885_v16, %v1569_v3  ;;  %v1573_v19 = vsel %vm1509_vm5, %v1477_v12, %v1541_v35 }
 0x343   : > { %2022 = vmax.xlane.f32.xlu0 %v2021_v9  ;;  %v7043_v9 = vadd.f32 %v1869_v4, %v1565_v10  ;;  %v1566_v43 = vsel %vm1502_vm10, %v1470_v0, %v1534_v37  ;;  %v1571_v4 = vsel %vm1507_vm9, %v1475_v1, %v1539_v39  ;;  %vm2676_vm10 = vcmask 523264  }
 0x344   : > { %v2048_v10 = vsel %vm1966_vm13, %v7069_v21, -inf }
 0x345   : > { %v2036_v55 = vsel %vm1966_vm13, %v7043_v9, -inf }
 0x347   : > { %2025 = vmax.xlane.f32.xlu0 %v2024_v32  ;;  %v7054_v32 = vadd.f32 %v1873_v14, %v1566_v43 }
 0x349   : > { %v2039_v42 = vsel %vm1966_vm13, %v7054_v32, -inf }
 0x34b   : > { %2028 = vmax.xlane.f32.xlu0 %v2027_v45  ;;  %v1769_v45 = vrot.slane %v1741_v30, %v6798_v6 }
 0x34d   : > { %v1893_v0 = vrot.slane %v1769_v45, %v6818_v54 }
 0x34f   : > { %2031 = vmax.xlane.f32.xlu0 %v2030_v2  ;;  %v1773_v2 = vcombine.high %v1769_v45, %v1769_v45  ;;  %v7074_v37 = vadd.f32 %v1893_v0, %v1571_v4 }
 0x351   : > { %v1901_v58 = vrot.slane %v1773_v2, %v6818_v54  ;;  %v2054_v33 = vsel %vm1966_vm13, %v7074_v37, -inf }
 0x353   : > { %2034 = vmax.xlane.f32.xlu0 %v2033_v27  ;;  %v7079_v27 = vadd.f32 %v1901_v58, %v1573_v19 }
 0x355   : > { %v2060_v14 = vsel %vm1966_vm13, %v7079_v27, -inf }
 0x357   : > { %2037 = vmax.xlane.f32.xlu0 %v2036_v55 }
 0x35b   : > { %2040 = vmax.xlane.f32.xlu0 %v2039_v42 }
 0x35f   : > { %2043 = vmax.xlane.f32.xlu0 %v2042_v20 }
 0x363   : > { %2049 = vmax.xlane.f32.xlu0 %v2048_v10 }
 0x367   : > { %2055 = vmax.xlane.f32.xlu0 %v2054_v33 }
 0x36b   : > { %2061 = vmax.xlane.f32.xlu0 %v2060_v14 }
 0x388   : > { %v1969_v49 = vpop.xlane.xlu0 %1968 }
 0x389   : > { %v2063_v43 = vsub.f32 %v6858_v62, %v1969_v49 }
 0x38b   : > { %v2095_v41 = vmul.f32 1.442695, %v2063_v43 }
 0x38c   : > { %v1972_v23 = vpop.xlane.xlu0 %1971 }
 0x38d   : > { %v2064_v30 = vsub.f32 %v6867_v48, %v1972_v23  ;;  %5817 = vpow2.f32 %v2095_v41 }
 0x38f   : > { %v2097_v55 = vmul.f32 1.442695, %v2064_v30 }
 0x390   : > { %v1975_v56 = vpop.xlane.xlu0 %1974 }
 0x391   : > { %v2065_v47 = vsub.f32 %v6881_v34, %v1975_v56  ;;  %5819 = vpow2.f32 %v2097_v55 }
 0x393   : > { %v2099_v18 = vmul.f32 1.442695, %v2065_v47 }
 0x394   : > { %v1978_v38 = vpop.xlane.xlu0 %1977 }
 0x395   : > { %v2066_v1 = vsub.f32 %v6893_v46, %v1978_v38  ;;  %5821 = vpow2.f32 %v2099_v18 }
 0x397   : > { %v2101_v42 = vmul.f32 1.442695, %v2066_v1 }
 0x398   : > { %v1981_v16 = vpop.xlane.xlu0 %1980 }
 0x399   : > { %v2067_v45 = vsub.f32 %v6903_v61, %v1981_v16  ;;  %5823 = vpow2.f32 %v2101_v42 }
 0x39a   : > { %v7088_v62 = vpop.eup %5817 }
 0x39b   : > { %v2103_v3 = vmul.f32 1.442695, %v2067_v45  ;;  %v2159_v48 = vsel %vm1966_vm13, %v7088_v62, 0.0 }
 0x39c   : > { %v1984_v39 = vpop.xlane.xlu0 %1983  ;;  %2160 = vadd.xlane.f32.xlu1 %v2159_v48 }
 0x39d   : > { %5825 = vpow2.f32 %v2103_v3  ;;  %v2068_v34 = vsub.f32 %v6909_v8, %v1984_v39 }
 0x39e   : > { %v7093_v12 = vpop.eup %5819 }
 0x39f   : > { %v2105_v46 = vmul.f32 1.442695, %v2068_v34  ;;  %v2162_v20 = vsel %vm1966_vm13, %v7093_v12, 0.0 }
 0x3a0   : > { %v1987_v0 = vpop.xlane.xlu0 %1986  ;;  %2163 = vadd.xlane.f32.xlu0 %v2162_v20  ;;  %v2017_v20 = vpop.xlane.xlu1 %2016 }
 0x3a1   : > { %5827 = vpow2.f32 %v2105_v46  ;;  %v2069_v61 = vsub.f32 %v6918_v29, %v1987_v0 }
 0x3a2   : > { %v7098_v2 = vpop.eup %5821 }
 0x3a3   : > { %v2107_v4 = vmul.f32 1.442695, %v2069_v61  ;;  %v2165_v35 = vsel %vm1966_vm13, %v7098_v2, 0.0 }
 0x3a4   : > { %v1990_v10 = vpop.xlane.xlu0 %1989  ;;  %2166 = vadd.xlane.f32.xlu1 %v2165_v35 }
 0x3a5   : > { %5829 = vpow2.f32 %v2107_v4  ;;  %v2070_v8 = vsub.f32 %v6925_v63, %v1990_v10  ;;  %v2079_v4 = vsub.f32 %v6856_v15, %v2017_v20 }
 0x3a6   : > { %v7103_v58 = vpop.eup %5823 }
 0x3a7   : > { %v2109_v19 = vmul.f32 1.442695, %v2070_v8  ;;  %v2168_v33 = vsel %vm1966_vm13, %v7103_v58, 0.0 }
 0x3a8   : > { %v1993_v14 = vpop.xlane.xlu0 %1992  ;;  %2169 = vadd.xlane.f32.xlu0 %v2168_v33  ;;  %v2127_v33 = vmul.f32 1.442695, %v2079_v4 }
 0x3a9   : > { %5831 = vpow2.f32 %v2109_v19  ;;  %v2071_v29 = vsub.f32 %v6933_v52, %v1993_v14 }
 0x3aa   : > { %v7108_v49 = vpop.eup %5825 }
 0x3ab   : > { %v2111_v43 = vmul.f32 1.442695, %v2071_v29  ;;  %v2171_v41 = vsel %vm1966_vm13, %v7108_v49, 0.0 }
 0x3ac   : > { %2172 = vadd.xlane.f32.xlu1 %v2171_v41  ;;  %v1996_v23 = vpop.xlane.xlu0 %1995 }
 0x3ad   : > { %5833 = vpow2.f32 %v2111_v43  ;;  %v2072_v63 = vsub.f32 %v6939_v24, %v1996_v23 }
 0x3ae   : > { %v7113_v30 = vpop.eup %5827 }
 0x3af   : > { %v2113_v55 = vmul.f32 1.442695, %v2072_v63  ;;  %v2174_v56 = vsel %vm1966_vm13, %v7113_v30, 0.0 }
 0x3b0   : > { %2175 = vadd.xlane.f32.xlu0 %v2174_v56  ;;  %v1999_v47 = vpop.xlane.xlu0 %1998 }
 0x3b1   : > { %5835 = vpow2.f32 %v2113_v55  ;;  %v2073_v52 = vsub.f32 %v6947_v51, %v1999_v47 }
 0x3b2   : > { %v7118_v18 = vpop.eup %5829 }
 0x3b3   : > { %v2115_v38 = vmul.f32 1.442695, %v2073_v52  ;;  %v2177_v1 = vsel %vm1966_vm13, %v7118_v18, 0.0 }
 0x3b4   : > { %2178 = vadd.xlane.f32.xlu1 %v2177_v1  ;;  %v2002_v42 = vpop.xlane.xlu0 %2001 }
 0x3b5   : > { %5837 = vpow2.f32 %v2115_v38  ;;  %v2074_v24 = vsub.f32 %v6954_v25, %v2002_v42 }
 0x3b6   : > { %v7123_v16 = vpop.eup %5831 }
 0x3b7   : > { %v2117_v45 = vmul.f32 1.442695, %v2074_v24  ;;  %v2180_v3 = vsel %vm1966_vm13, %v7123_v16, 0.0 }
 0x3b8   : > { %2181 = vadd.xlane.f32.xlu0 %v2180_v3  ;;  %v2005_v48 = vpop.xlane.xlu0 %2004 }
 0x3b9   : > { %5839 = vpow2.f32 %v2117_v45  ;;  %v2075_v51 = vsub.f32 %v6962_v5, %v2005_v48 }
 0x3ba   : > { %v7128_v39 = vpop.eup %5833 }
 0x3bb   : > { %v2119_v34 = vmul.f32 1.442695, %v2075_v51  ;;  %v2183_v46 = vsel %vm1966_vm13, %v7128_v39, 0.0 }
 0x3bc   : > { %2184 = vadd.xlane.f32.xlu1 %v2183_v46  ;;  %v2008_v25 = vpop.xlane.xlu0 %2007 }
 0x3bd   : > { %5841 = vpow2.f32 %v2119_v34  ;;  %v2076_v0 = vsub.f32 %v6968_v36, %v2008_v25 }
 0x3be   : > { %v7133_v61 = vpop.eup %5835 }
 0x3bf   : > { %v2121_v35 = vmul.f32 1.442695, %v2076_v0  ;;  %v2186_v5 = vsel %vm1966_vm13, %v7133_v61, 0.0 }
 0x3c0   : > { %2187 = vadd.xlane.f32.xlu0 %v2186_v5  ;;  %v2011_v10 = vpop.xlane.xlu0 %2010 }
 0x3c1   : > { %5843 = vpow2.f32 %v2121_v35  ;;  %v2077_v8 = vsub.f32 %v6977_v53, %v2011_v10  ;;  %v2047_v10 = vpop.xlane.xlu1 %2046 }
 0x3c2   : > { %v7139_v19 = vpop.eup %5837 }
 0x3c3   : > { %v2123_v14 = vmul.f32 1.442695, %v2077_v8  ;;  %v2189_v36 = vsel %vm1966_vm13, %v7139_v19, 0.0 }
 0x3c4   : > { %2190 = vadd.xlane.f32.xlu1 %v2189_v36  ;;  %v2014_v29 = vpop.xlane.xlu0 %2013 }
 0x3c5   : > { %5845 = vpow2.f32 %v2123_v14  ;;  %v2078_v15 = vsub.f32 %v6985_v59, %v2014_v29 }
 0x3c6   : > { %v7144_v43 = vpop.eup %5839  ;;  %5847 = vpow2.f32 %v2127_v33 }
 0x3c7   : > { %v2125_v41 = vmul.f32 1.442695, %v2078_v15  ;;  %v2192_v23 = vsel %vm1966_vm13, %v7144_v43, 0.0 }
 0x3c8   : > { %2193 = vadd.xlane.f32.xlu0 %v2192_v23  ;;  %v2020_v53 = vpop.xlane.xlu0 %2019  ;;  %v2089_v23 = vsub.f32 %v6860_v31, %v2047_v10 }
 0x3c9   : > { %5849 = vpow2.f32 %v2125_v41  ;;  %v2080_v63 = vsub.f32 %v6996_v7, %v2020_v53  ;;  %v2053_v53 = vpop.xlane.xlu1 %2052 }
 0x3ca   : > { %v7149_v55 = vpop.eup %5841 }
 0x3cb   : > { %v2129_v56 = vmul.f32 1.442695, %v2080_v63  ;;  %v2195_v47 = vsel %vm1966_vm13, %v7149_v55, 0.0 }
 0x3cc   : > { %2196 = vadd.xlane.f32.xlu1 %v2195_v47  ;;  %v2023_v59 = vpop.xlane.xlu0 %2022 }
 0x3cd   : > { %5851 = vpow2.f32 %v2129_v56  ;;  %v2081_v52 = vsub.f32 %v7004_v22, %v2023_v59  ;;  %v2059_v31 = vpop.xlane.xlu1 %2058 }
 0x3ce   : > { %v7154_v38 = vpop.eup %5843 }
 0x3cf   : > { %v2131_v1 = vmul.f32 1.442695, %v2081_v52  ;;  %v2198_v42 = vsel %vm1966_vm13, %v7154_v38, 0.0  ;;  %v2147_v52 = vmul.f32 1.442695, %v2089_v23 }
 0x3d0   : > { %2199 = vadd.xlane.f32.xlu0 %v2198_v42  ;;  %v2026_v24 = vpop.xlane.xlu0 %2025 }
 0x3d1   : > { %5853 = vpow2.f32 %v2131_v1  ;;  %v2082_v7 = vsub.f32 %v7012_v13, %v2026_v24  ;;  %v2091_v1 = vsub.f32 %v6879_v57, %v2053_v53 }
 0x3d2   : > { %v7159_v45 = vpop.eup %5845 }
 0x3d3   : > { %v2133_v3 = vmul.f32 1.442695, %v2082_v7  ;;  %v2201_v48 = vsel %vm1966_vm13, %v7159_v45, 0.0  ;;  %v7163_v51 = vpop.eup %5847 }
 0x3d4   : > { %2202 = vadd.xlane.f32.xlu1 %v2201_v48  ;;  %v2029_v22 = vpop.xlane.xlu0 %2028  ;;  %v2207_v25 = vsel %vm1966_vm13, %v7163_v51, 0.0  ;;  %v2151_v48 = vmul.f32 1.442695, %v2091_v1 }
 0x3d5   : > { %5855 = vpow2.f32 %v2133_v3  ;;  %v2083_v34 = vsub.f32 %v7020_v40, %v2029_v22 }
 0x3d6   : > { %v7166_v46 = vpop.eup %5849 }
 0x3d7   : > { %v2135_v20 = vmul.f32 1.442695, %v2083_v34  ;;  %v2204_v13 = vsel %vm1966_vm13, %v7166_v46, 0.0 }
 0x3d8   : > { %2208 = vadd.xlane.f32.xlu1 %v2207_v25  ;;  %2205 = vadd.xlane.f32.xlu0 %v2204_v13  ;;  %v2032_v0 = vpop.xlane.xlu0 %2031 }
 0x3d9   : > { %5857 = vpow2.f32 %v2135_v20  ;;  %v2084_v4 = vsub.f32 %v7027_v28, %v2032_v0 }
 0x3da   : > { %v7173_v35 = vpop.eup %5851 }
 0x3db   : > { %v2137_v5 = vmul.f32 1.442695, %v2084_v4  ;;  %v2210_v40 = vsel %vm1966_vm13, %v7173_v35, 0.0 }
 0x3dc   : > { %2211 = vadd.xlane.f32.xlu0 %v2210_v40  ;;  %v2035_v8 = vpop.xlane.xlu0 %2034 }
 0x3dd   : > { %5859 = vpow2.f32 %v2137_v5  ;;  %v2085_v33 = vsub.f32 %v7034_v60, %v2035_v8 }
 0x3de   : > { %v7178_v14 = vpop.eup %5853 }
 0x3df   : > { %v2139_v36 = vmul.f32 1.442695, %v2085_v33  ;;  %v2213_v29 = vsel %vm1966_vm13, %v7178_v14, 0.0 }
 0x3e0   : > { %2214 = vadd.xlane.f32.xlu1 %v2213_v29  ;;  %v2038_v28 = vpop.xlane.xlu0 %2037 }
 0x3e1   : > { %5861 = vpow2.f32 %v2139_v36  ;;  %v2086_v15 = vsub.f32 %v7043_v9, %v2038_v28 }
 0x3e2   : > { %v7183_v41 = vpop.eup %5855 }
 0x3e3   : > { %v2141_v63 = vmul.f32 1.442695, %v2086_v15  ;;  %v2216_v60 = vsel %vm1966_vm13, %v7183_v41, 0.0 }
 0x3e4   : > { %2217 = vadd.xlane.f32.xlu0 %v2216_v60  ;;  %v2041_v56 = vpop.xlane.xlu0 %2040 }
 0x3e5   : > { %5863 = vpow2.f32 %v2141_v63  ;;  %v2087_v47 = vsub.f32 %v7054_v32, %v2041_v56  ;;  %v2093_v32 = vsub.f32 %v6891_v11, %v2059_v31 }
 0x3e6   : > { %v7189_v59 = vpop.eup %5857 }
 0x3e7   : > { %v2143_v9 = vmul.f32 1.442695, %v2087_v47  ;;  %v2219_v42 = vsel %vm1966_vm13, %v7189_v59, 0.0  ;;  %v2155_v13 = vmul.f32 1.442695, %v2093_v32 }
 0x3e8   : > { %2220 = vadd.xlane.f32.xlu1 %v2219_v42  ;;  %v2044_v24 = vpop.xlane.xlu0 %2043 }
 0x3e9   : > { %5865 = vpow2.f32 %v2143_v9  ;;  %v2088_v7 = vsub.f32 %v7061_v17, %v2044_v24 }
 0x3ea   : > { %v7195_v3 = vpop.eup %5859  ;;  %5867 = vpow2.f32 %v2147_v52 }
 0x3eb   : > { %v2145_v22 = vmul.f32 1.442695, %v2088_v7  ;;  %v2222_v57 = vsel %vm1966_vm13, %v7195_v3, 0.0 }
 0x3ec   : > { %2223 = vadd.xlane.f32.xlu0 %v2222_v57  ;;  %v2050_v34 = vpop.xlane.xlu0 %2049 }
 0x3ed   : > { %5869 = vpow2.f32 %v2145_v22  ;;  %v2090_v20 = vsub.f32 %v7069_v21, %v2050_v34 }
 0x3ee   : > { %v7201_v25 = vpop.eup %5861  ;;  %5871 = vpow2.f32 %v2151_v48 }
 0x3ef   : > { %v2149_v17 = vmul.f32 1.442695, %v2090_v20  ;;  %v2225_v0 = vsel %vm1966_vm13, %v7201_v25, 0.0 }
 0x3f0   : > { %2226 = vadd.xlane.f32.xlu1 %v2225_v0  ;;  %v2056_v4 = vpop.xlane.xlu0 %2055 }
 0x3f1   : > { %5873 = vpow2.f32 %v2149_v17  ;;  %v2092_v11 = vsub.f32 %v7074_v37, %v2056_v4 }
 0x3f2   : > { %v7206_v5 = vpop.eup %5863  ;;  %5875 = vpow2.f32 %v2155_v13 }
 0x3f3   : > { %v2153_v40 = vmul.f32 1.442695, %v2092_v11  ;;  %v2228_v21 = vsel %vm1966_vm13, %v7206_v5, 0.0 }
 0x3f4   : > { %2229 = vadd.xlane.f32.xlu0 %v2228_v21  ;;  %v2062_v10 = vpop.xlane.xlu0 %2061 }
 0x3f5   : > { %5877 = vpow2.f32 %v2153_v40  ;;  %v2094_v8 = vsub.f32 %v7079_v27, %v2062_v10 }
 0x3f6   : > { %v7211_v33 = vpop.eup %5865 }
 0x3f7   : > { %v7213_v36 = vpop.eup %5867  ;;  %v2157_v29 = vmul.f32 1.442695, %v2094_v8  ;;  %v2231_v37 = vsel %vm1966_vm13, %v7211_v33, 0.0 }
 0x3f8   : > { %2232 = vadd.xlane.f32.xlu1 %v2231_v37  ;;  %v2237_v15 = vsel %vm1966_vm13, %v7213_v36, 0.0 }
 0x3f9   : > { %5879 = vpow2.f32 %v2157_v29 }
 0x3fa   : > { %v7217_v28 = vpop.eup %5869 }
 0x3fb   : > { %v2234_v23 = vsel %vm1966_vm13, %v7217_v28, 0.0  ;;  %v7223_v53 = vpop.eup %5871 }
 0x3fc   : > { %2238 = vadd.xlane.f32.xlu1 %v2237_v15  ;;  %2235 = vadd.xlane.f32.xlu0 %v2234_v23  ;;  %v2243_v63 = vsel %vm1966_vm13, %v7223_v53, 0.0 }
 0x3fe   : > { %v7225_v27 = vpop.eup %5873 }
 0x3ff   : > { %v2240_v60 = vsel %vm1966_vm13, %v7225_v27, 0.0  ;;  %v7231_v56 = vpop.eup %5875 }
 0x400   : > { %2244 = vadd.xlane.f32.xlu1 %v2243_v63  ;;  %2241 = vadd.xlane.f32.xlu0 %v2240_v60  ;;  %v2249_v52 = vsel %vm1966_vm13, %v7231_v56, 0.0 }
 0x402   : > { %v7233_v47 = vpop.eup %5877 }
 0x403   : > { %v2246_v1 = vsel %vm1966_vm13, %v7233_v47, 0.0 }
 0x404   : > { %2250 = vadd.xlane.f32.xlu1 %v2249_v52  ;;  %2247 = vadd.xlane.f32.xlu0 %v2246_v1 }
 0x406   : > { %v7239_v9 = vpop.eup %5879 }
 0x407   : > { %v2252_v42 = vsel %vm1966_vm13, %v7239_v9, 0.0 }
 0x408   : > { %2253 = vadd.xlane.f32.xlu0 %v2252_v42 }
 0x425   : > { %v2161_v31 = vpop.xlane.xlu1 %2160 }
 0x426   : > { %v2255_v20 = vmax.f32 %v2161_v31, 1e-30 }
 0x429   : > { %v2164_v24 = vpop.xlane.xlu0 %2163 }
 0x42a   : > { %v2256_v22 = vmax.f32 %v2164_v24, 1e-30 }
 0x42d   : > { %v2167_v7 = vpop.xlane.xlu1 %2166 }
 0x42e   : > { %v2257_v34 = vmax.f32 %v2167_v7, 1e-30 }
 0x431   : > { %v2170_v48 = vpop.xlane.xlu0 %2169 }
 0x432   : > { %v2258_v32 = vmax.f32 %v2170_v48, 1e-30 }
 0x434   : > { %5881 = vrcp.f32 %v2258_v32 }
 0x435   : > { %v2173_v57 = vpop.xlane.xlu1 %2172  ;;  %5883 = vrcp.f32 %v2256_v22 }
 0x436   : > { %v2259_v13 = vmax.f32 %v2173_v57, 1e-30  ;;  %5885 = vrcp.f32 %v2257_v34 }
 0x437   : > { %5887 = vrcp.f32 %v2255_v20 }
 0x438   : > { %5889 = vrcp.f32 %v2259_v13 }
 0x439   : > { %v2176_v17 = vpop.xlane.xlu0 %2175 }
 0x43a   : > { %v2260_v4 = vmax.f32 %v2176_v17, 1e-30 }
 0x43d   : > { %v2179_v0 = vpop.xlane.xlu1 %2178 }
 0x43e   : > { %v2261_v11 = vmax.f32 %v2179_v0, 1e-30 }
 0x440   : > { %5891 = vrcp.f32 %v2261_v11 }
 0x441   : > { %v2182_v40 = vpop.xlane.xlu0 %2181  ;;  %5893 = vrcp.f32 %v2260_v4  ;;  %v5882_v10 = vpop.eup %5881 }
 0x442   : > { %v2262_v21 = vmax.f32 %v2182_v40, 1e-30  ;;  %v5884_v8 = vpop.eup %5883  ;;  %v2322_v15 = vmul.f32 %v5882_v10, %v7103_v58 }
 0x443   : > { %v5886_v29 = vpop.eup %5885  ;;  %v2320_v60 = vmul.f32 %v5884_v8, %v7093_v12 }
 0x444   : > { %5895 = vrcp.f32 %v2262_v21  ;;  %v5888_v37 = vpop.eup %5887  ;;  %v2321_v52 = vmul.f32 %v5886_v29, %v7098_v2 }
 0x445   : > { %v5890_v23 = vpop.eup %5889  ;;  %v2319_v31 = vmul.f32 %v5888_v37, %v7088_v62  ;;  %v2359_v7 = vcombine.low %v2320_v60, %v2322_v15  ;;  %v2185_v22 = vpop.xlane.xlu1 %2184 }
 0x446   : > { %v2323_v48 = vmul.f32 %v5890_v23, %v7108_v49  ;;  %v2263_v21 = vmax.f32 %v2185_v22, 1e-30 }
 0x447   : > { %v2351_v57 = vcombine.low %v2319_v31, %v2321_v52  ;;  %v7252_v2 = vrot.slane %v2359_v7, %v6398_v44 }
 0x449   : > { %v2188_v24 = vpop.xlane.xlu0 %2187  ;;  %v7255_v62 = vrot.slane %v2351_v57, %v6398_v44 }
 0x44d   : > { %v5892_v63 = vpop.eup %5891  ;;  %v2191_v13 = vpop.xlane.xlu1 %2190 }
 0x44e   : > { %v2325_v1 = vmul.f32 %v5892_v63, %v7118_v18  ;;  %v5894_v42 = vpop.eup %5893  ;;  %v2265_v4 = vmax.f32 %v2191_v13, 1e-30 }
 0x44f   : > { %v2324_v58 = vmul.f32 %v5894_v42, %v7113_v30  ;;  %v2264_v30 = vmax.f32 %v2188_v24, 1e-30 }
 0x450   : > { %v2367_v20 = vcombine.low %v2323_v48, %v2325_v1 }
 0x451   : > { %v5896_v32 = vpop.eup %5895  ;;  %v2194_v12 = vpop.xlane.xlu0 %2193 }
 0x452   : > { %v2326_v34 = vmul.f32 %v5896_v32, %v7123_v16  ;;  %v2266_v17 = vmax.f32 %v2194_v12, 1e-30  ;;  %v7258_v49 = vrot.slane %v2367_v20, %v6398_v44  ;;  %v2383_v16 = vcombine.low %v7255_v62, %v7252_v2 }
 0x454   : > { %v2375_v18 = vcombine.low %v2324_v58, %v2326_v34  ;;  %5897 = vrcp.f32 %v2266_v17  ;;  %v7271_v8 = vrot.slane %v2383_v16, %v6403_v50 }
 0x455   : > { %v2197_v40 = vpop.xlane.xlu1 %2196  ;;  %5899 = vrcp.f32 %v2264_v30 }
 0x456   : > { %v7261_v0 = vrot.slane %v2375_v18, %v6398_v44  ;;  %5901 = vrcp.f32 %v2265_v4  ;;  %v2267_v37 = vmax.f32 %v2197_v40, 1e-30 }
 0x457   : > { %5903 = vrcp.f32 %v2263_v21 }
 0x458   : > { %v2399_v11 = vcombine.low %v7258_v49, %v7261_v0 }
 0x459   : > { %v2200_v29 = vpop.xlane.xlu0 %2199 }
 0x45a   : > { %v7268_v10 = vrot.slane %v2399_v11, %v6403_v50  ;;  %v2268_v60 = vmax.f32 %v2200_v29, 1e-30 }
 0x45c   : > { %v2415_v23 = vcombine.low %v7271_v8, %v7268_v10 }
 0x45d   : > { %v2203_v15 = vpop.xlane.xlu1 %2202 }
 0x45e   : > { %v2269_v63 = vmax.f32 %v2203_v15, 1e-30 }
 0x460   : > { %5905 = vrcp.f32 %v2269_v63 }
 0x461   : > { %5907 = vrcp.f32 %v2267_v37  ;;  %v2206_v52 = vpop.xlane.xlu0 %2205  ;;  %v5898_v42 = vpop.eup %5897 }
 0x462   : > { %v2270_v1 = vmax.f32 %v2206_v52, 1e-30  ;;  %5909 = vrcp.f32 %v2268_v60  ;;  %v5900_v31 = vpop.eup %5899  ;;  %v2330_v7 = vmul.f32 %v5898_v42, %v7144_v43  ;;  %v2209_v57 = vpop.xlane.xlu1 %2208 }
 0x463   : > { %v5902_v24 = vpop.eup %5901  ;;  %v2328_v32 = vmul.f32 %v5900_v31, %v7133_v61  ;;  %v2271_v60 = vmax.f32 %v2209_v57, 1e-30  ;;  %v2384_v57 = vcombine.high %v7255_v62, %v7252_v2 }
 0x464   : > { %5911 = vrcp.f32 %v2270_v1  ;;  %v5904_v48 = vpop.eup %5903  ;;  %v2329_v22 = vmul.f32 %v5902_v24, %v7139_v19 }
 0x465   : > { %v2212_v58 = vpop.xlane.xlu0 %2211  ;;  %v2327_v12 = vmul.f32 %v5904_v48, %v7128_v39  ;;  %v2427_v18 = vcombine.low %v2328_v32, %v2330_v7 }
 0x466   : > { %v2272_v37 = vmax.f32 %v2212_v58, 1e-30 }
 0x467   : > { %v2419_v4 = vcombine.low %v2327_v12, %v2329_v22  ;;  %v2434_v61 = vrot.slane %v2427_v18, %v6398_v44 }
 0x469   : > { %v2215_v30 = vpop.xlane.xlu1 %2214  ;;  %v2426_v15 = vrot.slane %v2419_v4, %v6398_v44 }
 0x46b   : > { %v2451_v1 = vcombine.low %v2426_v15, %v2434_v61 }
 0x46d   : > { %v5906_v34 = vpop.eup %5905  ;;  %v2218_v16 = vpop.xlane.xlu0 %2217  ;;  %v7292_v58 = vrot.slane %v2451_v1, %v6403_v50 }
 0x46e   : > { %v5908_v20 = vpop.eup %5907  ;;  %v2333_v13 = vmul.f32 %v5906_v34, %v7159_v45  ;;  %v2274_v21 = vmax.f32 %v2218_v16, 1e-30  ;;  %v2273_v45 = vmax.f32 %v2215_v30, 1e-30  ;;  %v7313_v30 = vrot.slane %v2384_v57, %v6403_v50 }
 0x46f   : > { %v5910_v17 = vpop.eup %5909  ;;  %v2331_v43 = vmul.f32 %v5908_v20, %v7149_v55 }
 0x470   : > { %v2332_v19 = vmul.f32 %v5910_v17, %v7154_v38  ;;  %5913 = vrcp.f32 %v2274_v21  ;;  %v2400_v38 = vcombine.high %v7258_v49, %v7261_v0  ;;  %v2416_v0 = vcombine.high %v7271_v8, %v7268_v10 }
 0x471   : > { %v5912_v11 = vpop.eup %5911  ;;  %v2435_v29 = vcombine.low %v2331_v43, %v2333_v13  ;;  %v2221_v39 = vpop.xlane.xlu1 %2220  ;;  %5915 = vrcp.f32 %v2272_v37 }
 0x472   : > { %v2334_v40 = vmul.f32 %v5912_v11, %v7166_v46  ;;  %v2275_v55 = vmax.f32 %v2221_v39, 1e-30  ;;  %v2452_v46 = vcombine.high %v2426_v15, %v2434_v61  ;;  %5917 = vrcp.f32 %v2273_v45 }
 0x473   : > { %v2442_v42 = vrot.slane %v2435_v29, %v6398_v44  ;;  %5919 = vrcp.f32 %v2271_v60  ;;  %v7303_v20 = vrot.slane %v2400_v38, %v6403_v50 }
 0x474   : > { %v2443_v63 = vcombine.low %v2332_v19, %v2334_v40  ;;  %5921 = vrcp.f32 %v2275_v55  ;;  %v7308_v62 = vrot.slane %v2452_v46, %v6403_v50 }
 0x475   : > { %v2224_v52 = vpop.xlane.xlu0 %2223  ;;  %v2417_v43 = vcombine.low %v7313_v30, %v7303_v20 }
 0x476   : > { %v2450_v31 = vrot.slane %v2443_v63, %v6398_v44  ;;  %v2276_v24 = vmax.f32 %v2224_v52, 1e-30 }
 0x478   : > { %v2467_v48 = vcombine.low %v2442_v42, %v2450_v31  ;;  %v2468_v32 = vcombine.high %v2442_v42, %v2450_v31 }
 0x479   : > { %v2227_v7 = vpop.xlane.xlu1 %2226 }
 0x47a   : > { %v2277_v22 = vmax.f32 %v2227_v7, 1e-30  ;;  %v7295_v34 = vrot.slane %v2467_v48, %v6403_v50  ;;  %v7298_v49 = vrot.slane %v2468_v32, %v6403_v50 }
 0x47c   : > { %5923 = vrcp.f32 %v2277_v22  ;;  %v2484_v2 = vcombine.high %v7292_v58, %v7295_v34  ;;  %v2483_v18 = vcombine.low %v7292_v58, %v7295_v34  ;;  %v2485_v16 = vcombine.low %v7308_v62, %v7298_v49 }
 0x47d   : > { %5925 = vrcp.f32 %v2276_v24  ;;  %v2230_v12 = vpop.xlane.xlu0 %2229  ;;  %v5914_v61 = vpop.eup %5913 }
 0x47e   : > { %v2278_v13 = vmax.f32 %v2230_v12, 1e-30  ;;  %v5757_v17 = vpack.i.bf16 %v2484_v2, %v2416_v0  ;;  %v5767_v11 = vpack.i.bf16 %v2485_v16, %v2417_v43  ;;  %v5916_v19 = vpop.eup %5915  ;;  %v2338_v15 = vmul.f32 %v5914_v61, %v7183_v41 }
 0x47f   : > { %v5918_v29 = vpop.eup %5917  ;;  %v2336_v1 = vmul.f32 %v5916_v19, %v7173_v35 }
 0x480   : > { %5927 = vrcp.f32 %v2278_v13  ;;  %5758 = vrot.lane.b32.xlu1 %v5757_v17, %s6176_s26  ;;  %v5920_v39 = vpop.eup %5919  ;;  %v2337_v55 = vmul.f32 %v5918_v29, %v7178_v14 }
 0x481   : > { %v2233_v4 = vpop.xlane.xlu1 %2232  ;;  %v5922_v63 = vpop.eup %5921  ;;  %v2335_v7 = vmul.f32 %v5920_v39, %v7163_v51  ;;  %v2495_v41 = vcombine.low %v2336_v1, %v2338_v15 }
 0x482   : > { %v2279_v37 = vmax.f32 %v2233_v4, 1e-30  ;;  %v2339_v32 = vmul.f32 %v5922_v63, %v7189_v59 }
 0x483   : > { %v2487_v0 = vcombine.low %v2335_v7, %v2337_v55  ;;  %v2502_v51 = vrot.slane %v2495_v41, %v6398_v44 }
 0x484   : > { %5768 = vrot.lane.b32.xlu1 %v5767_v11, %s6177_s27  ;;  %5929 = vrcp.f32 %v2279_v37 }
 0x485   : > { %v2239_v40 = vpop.xlane.xlu1 %2238  ;;  %v2236_v21 = vpop.xlane.xlu0 %2235  ;;  %v2494_v59 = vrot.slane %v2487_v0, %v6398_v44 }
 0x486   : > { %v2281_v45 = vmax.f32 %v2239_v40, 1e-30  ;;  %v2280_v60 = vmax.f32 %v2236_v21, 1e-30 }
 0x487   : > { %v2519_v11 = vcombine.low %v2494_v59, %v2502_v51 }
 0x488   : > { %5931 = vrcp.f32 %v2281_v45 }
 0x489   : > { %v5924_v52 = vpop.eup %5923  ;;  %v2245_v42 = vpop.xlane.xlu1 %2244  ;;  %5933 = vrcp.f32 %v2280_v60  ;;  %v7337_v40 = vrot.slane %v2519_v11, %v6403_v50  ;;  %v2486_v11 = vcombine.high %v7308_v62, %v7298_v49 }
 0x48a   : > { %v2242_v31 = vpop.xlane.xlu0 %2241  ;;  %v5926_v38 = vpop.eup %5925  ;;  %v2341_v46 = vmul.f32 %v5924_v52, %v7201_v25  ;;  %v2283_v48 = vmax.f32 %v2245_v42, 1e-30 }
 0x48b   : > { %v2282_v24 = vmax.f32 %v2242_v31, 1e-30  ;;  %v2340_v35 = vmul.f32 %v5926_v38, %v7195_v3 }
 0x48c   : > { %v2503_v13 = vcombine.low %v2339_v32, %v2341_v46 }
 0x48d   : > { %v5928_v22 = vpop.eup %5927  ;;  %5935 = vrcp.f32 %v2282_v24  ;;  %v2251_v14 = vpop.xlane.xlu1 %2250 }
 0x48e   : > { %v2248_v57 = vpop.xlane.xlu0 %2247  ;;  %v2342_v12 = vmul.f32 %v5928_v22, %v7206_v5  ;;  %v2285_v25 = vmax.f32 %v2251_v14, 1e-30  ;;  %5937 = vrcp.f32 %v2283_v48  ;;  %v2510_v3 = vrot.slane %v2503_v13, %v6398_v44 }
 0x48f   : > { %v2284_v2 = vmax.f32 %v2248_v57, 1e-30 }
 0x490   : > { %5939 = vrcp.f32 %v2285_v25  ;;  %v2511_v17 = vcombine.low %v2340_v35, %v2342_v12 }
 0x491   : > { %5941 = vrcp.f32 %v2284_v2  ;;  %v5930_v19 = vpop.eup %5929 }
 0x492   : > { %v2254_v16 = vpop.xlane.xlu0 %2253  ;;  %v2518_v43 = vrot.slane %v2511_v17, %v6398_v44  ;;  %v2343_v1 = vmul.f32 %v5930_v19, %v7211_v33  ;;  %v2520_v33 = vcombine.high %v2494_v59, %v2502_v51  ;;  %v2418_v19 = vcombine.high %v7313_v30, %v7303_v20 }
 0x493   : > { %v2286_v4 = vmax.f32 %v2254_v16, 1e-30 }
 0x494   : > { %v2535_v5 = vcombine.low %v2510_v3, %v2518_v43  ;;  %v2536_v41 = vcombine.high %v2510_v3, %v2518_v43 }
 0x495   : > { %5943 = vrcp.f32 %v2286_v4  ;;  %v5932_v21 = vpop.eup %5931 }
 0x496   : > { %v7334_v61 = vrot.slane %v2535_v5, %v6403_v50  ;;  %v5934_v29 = vpop.eup %5933  ;;  %v2345_v63 = vmul.f32 %v5932_v21, %v7213_v36  ;;  %v2550_v14 = vrot.slane %v2536_v41, %v6403_v50 }
 0x497   : > { %v2344_v60 = vmul.f32 %v5934_v29, %v7217_v28  ;;  %v5777_v29 = vpack.i.bf16 %v2486_v11, %v2418_v19 }
 0x498   : > { %v2551_v37 = vcombine.low %v7337_v40, %v7334_v61  ;;  %v2555_v46 = vcombine.low %v2343_v1, %v2345_v63  ;;  %v2552_v17 = vcombine.high %v7337_v40, %v7334_v61 }
 0x49a   : > { %v5936_v39 = vpop.eup %5935  ;;  %v2562_v28 = vrot.slane %v2555_v46, %v6398_v44 }
 0x49b   : > { %v2346_v15 = vmul.f32 %v5936_v39, %v7225_v27  ;;  %v5938_v45 = vpop.eup %5937 }
 0x49c   : > { %v2347_v38 = vmul.f32 %v5938_v45, %v7223_v53 }
 0x49d   : > { %v5940_v52 = vpop.eup %5939  ;;  %v2563_v42 = vcombine.low %v2344_v60, %v2346_v15 }
 0x49e   : > { %v2349_v55 = vmul.f32 %v5940_v52, %v7231_v56  ;;  %v5942_v31 = vpop.eup %5941 }
 0x49f   : > { %v2348_v7 = vmul.f32 %v5942_v31, %v7233_v47  ;;  %v2570_v48 = vrot.slane %v2563_v42, %v6398_v44 }
 0x4a0   : > { %v2571_v36 = vcombine.low %v2347_v38, %v2349_v55 }
 0x4a1   : > { %v2588_v35 = vcombine.high %v2562_v28, %v2570_v48  ;;  %v2587_v53 = vcombine.low %v2562_v28, %v2570_v48 }
 0x4a2   : > { %v5944_v24 = vpop.eup %5943  ;;  %v2578_v56 = vrot.slane %v2571_v36, %v6398_v44 }
 0x4a3   : > { %v2350_v27 = vmul.f32 %v5944_v24, %v7239_v9  ;;  %v2534_v9 = vrot.slane %v2520_v33, %v6403_v50  ;;  %v2602_v0 = vrot.slane %v2588_v35, %v6403_v50  ;;  %v2595_v25 = vrot.slane %v2587_v53, %v6403_v50  ;;  %v250_v33 = vld [vmem:[#allocation2 + $0x38] sm:$0xff]  ;;  %v248_v35 = vld [vmem:[#allocation2 + $0x28] sm:$0xff] }
 0x4a5   : > { %v2579_v32 = vcombine.low %v2348_v7, %v2350_v27  ;;  %v2553_v13 = vcombine.low %v2534_v9, %v2550_v14  ;;  %v2554_v5 = vcombine.high %v2534_v9, %v2550_v14  ;;  %v5616_v14 = vpop.f32.mrf.mxu0 }
 0x4a7   : > { %v2586_v22 = vrot.slane %v2579_v32, %v6398_v44  ;;  %v249_v32 = vld [vmem:[#allocation2 + $0x30] sm:$0xff] }
 0x4a9   : > { %v2604_v57 = vcombine.high %v2578_v56, %v2586_v22  ;;  %v2603_v47 = vcombine.low %v2578_v56, %v2586_v22  ;;  %v247_v56 = vld [vmem:[#allocation2 + $0x20] sm:$0xff]  ;;  %v2796_v22 = vpack.c.bf16 %v250_v33, %v249_v32 }
 0x4aa   : > { %v2795_v53 = vpack.c.bf16 %v248_v35, %v247_v56 }
 0x4ab   : > { %v2618_v12 = vrot.slane %v2604_v57, %v6403_v50  ;;  %v2611_v2 = vrot.slane %v2603_v47, %v6403_v50  ;;  %5644 = vmatprep.subr.bf16.mxu1 %v2796_v22  ;;  %v315_v57 = vpop.f32.mrf.mxu0 }
 0x4ac   : > { %5645 = vmatpush3.bf16.msra.mxu1 %v2796_v22 }
 0x4ad   : > { %v2621_v51 = vcombine.low %v2602_v0, %v2618_v12  ;;  %v2620_v16 = vcombine.high %v2595_v25, %v2611_v2  ;;  %v2619_v59 = vcombine.low %v2595_v25, %v2611_v2  ;;  %v2622_v43 = vcombine.high %v2602_v0, %v2618_v12  ;;  %5646 = vmatprep.subr.bf16.mxu1 %v2795_v53  ;;  %v5617_v47 = vpop.f32.mrf.mxu0 }
 0x4af   : > { %v5772_v4 = vpack.i.bf16 %v2621_v51, %v2553_v13  ;;  %v5762_v3 = vpack.i.bf16 %v2620_v16, %v2552_v17  ;;  %v5782_v21 = vpack.i.bf16 %v2622_v43, %v2554_v5  ;;  %v318_v9 = vpop.f32.mrf.mxu0  ;;  %v5528_v51 = vld [vmem:[#allocation2 + $0xa4] ss:$0 sm:$0xff] }
 0x4b0   : > { %5647 = vmatpush3.bf16.msra.mxu1 %v2795_v53 }
 0x4b1   : > { %5773 = vrot.lane.b32.xlu1 %v5772_v4, %s6177_s27  ;;  %5763 = vrot.lane.b32.xlu0 %v5762_v3, %s6176_s26 }
 0x4b5   : > { %5783 = vrot.lane.b32.xlu1 %v5782_v21, %s6178_s28  ;;  %5778 = vrot.lane.b32.xlu0 %v5777_v29, %s6178_s28 }
 0x4f2   : > { %v5759_v39 = vpop.permute.xlu1 %5758 }
 0x4f3   : > { %v5761_v45 = vunpack.i.h.bf16 %v5759_v39  ;;  %v5760_v63 = vunpack.i.l.bf16 %v5759_v39 }
 0x4f5   : > { %v2672_v38 = vsel %vm2671_vm6, %v2415_v23, %v5760_v63  ;;  %v2673_v46 = vsel %vm2671_vm6, %v2483_v18, %v5761_v45  ;;  %v5532_v45 = vld [vmem:[#allocation2 + $0xa2] ss:$0 sm:$0xff] }
 0x4f6   : > { %v5769_v15 = vpop.permute.xlu1 %5768 }
 0x4f7   : > { %v5771_v1 = vunpack.i.h.bf16 %v5769_v15  ;;  %v5770_v55 = vunpack.i.l.bf16 %v5769_v15 }
 0x4f9   : > { %v2677_v10 = vsel %vm2676_vm10, %v2672_v38, %v5770_v55  ;;  %v2678_v8 = vsel %vm2676_vm10, %v2673_v46, %v5771_v1  ;;  %v5531_v55 = vld [vmem:[#allocation2 + $0xa3] ss:$0 sm:$0xff] }
 0x523   : > { %v5774_v49 = vpop.permute.xlu1 %5773  ;;  %v5764_v62 = vpop.permute.xlu0 %5763 }
 0x524   : > { %v5766_v60 = vunpack.i.h.bf16 %v5764_v62  ;;  %v5765_v52 = vunpack.i.l.bf16 %v5764_v62  ;;  %v5776_v42 = vunpack.i.h.bf16 %v5774_v49  ;;  %v5775_v20 = vunpack.i.l.bf16 %v5774_v49 }
 0x526   : > { %v2674_v30 = vsel %vm2671_vm6, %v2551_v37, %v5765_v52  ;;  %v2675_v31 = vsel %vm2671_vm6, %v2619_v59, %v5766_v60 }
 0x527   : > { %v5784_v24 = vpop.permute.xlu1 %5783  ;;  %v5779_v7 = vpop.permute.xlu0 %5778  ;;  %v2679_v48 = vsel %vm2676_vm10, %v2674_v30, %v5775_v20  ;;  %v2680_v36 = vsel %vm2676_vm10, %v2675_v31, %v5776_v42 }
 0x528   : > { %v5786_v27 = vunpack.i.h.bf16 %v5784_v24  ;;  %v5785_v61 = vunpack.i.l.bf16 %v5784_v24  ;;  %v5781_v40 = vunpack.i.h.bf16 %v5779_v7  ;;  %v5780_v37 = vunpack.i.l.bf16 %v5779_v7 }
 0x52a   : > { %v2684_v23 = vsel %vm2681_vm11, %v2679_v48, %v5785_v61  ;;  %v2685_v58 = vsel %vm2681_vm11, %v2680_v36, %v5786_v27  ;;  %v2682_v34 = vsel %vm2681_vm11, %v2677_v10, %v5780_v37  ;;  %v2683_v18 = vsel %vm2681_vm11, %v2678_v8, %v5781_v40 }
 0x52b   : > { %v2722_v41 = vpack.c.bf16 %v2683_v18, %v2682_v34  ;;  %v2723_v28 = vpack.c.bf16 %v2685_v58, %v2684_v23 }
 0x52d   : > { %5640 = vmatprep.mubr.bf16.mxu0 %v2722_v41 }
 0x52e   : > { %5641 = vmatmul.mubr.bf16.vlgmr.msra.gmra.mxu0 %v2723_v28 }
 0x5ee   : > { %v5642_v0 = vpop.f32.mrf.mxu0 }
 0x5ef   : > { %v2775_v2 = vadd.f32 %v5642_v0, %v5616_v14 }
 0x5f0   : > { %v2766_v12 = vpop.f32.mrf.mxu0 }
 0x5f1   : > { %v2767_v25 = vadd.f32 %v2766_v12, %v315_v57  ;;  %v7394_v43 = vadd.f32 %v5528_v51, %v2775_v2 }
 0x5f2   : > { %v5643_v13 = vpop.f32.mrf.mxu0 }
 0x5f3   : > { %v2778_v17 = vadd.f32 %v5643_v13, %v5617_v47  ;;  %v7390_v59 = vadd.f32 %v5528_v51, %v2767_v25  ;;  %8590 = vst [vmem:[#allocation16_spill] sm:$0xff] %v7394_v43  ;;  %v8562_v29 = vmax.f32 %v7394_v43, 0.0 }
 0x5f4   : > { %v2769_v16 = vpop.f32.mrf.mxu0 }
 0x5f5   : > { %8588 = vst [vmem:[#allocation14_spill] sm:$0xff] %v7390_v59  ;;  %v7392_v4 = vadd.f32 %v5528_v51, %v2778_v17  ;;  %v2770_v3 = vadd.f32 %v2769_v16, %v318_v9  ;;  %v8563_v19 = vmax.f32 %v7390_v59, 0.0 }
 0x5f7   : > { %8589 = vst [vmem:[#allocation15_spill] sm:$0xff] %v7392_v4  ;;  %v7396_v11 = vadd.f32 %v5528_v51, %v2770_v3  ;;  %v8561_v5 = vmax.f32 %v7392_v4, 0.0 }
 0x5f9   : > { %8591 = vst [vmem:[#allocation17_spill] sm:$0xff] %v7396_v11  ;;  %v8560_v21 = vmax.f32 %v7396_v11, 0.0  ;;  %v2794_v15 = vpack.c.bf16 %v8561_v5, %v8562_v29 }
 0x5fb   : > { %v2793_v39 = vpack.c.bf16 %v8560_v21, %v8563_v19 }
 0x5fd   : > { %5648 = vmatprep.mubr.msk.bf16.mxu1 %vm2671_vm6, %v2793_v39 }
 0x5fe   : > { %5649 = vmatmul.mubr.msk.bf16.vlgmr.msra.gmra.mxu1 %vm2671_vm6, %v2794_v15 }
 0x6be   : > { %v5650_v63 = vpop.f32.mrf.mxu1 }
 0x6bf   : > { %v7412_v49 = vmul.f32 %v5650_v63, %v5532_v45  ;;  %v7426_v31 = vmul.f32 %v5650_v63, %v5531_v55 }
 0x6c0   : > { %v2837_v62 = vpop.f32.mrf.mxu1 }
 0x6c1   : > { %3296 = vrot.lane.b32.xlu1 %v7412_v49, %s6168_s10  ;;  %3284 = vrot.lane.b32.xlu0 %v7412_v49, %s6169_s11  ;;  %v7418_v52 = vmul.f32 %v5532_v45, %v2837_v62  ;;  %v7472_v27 = vmul.f32 %v5531_v55, %v2837_v62 }
 0x6c2   : > { %v5651_v60 = vpop.f32.mrf.mxu1 }
 0x6c3   : > { %v5534_v1 = vpack.c.bf16 %v5651_v60, %v5650_v63  ;;  %v7428_v38 = vmul.f32 %v5651_v60, %v5532_v45  ;;  %v7446_v24 = vmul.f32 %v5651_v60, %v5531_v55 }
 0x6c4   : > { %v2840_v42 = vpop.f32.mrf.mxu1 }
 0x6c5   : > { %v5537_v20 = vpack.c.bf16 %v2840_v42, %v2837_v62  ;;  %3308 = vrot.lane.b32.xlu0 %v7412_v49, %s6170_s17  ;;  %3292 = vrot.lane.b32.xlu1 %v7418_v52, %s6168_s10  ;;  %v7474_v61 = vmul.f32 %v5532_v45, %v2840_v42  ;;  %v7492_v37 = vmul.f32 %v5531_v55, %v2840_v42 }
 0x6c6   : > { %5652 = vmatprep.subr.msk.bf16.mxu1 %vm6293_vm4, %v5534_v1 }
 0x6c7   : > { %5653 = vmatpush3.bf16.msk.msra.mxu1 %vm6293_vm4, %v5534_v1 }
 0x6c8   : > { %5654 = vmatprep.subr.msk.bf16.mxu1 %vm6293_vm4, %v5537_v20 }
 0x6c9   : > { %2868 = vrot.lane.b32.xlu0 %v7426_v31, %s6169_s11  ;;  %3286 = vrot.lane.b32.xlu1 %v7428_v38, %s6169_s11 }
 0x6cb   : > { %5655 = vmatpush3.bf16.msk.msra.mxu1 %vm6293_vm4, %v5537_v20  ;;  %vm8598_vm4 = vcmask 1045509  }
 0x6cc   : > { %5656 = vmatprep.subr.msk.bf16.mxu1 %vm6315_vm8, %v5534_v1  ;;  %vm8604_vm9 = vmmov %vm8598_vm4 }
 0x6cd   : > { %2880 = vrot.lane.b32.xlu0 %v7426_v31, %s6168_s10  ;;  %3310 = vrot.lane.b32.xlu1 %v7428_v38, %s6170_s17 }
 0x6cf   : > { %5657 = vmatpush3.bf16.msk.msra.mxu1 %vm6315_vm8, %v5534_v1 }
 0x6d0   : > { %5658 = vmatprep.subr.msk.bf16.mxu1 %vm6315_vm8, %v5537_v20 }
 0x6d1   : > { %2892 = vrot.lane.b32.xlu0 %v7426_v31, %s6170_s17  ;;  %2870 = vrot.lane.b32.xlu1 %v7446_v24, %s6169_s11 }
 0x6d3   : > { %5659 = vmatpush3.bf16.msk.msra.mxu1 %vm6315_vm8, %v5537_v20  ;;  %vm8599_vm8 = vcmask 1046534  }
 0x6d4   : > { %5660 = vmatprep.subr.msk.bf16.mxu1 %vm6337_vm12, %v5534_v1  ;;  %vm8605_vm5 = vmmov %vm8599_vm8 }
 0x6d5   : > { %3280 = vrot.lane.b32.xlu0 %v7418_v52, %s6169_s11  ;;  %2882 = vrot.lane.b32.xlu1 %v7446_v24, %s6168_s10 }
 0x6d7   : > { %5661 = vmatpush3.bf16.msk.msra.mxu1 %vm6337_vm12, %v5534_v1 }
 0x6d8   : > { %5662 = vmatprep.subr.msk.bf16.mxu1 %vm6337_vm12, %v5537_v20 }
 0x6d9   : > { %3304 = vrot.lane.b32.xlu0 %v7418_v52, %s6170_s17  ;;  %2894 = vrot.lane.b32.xlu1 %v7446_v24, %s6170_s17 }
 0x6db   : > { %5663 = vmatpush3.bf16.msk.msra.mxu1 %vm6337_vm12, %v5537_v20  ;;  %vm8600_vm12 = vcmask 1047559  }
 0x6dc   : > { %5664 = vmatprep.subr.msk.bf16.mxu1 %vm6357_vm14, %v5534_v1  ;;  %vm8603_vm7 = vmmov %vm8600_vm12 }
 0x6dd   : > { %2864 = vrot.lane.b32.xlu0 %v7472_v27, %s6169_s11  ;;  %3282 = vrot.lane.b32.xlu1 %v7474_v61, %s6169_s11 }
 0x6df   : > { %5665 = vmatpush3.bf16.msk.msra.mxu1 %vm6357_vm14, %v5534_v1 }
 0x6e0   : > { %5666 = vmatprep.subr.msk.bf16.mxu1 %vm6357_vm14, %v5537_v20 }
 0x6e1   : > { %2876 = vrot.lane.b32.xlu0 %v7472_v27, %s6168_s10  ;;  %3306 = vrot.lane.b32.xlu1 %v7474_v61, %s6170_s17 }
 0x6e3   : > { %5667 = vmatpush3.bf16.msk.msra.mxu1 %vm6357_vm14, %v5537_v20  ;;  %vm8601_vm14 = vmmov %vm8598_vm4 }
 0x6e5   : > { %2888 = vrot.lane.b32.xlu0 %v7472_v27, %s6170_s17  ;;  %2866 = vrot.lane.b32.xlu1 %v7492_v37, %s6169_s11  ;;  %s6179_s11 = smov [#allocation5]  }
 0x6e9   : > { %3298 = vrot.lane.b32.xlu0 %v7428_v38, %s6168_s10  ;;  %2878 = vrot.lane.b32.xlu1 %v7492_v37, %s6168_s10 }
 0x6ed   : > { %3294 = vrot.lane.b32.xlu0 %v7474_v61, %s6168_s10  ;;  %2890 = vrot.lane.b32.xlu1 %v7492_v37, %s6170_s17  ;;  %s6099_s10 = scalar_lea.vmem %s8488_s5, 512  ;;  %s6103_s17 = sshll.u32 %s6179_s11, 4  ;;  %s6104_s17 = int_to_ptr.vmem [resolvable:$false] %s6103_s17 }
 0x6ee   : > { %p6100_p6 = scmp.ne.s32.totalorder %s8488_s5, %s6099_s10  ;;  %s6105_s19 = scalar_lea.vmem %s6104_s17, 1024 }
 0x6ef   : > { %p6106_p11 = scmp.lt.s32.totalorder %s8488_s5, %s6104_s17  ;;  %p6107_p12 = scmp.lt.s32.totalorder %s6105_s19, %s6099_s10 }
 0x6f0   : > { %p6101_p9 = pnand %p6100_p6, %p6240_p5 }
 0x6f1   : > { %p6108_p13 = por %p6107_p12, %p6106_p11 }
 0x6f2   : > { %p6102_p10 = pneg %p6101_p9 }
 0x6f4   : > { %p6109_p0 = pnand %p6108_p13, %p6102_p10 }
 0x733   : > { %v3297_v48 = vpop.permute.xlu1 %3296  ;;  %v3285_v36 = vpop.permute.xlu0 %3284 }
 0x734   : > { %v3452_v10 = vcombine.low %v7412_v49, %v3297_v48  ;;  %v3453_v8 = vcombine.high %v7412_v49, %v3297_v48 }
 0x736   : > { %v3460_v18 = vrot.slane %v3452_v10, %v6398_v44  ;;  %v3467_v41 = vrot.slane %v3453_v8, %v6398_v44 }
 0x737   : > { %v3309_v23 = vpop.permute.xlu0 %3308  ;;  %v3293_v17 = vpop.permute.xlu1 %3292 }
 0x738   : > { %v3468_v58 = vcombine.low %v3285_v36, %v3309_v23  ;;  %v3469_v34 = vcombine.high %v3285_v36, %v3309_v23  ;;  %v3316_v62 = vcombine.low %v7418_v52, %v3293_v17  ;;  %v3317_v23 = vcombine.high %v7418_v52, %v3293_v17 }
 0x73a   : > { %v3476_v28 = vrot.slane %v3468_v58, %v6398_v44  ;;  %v3483_v32 = vrot.slane %v3469_v34, %v6398_v44  ;;  %v3324_v7 = vrot.slane %v3316_v62, %v6398_v44 }
 0x73b   : > { %v2869_v33 = vpop.permute.xlu0 %2868 }
 0x73c   : > { %v3500_v56 = vcombine.low %v3467_v41, %v3483_v32  ;;  %v3484_v22 = vcombine.low %v3460_v18, %v3476_v28  ;;  %v3485_v14 = vcombine.high %v3460_v18, %v3476_v28  ;;  %v3501_v0 = vcombine.high %v3467_v41, %v3483_v32 }
 0x73e   : > { %v7515_v35 = vrot.slane %v3500_v56, %v6403_v50  ;;  %v3492_v53 = vrot.slane %v3484_v22, %v6403_v50  ;;  %v3499_v25 = vrot.slane %v3485_v14, %v6403_v50  ;;  %v7524_v51 = vrot.slane %v3501_v0, %v6403_v50  ;;  %v7555_v0 = vpop.permute.xlu1 %3286 }
 0x73f   : > { %v2881_v57 = vpop.permute.xlu0 %2880  ;;  %v3331_v56 = vrot.slane %v3317_v23, %v6398_v44 }
 0x740   : > { %v3648_v47 = vsel %vm700_vm15, %v7515_v35, 0.0  ;;  %v3636_v9 = vsel %vm700_vm15, %v3492_v53, 0.0  ;;  %v3036_v12 = vcombine.low %v7426_v31, %v2881_v57  ;;  %v3642_v15 = vsel %vm700_vm15, %v3499_v25, 0.0 }
 0x741   : > { %3649 = vadd.xlane.f32.xlu0 %v3648_v47  ;;  %3637 = vadd.xlane.f32.xlu1 %v3636_v9  ;;  %v3037_v63 = vcombine.high %v7426_v31, %v2881_v57  ;;  %v3654_v1 = vsel %vm700_vm15, %v7524_v51, 0.0 }
 0x742   : > { %v3044_v16 = vrot.slane %v3036_v12, %v6398_v44  ;;  %v7569_v62 = vpop.permute.xlu1 %3310 }
 0x743   : > { %v2893_v2 = vpop.permute.xlu0 %2892  ;;  %v3051_v30 = vrot.slane %v3037_v63, %v6398_v44 }
 0x744   : > { %v3052_v13 = vcombine.low %v2869_v33, %v2893_v2  ;;  %v3053_v3 = vcombine.high %v2869_v33, %v2893_v2  ;;  %v8596_v2 = vmov 0.0  }
 0x745   : > { %3643 = vadd.xlane.f32.xlu1 %v3642_v15 }
 0x746   : > { %v3060_v39 = vrot.slane %v3052_v13, %v6398_v44  ;;  %v3067_v60 = vrot.slane %v3053_v3, %v6398_v44  ;;  %v3516_v13 = vcombine.high %v3492_v53, %v8596_v2 }
 0x747   : > { %v3281_v45 = vpop.permute.xlu0 %3280 }
 0x748   : > { %v3068_v49 = vcombine.low %v3044_v16, %v3060_v39  ;;  %v3069_v42 = vcombine.high %v3044_v16, %v3060_v39  ;;  %v3084_v10 = vcombine.low %v3051_v30, %v3067_v60  ;;  %v3085_v18 = vcombine.high %v3051_v30, %v3067_v60 }
 0x749   : > { %3655 = vadd.xlane.f32.xlu1 %v3654_v1  ;;  %v3639_v15 = vsel %vm700_vm15, %v3516_v13, 0.0  ;;  %v3518_v30 = vcombine.high %v7515_v35, %v8596_v2 }
 0x74a   : > { %v3076_v55 = vrot.slane %v3068_v49, %v6403_v50  ;;  %v3083_v36 = vrot.slane %v3069_v42, %v6403_v50  ;;  %v3092_v33 = vrot.slane %v3084_v10, %v6403_v50  ;;  %v3099_v47 = vrot.slane %v3085_v18, %v6403_v50 }
 0x74b   : > { %v3305_v20 = vpop.permute.xlu0 %3304  ;;  %v3519_v10 = vcombine.high %v7524_v51, %v8596_v2 }
 0x74c   : > { %v3332_v46 = vcombine.low %v3281_v45, %v3305_v20  ;;  %v3220_v31 = vsel %vm700_vm15, %v3076_v55, 0.0  ;;  %v3333_v40 = vcombine.high %v3281_v45, %v3305_v20  ;;  %v3226_v28 = vsel %vm700_vm15, %v3083_v36, 0.0 }
 0x74d   : > { %3221 = vadd.xlane.f32.xlu1 %v3220_v31  ;;  %v3232_v57 = vsel %vm700_vm15, %v3092_v33, 0.0  ;;  %v3238_v17 = vsel %vm700_vm15, %v3099_v47, 0.0  ;;  %v3517_v45 = vcombine.high %v3499_v25, %v8596_v2  ;;  %v3100_v42 = vcombine.high %v3076_v55, %v8596_v2 }
 0x74e   : > { %v3340_v48 = vrot.slane %v3332_v46, %v6398_v44  ;;  %v3347_v41 = vrot.slane %v3333_v40, %v6398_v44  ;;  %v3101_v40 = vcombine.high %v3083_v36, %v8596_v2  ;;  %v3651_v55 = vsel %vm700_vm15, %v3518_v30, 0.0 }
 0x74f   : > { %v2865_v8 = vpop.permute.xlu0 %2864  ;;  %v3645_v1 = vsel %vm700_vm15, %v3517_v45, 0.0  ;;  %v3223_v31 = vsel %vm700_vm15, %v3100_v42, 0.0  ;;  %v3657_v36 = vsel %vm700_vm15, %v3519_v10, 0.0  ;;  %v3536_v30 = vcombine.low %v7555_v0, %v7569_v62 }
 0x750   : > { %v3348_v58 = vcombine.low %v3324_v7, %v3340_v48  ;;  %v3349_v34 = vcombine.high %v3324_v7, %v3340_v48  ;;  %v3364_v9 = vcombine.low %v3331_v56, %v3347_v41  ;;  %v3365_v3 = vcombine.high %v3331_v56, %v3347_v41  ;;  %v7579_v7 = vpop.permute.xlu1 %2870 }
 0x751   : > { %3227 = vadd.xlane.f32.xlu1 %v3226_v28 }
 0x752   : > { %v7544_v32 = vrot.slane %v3348_v58, %v6403_v50  ;;  %v7551_v52 = vrot.slane %v3349_v34, %v6403_v50  ;;  %v7562_v16 = vrot.slane %v3364_v9, %v6403_v50  ;;  %v3379_v53 = vrot.slane %v3365_v3, %v6403_v50 }
 0x753   : > { %v2877_v22 = vpop.permute.xlu0 %2876  ;;  %v3229_v58 = vsel %vm700_vm15, %v3101_v40, 0.0  ;;  %v3102_v34 = vcombine.high %v3092_v33, %v8596_v2  ;;  %v3103_v33 = vcombine.high %v3099_v47, %v8596_v2 }
 0x754   : > { %v3588_v14 = vsel %vm700_vm15, %v7544_v32, 0.0  ;;  %v3594_v12 = vsel %vm700_vm15, %v7551_v52, 0.0  ;;  %v3600_v49 = vsel %vm700_vm15, %v7562_v16, 0.0  ;;  %v2900_v60 = vcombine.low %v7472_v27, %v2877_v22  ;;  %v7592_v56 = vpop.permute.xlu1 %2882 }
 0x755   : > { %3589 = vadd.xlane.f32.xlu0 %v3588_v14  ;;  %3233 = vadd.xlane.f32.xlu1 %v3232_v57  ;;  %v3606_v25 = vsel %vm700_vm15, %v3379_v53, 0.0  ;;  %v2901_v35 = vcombine.high %v7472_v27, %v2877_v22  ;;  %v3235_v22 = vsel %vm700_vm15, %v3102_v34, 0.0  ;;  %v3241_v3 = vsel %vm700_vm15, %v3103_v33, 0.0 }
 0x756   : > { %v2908_v46 = vrot.slane %v2900_v60, %v6398_v44  ;;  %v3381_v47 = vcombine.high %v7551_v52, %v8596_v2  ;;  %v3383_v60 = vcombine.high %v3379_v53, %v8596_v2  ;;  %v3380_v40 = vcombine.high %v7544_v32, %v8596_v2 }
 0x757   : > { %v2889_v39 = vpop.permute.xlu0 %2888  ;;  %v2915_v51 = vrot.slane %v2901_v35, %v6398_v44  ;;  %v3382_v35 = vcombine.high %v7562_v16, %v8596_v2  ;;  %v3104_v16 = vcombine.low %v7446_v24, %v7592_v56 }
 0x758   : > { %v2916_v63 = vcombine.low %v2865_v8, %v2889_v39  ;;  %v2917_v48 = vcombine.high %v2865_v8, %v2889_v39  ;;  %v7602_v13 = vpop.permute.xlu1 %2894 }
 0x759   : > { %3595 = vadd.xlane.f32.xlu0 %v3594_v12  ;;  %3239 = vadd.xlane.f32.xlu1 %v3238_v17  ;;  %v3537_v12 = vcombine.high %v7555_v0, %v7569_v62 }
 0x75a   : > { %v2924_v20 = vrot.slane %v2916_v63, %v6398_v44  ;;  %v2931_v18 = vrot.slane %v2917_v48, %v6398_v44  ;;  %v3544_v48 = vrot.slane %v3536_v30, %v6398_v44 }
 0x75b   : > { %v3299_v41 = vpop.permute.xlu0 %3298  ;;  %v3551_v63 = vrot.slane %v3537_v12, %v6398_v44 }
 0x75c   : > { %v2932_v23 = vcombine.low %v2908_v46, %v2924_v20  ;;  %v2933_v28 = vcombine.high %v2908_v46, %v2924_v20  ;;  %v3521_v27 = vcombine.high %v7428_v38, %v3299_v41  ;;  %v2948_v9 = vcombine.low %v2915_v51, %v2931_v18 }
 0x75d   : > { %3640 = vadd.xlane.f32.xlu0 %v3639_v15  ;;  %3601 = vadd.xlane.f32.xlu1 %v3600_v49  ;;  %v2949_v45 = vcombine.high %v2915_v51, %v2931_v18  ;;  %v3597_v49 = vsel %vm700_vm15, %v3381_v47, 0.0  ;;  %v3520_v42 = vcombine.low %v7428_v38, %v3299_v41  ;;  %v3609_v46 = vsel %vm700_vm15, %v3383_v60, 0.0 }
 0x75e   : > { %v2940_v8 = vrot.slane %v2932_v23, %v6403_v50  ;;  %v2947_v57 = vrot.slane %v2933_v28, %v6403_v50  ;;  %v7605_v17 = vrot.slane %v3521_v27, %v6398_v44  ;;  %v2956_v15 = vrot.slane %v2948_v9, %v6403_v50 }
 0x75f   : > { %v2963_v20 = vrot.slane %v2949_v45, %v6403_v50  ;;  %v3528_v53 = vrot.slane %v3520_v42, %v6398_v44  ;;  %v3295_v10 = vpop.permute.xlu0 %3294  ;;  %v3591_v23 = vsel %vm700_vm15, %v3380_v40, 0.0  ;;  %v3120_v41 = vcombine.low %v7579_v7, %v7602_v13 }
 0x760   : > { %v3172_v14 = vsel %vm700_vm15, %v2940_v8, 0.0  ;;  %v3178_v39 = vsel %vm700_vm15, %v2947_v57, 0.0  ;;  %v3184_v52 = vsel %vm700_vm15, %v2956_v15, 0.0  ;;  %v2964_v62 = vcombine.high %v2940_v8, %v8596_v2 }
 0x761   : > { %3646 = vadd.xlane.f32.xlu0 %v3645_v1  ;;  %3607 = vadd.xlane.f32.xlu1 %v3606_v25  ;;  %v3568_v1 = vcombine.low %v7605_v17, %v3551_v63  ;;  %v3283_v25 = vpop.permute.xlu1 %3282  ;;  %v3190_v38 = vsel %vm700_vm15, %v2963_v20, 0.0  ;;  %v3384_v32 = vcombine.low %v7474_v61, %v3295_v10  ;;  %v2965_v18 = vcombine.high %v2947_v57, %v8596_v2 }
 0x762   : > { %v3175_v34 = vsel %vm700_vm15, %v2964_v62, 0.0  ;;  %v3553_v28 = vcombine.high %v3528_v53, %v3544_v48  ;;  %v2966_v57 = vcombine.high %v2956_v15, %v8596_v2  ;;  %v3128_v9 = vrot.slane %v3120_v41, %v6398_v44 }
 0x763   : > { %v3392_v33 = vrot.slane %v3384_v32, %v6398_v44  ;;  %v3569_v47 = vcombine.high %v7605_v17, %v3551_v63 }
 0x764   : > { %v3187_v15 = vsel %vm700_vm15, %v2966_v57, 0.0 }
 0x765   : > { %3224 = vadd.xlane.f32.xlu0 %v3223_v31  ;;  %3652 = vadd.xlane.f32.xlu1 %v3651_v55  ;;  %v7623_v31 = vrot.slane %v3568_v1, %v6403_v50  ;;  %v3307_v55 = vpop.permute.xlu1 %3306  ;;  %v2967_v1 = vcombine.high %v2963_v20, %v8596_v2  ;;  %v3583_v30 = vrot.slane %v3569_v47, %v6403_v50 }
 0x766   : > { %v3400_v51 = vcombine.low %v3283_v25, %v3307_v55 }
 0x767   : > { %v3672_v0 = vsel %vm700_vm15, %v7623_v31, 0.0  ;;  %v3586_v47 = vcombine.high %v7623_v31, %v8596_v2 }
 0x768   : > { %v3408_v45 = vrot.slane %v3400_v51, %v6398_v44 }
 0x769   : > { %3230 = vadd.xlane.f32.xlu0 %v3229_v58  ;;  %3658 = vadd.xlane.f32.xlu1 %v3657_v36  ;;  %v3552_v58 = vcombine.low %v3528_v53, %v3544_v48  ;;  %v3603_v36 = vsel %vm700_vm15, %v3382_v35, 0.0  ;;  %v7643_v27 = vpop.permute.xlu1 %2866 }
 0x76a   : > { %v3417_v42 = vcombine.high %v3392_v33, %v3408_v45  ;;  %v3416_v35 = vcombine.low %v3392_v33, %v3408_v45 }
 0x76b   : > { %v3560_v8 = vrot.slane %v3552_v58, %v6403_v50 }
 0x76d   : > { %3236 = vadd.xlane.f32.xlu0 %v3235_v22  ;;  %3173 = vadd.xlane.f32.xlu1 %v3172_v14  ;;  %v3385_v22 = vcombine.high %v7474_v61, %v3295_v10  ;;  %v3181_v14 = vsel %vm700_vm15, %v2965_v18, 0.0  ;;  %v3660_v12 = vsel %vm700_vm15, %v3560_v8, 0.0  ;;  %v3112_v61 = vrot.slane %v3104_v16, %v6398_v44 }
 0x76f   : > { %v3399_v60 = vrot.slane %v3385_v22, %v6398_v44  ;;  %v3136_v17 = vcombine.low %v3112_v61, %v3128_v9  ;;  %v3137_v40 = vcombine.high %v3112_v61, %v3128_v9 }
 0x771   : > { %3242 = vadd.xlane.f32.xlu0 %v3241_v3  ;;  %3179 = vadd.xlane.f32.xlu1 %v3178_v39  ;;  %v3567_v3 = vrot.slane %v3553_v28, %v6403_v50  ;;  %v3401_v39 = vcombine.high %v3283_v25, %v3307_v55  ;;  %v3193_v25 = vsel %vm700_vm15, %v2967_v1, 0.0  ;;  %v3144_v20 = vrot.slane %v3136_v17, %v6403_v50 }
 0x772   : > { %v3121_v1 = vcombine.high %v7579_v7, %v7602_v13 }
 0x773   : > { %v3415_v63 = vrot.slane %v3401_v39, %v6398_v44  ;;  %v3244_v10 = vsel %vm700_vm15, %v3144_v20, 0.0  ;;  %v3585_v22 = vcombine.high %v3567_v3, %v8596_v2 }
 0x775   : > { %3598 = vadd.xlane.f32.xlu0 %v3597_v49  ;;  %3185 = vadd.xlane.f32.xlu1 %v3184_v52  ;;  %v2879_v49 = vpop.permute.xlu1 %2878  ;;  %v3666_v52 = vsel %vm700_vm15, %v3567_v3, 0.0  ;;  %v3432_v53 = vcombine.low %v3399_v60, %v3415_v63  ;;  %v3433_v28 = vcombine.high %v3399_v60, %v3415_v63  ;;  %v3675_v60 = vsel %vm700_vm15, %v3586_v47, 0.0 }
 0x776   : > { %v2968_v58 = vcombine.low %v7492_v37, %v2879_v49  ;;  %v2969_v9 = vcombine.high %v7492_v37, %v2879_v49  ;;  %v3587_v37 = vcombine.high %v3583_v30, %v8596_v2 }
 0x778   : > { %v2976_v51 = vrot.slane %v2968_v58, %v6398_v44  ;;  %v2983_v61 = vrot.slane %v2969_v9, %v6398_v44 }
 0x779   : > { %3610 = vadd.xlane.f32.xlu0 %v3609_v46  ;;  %3191 = vadd.xlane.f32.xlu1 %v3190_v38  ;;  %v7665_v46 = vrot.slane %v3417_v42, %v6403_v50  ;;  %v3678_v38 = vsel %vm700_vm15, %v3583_v30, 0.0  ;;  %v2891_v48 = vpop.permute.xlu1 %2890  ;;  %v3681_v42 = vsel %vm700_vm15, %v3587_v37, 0.0 }
 0x77a   : > { %v2984_v62 = vcombine.low %v7643_v27, %v2891_v48  ;;  %v2985_v33 = vcombine.high %v7643_v27, %v2891_v48 }
 0x77b   : > { %v3618_v55 = vsel %vm700_vm15, %v7665_v46, 0.0 }
 0x77c   : > { %v2992_v18 = vrot.slane %v2984_v62, %v6398_v44  ;;  %v2999_v39 = vrot.slane %v2985_v33, %v6398_v44 }
 0x77d   : > { %3673 = vadd.xlane.f32.xlu0 %v3672_v0  ;;  %3592 = vadd.xlane.f32.xlu1 %v3591_v23  ;;  %v7672_v0 = vrot.slane %v3432_v53, %v6403_v50  ;;  %v3151_v23 = vrot.slane %v3137_v40, %v6403_v50  ;;  %v3135_v53 = vrot.slane %v3121_v1, %v6398_v44 }
 0x77e   : > { %v3000_v57 = vcombine.low %v2976_v51, %v2992_v18  ;;  %v3001_v45 = vcombine.high %v2976_v51, %v2992_v18  ;;  %v3017_v30 = vcombine.high %v2983_v61, %v2999_v39 }
 0x77f   : > { %v3624_v32 = vsel %vm700_vm15, %v7672_v0, 0.0  ;;  %v3250_v41 = vsel %vm700_vm15, %v3151_v23, 0.0  ;;  %v3169_v7 = vcombine.high %v3151_v23, %v8596_v2  ;;  %v3450_v62 = vcombine.high %v7672_v0, %v8596_v2 }
 0x780   : > { %v3008_v3 = vrot.slane %v3000_v57, %v6403_v50  ;;  %v3015_v31 = vrot.slane %v3001_v45, %v6403_v50  ;;  %v3449_v23 = vcombine.high %v7665_v46, %v8596_v2 }
 0x781   : > { %3176 = vadd.xlane.f32.xlu0 %v3175_v34  ;;  %3604 = vadd.xlane.f32.xlu1 %v3603_v36  ;;  %v3584_v34 = vcombine.high %v3560_v8, %v8596_v2  ;;  %v3424_v36 = vrot.slane %v3416_v35, %v6403_v50  ;;  %v3253_v48 = vsel %vm700_vm15, %v3169_v7, 0.0 }
 0x782   : > { %v3196_v49 = vsel %vm700_vm15, %v3008_v3, 0.0  ;;  %v3202_v17 = vsel %vm700_vm15, %v3015_v31, 0.0  ;;  %v3032_v33 = vcombine.high %v3008_v3, %v8596_v2  ;;  %v3033_v57 = vcombine.high %v3015_v31, %v8596_v2 }
 0x783   : > { %v3663_v16 = vsel %vm700_vm15, %v3584_v34, 0.0  ;;  %v3612_v8 = vsel %vm700_vm15, %v3424_v36, 0.0  ;;  %v3621_v34 = vsel %vm700_vm15, %v3449_v23, 0.0 }
 0x784   : > { %v3205_v9 = vsel %vm700_vm15, %v3033_v57, 0.0 }
 0x785   : > { %3182 = vadd.xlane.f32.xlu0 %v3181_v14  ;;  %3661 = vadd.xlane.f32.xlu1 %v3660_v12  ;;  %v7690_v14 = vrot.slane %v3433_v28, %v6403_v50  ;;  %v3669_v12 = vsel %vm700_vm15, %v3585_v22, 0.0 }
 0x787   : > { %v3630_v27 = vsel %vm700_vm15, %v7690_v14, 0.0 }
 0x789   : > { %3188 = vadd.xlane.f32.xlu0 %v3187_v15  ;;  %3667 = vadd.xlane.f32.xlu1 %v3666_v52  ;;  %v3016_v15 = vcombine.low %v2983_v61, %v2999_v39  ;;  %v3168_v52 = vcombine.high %v3144_v20, %v8596_v2  ;;  %v3031_v20 = vrot.slane %v3017_v30, %v6403_v50 }
 0x78b   : > { %v3024_v63 = vrot.slane %v3016_v15, %v6403_v50 }
 0x78d   : > { %3194 = vadd.xlane.f32.xlu0 %v3193_v25  ;;  %3679 = vadd.xlane.f32.xlu1 %v3678_v38  ;;  %v3105_v25 = vcombine.high %v7446_v24, %v7592_v56  ;;  %v3247_v38 = vsel %vm700_vm15, %v3168_v52, 0.0  ;;  %v3208_v13 = vsel %vm700_vm15, %v3024_v63, 0.0  ;;  %v3214_v56 = vsel %vm700_vm15, %v3031_v20, 0.0  ;;  %v8597_v52 = vld [vmem:[#allocation8_spill] sm:$0xff] }
 0x78f   : > { %v3119_v40 = vrot.slane %v3105_v25, %v6398_v44 }
 0x791   : > { %3619 = vadd.xlane.f32.xlu0 %v3618_v55  ;;  %3245 = vadd.xlane.f32.xlu1 %v3244_v10  ;;  %v3448_v55 = vcombine.high %v3424_v36, %v8596_v2  ;;  %v3152_v24 = vcombine.low %v3119_v40, %v3135_v53  ;;  %v3153_v58 = vcombine.high %v3119_v40, %v3135_v53 }
 0x793   : > { %v3615_v10 = vsel %vm700_vm15, %v3448_v55, 0.0  ;;  %v3160_v35 = vrot.slane %v3152_v24, %v6403_v50 }
 0x795   : > { %3625 = vadd.xlane.f32.xlu0 %v3624_v32  ;;  %3251 = vadd.xlane.f32.xlu1 %v3250_v41  ;;  %v3627_v32 = vsel %vm700_vm15, %v3450_v62, 0.0  ;;  %v3170_v18 = vcombine.high %v3160_v35, %v8596_v2  ;;  %v3167_v41 = vrot.slane %v3153_v58, %v6403_v50  ;;  %v3256_v0 = vsel %vm700_vm15, %v3160_v35, 0.0 }
 0x797   : > { %v3259_v36 = vsel %vm700_vm15, %v3170_v18, 0.0  ;;  %v3171_v46 = vcombine.high %v3167_v41, %v8596_v2  ;;  %v3262_v28 = vsel %vm700_vm15, %v3167_v41, 0.0 }
 0x799   : > { %3664 = vadd.xlane.f32.xlu0 %v3663_v16  ;;  %3613 = vadd.xlane.f32.xlu1 %v3612_v8  ;;  %v3265_v51 = vsel %vm700_vm15, %v3171_v46, 0.0  ;;  %v3451_v16 = vcombine.high %v7690_v14, %v8596_v2  ;;  %v3199_v8 = vsel %vm700_vm15, %v3032_v33, 0.0  ;;  %v3035_v14 = vcombine.high %v3031_v20, %v8596_v2 }
 0x79b   : > { %v3633_v22 = vsel %vm700_vm15, %v3451_v16, 0.0  ;;  %v3217_v3 = vsel %vm700_vm15, %v3035_v14, 0.0 }
 0x79d   : > { %3670 = vadd.xlane.f32.xlu0 %v3669_v12  ;;  %3631 = vadd.xlane.f32.xlu1 %v3630_v27  ;;  %v3034_v12 = vcombine.high %v3024_v63, %v8596_v2 }
 0x79f   : > { %v3211_v39 = vsel %vm700_vm15, %v3034_v12, 0.0  ;;  %vm8602_vm15 = vmmov %vm8599_vm8 }
 0x7a1   : > { %3676 = vadd.xlane.f32.xlu0 %v3675_v60  ;;  %3197 = vadd.xlane.f32.xlu1 %v3196_v49 }
 0x7a5   : > { %3682 = vadd.xlane.f32.xlu0 %v3681_v42  ;;  %3203 = vadd.xlane.f32.xlu1 %v3202_v17 }
 0x7a9   : > { %3248 = vadd.xlane.f32.xlu0 %v3247_v38  ;;  %3209 = vadd.xlane.f32.xlu1 %v3208_v13 }
 0x7ad   : > { %3254 = vadd.xlane.f32.xlu0 %v3253_v48  ;;  %3215 = vadd.xlane.f32.xlu1 %v3214_v56 }
 0x7b1   : > { %3616 = vadd.xlane.f32.xlu0 %v3615_v10  ;;  %3628 = vadd.xlane.f32.xlu1 %v3627_v32 }
 0x7b5   : > { %3622 = vadd.xlane.f32.xlu0 %v3621_v34  ;;  %3257 = vadd.xlane.f32.xlu1 %v3256_v0 }
 0x7b9   : > { %3260 = vadd.xlane.f32.xlu0 %v3259_v36  ;;  %3263 = vadd.xlane.f32.xlu1 %v3262_v28 }
 0x7bd   : > { %3266 = vadd.xlane.f32.xlu0 %v3265_v51 }
 0x7c1   : > { %3634 = vadd.xlane.f32.xlu0 %v3633_v22 }
 0x7c5   : > { %3200 = vadd.xlane.f32.xlu0 %v3199_v8 }
 0x7c9   : > { %3206 = vadd.xlane.f32.xlu0 %v3205_v9 }
 0x7ca   : > { %v3638_v47 = vpop.xlane.xlu1 %3637  ;;  %v3650_v60 = vpop.xlane.xlu0 %3649 }
 0x7cb   : > { %v3783_v63 = vrot.slane %v3638_v47, %v8597_v52  ;;  %v3799_v48 = vrot.slane %v3650_v60, %v8597_v52 }
 0x7cd   : > { %3212 = vadd.xlane.f32.xlu0 %v3211_v39 }
 0x7ce   : > { %v3644_v27 = vpop.xlane.xlu1 %3643 }
 0x7cf   : > { %v3791_v53 = vrot.slane %v3644_v27, %v8597_v52 }
 0x7d1   : > { %3218 = vadd.xlane.f32.xlu0 %v3217_v3 }
 0x7d2   : > { %v3656_v45 = vpop.xlane.xlu1 %3655 }
 0x7d3   : > { %v3807_v23 = vrot.slane %v3656_v45, %v8597_v52 }
 0x7d6   : > { %v7748_v61 = vpop.xlane.xlu1 %3221 }
 0x7da   : > { %v7750_v37 = vpop.xlane.xlu1 %3227 }
 0x7de   : > { %v3590_v49 = vpop.xlane.xlu0 %3589  ;;  %v7752_v31 = vpop.xlane.xlu1 %3233 }
 0x7df   : > { %v3719_v8 = vrot.slane %v3590_v49, %v8597_v52 }
 0x7e2   : > { %v3596_v15 = vpop.xlane.xlu0 %3595  ;;  %v7754_v1 = vpop.xlane.xlu1 %3239 }
 0x7e3   : > { %v3727_v9 = vrot.slane %v3596_v15, %v8597_v52 }
 0x7e6   : > { %v3641_v42 = vpop.xlane.xlu0 %3640  ;;  %v3602_v17 = vpop.xlane.xlu1 %3601 }
 0x7e7   : > { %v3787_v2 = vrot.slane %v3641_v42, %v8597_v52  ;;  %v3735_v14 = vrot.slane %v3602_v17, %v8597_v52 }
 0x7e9   : > { %v3858_v30 = vsel %vm1375_vm0, %v3787_v2, %v3783_v63 }
 0x7ea   : > { %v3647_v25 = vpop.xlane.xlu0 %3646  ;;  %v3608_v7 = vpop.xlane.xlu1 %3607  ;;  %v3859_v13 = vsel %vm1377_vm1, %v3791_v53, %v3858_v30 }
 0x7eb   : > { %v3795_v38 = vrot.slane %v3647_v25, %v8597_v52  ;;  %v3743_v49 = vrot.slane %v3608_v7, %v8597_v52 }
 0x7ed   : > { %v3860_v20 = vsel %vm1379_vm2, %v3795_v38, %v3859_v13 }
 0x7ee   : > { %v7763_v40 = vpop.xlane.xlu0 %3224  ;;  %v3653_v55 = vpop.xlane.xlu1 %3652  ;;  %v3861_v56 = vsel %vm1381_vm3, %v3799_v48, %v3860_v20 }
 0x7ef   : > { %v3803_v24 = vrot.slane %v3653_v55, %v8597_v52 }
 0x7f1   : > { %v3862_v62 = vsel %vm8598_vm4, %v3803_v24, %v3861_v56 }
 0x7f2   : > { %v7769_v10 = vpop.xlane.xlu0 %3230  ;;  %v3659_v35 = vpop.xlane.xlu1 %3658  ;;  %v3863_v32 = vsel %vm8599_vm8, %v3807_v23, %v3862_v62 }
 0x7f3   : > { %v3811_v58 = vrot.slane %v3659_v35, %v8597_v52 }
 0x7f5   : > { %v7777_v18 = vsel %vm8600_vm12, %v3811_v58, %v3863_v32 }
 0x7f6   : > { %v7774_v34 = vpop.xlane.xlu0 %3236  ;;  %v7779_v41 = vpop.xlane.xlu1 %3173 }
 0x7fa   : > { %v7781_v0 = vpop.xlane.xlu0 %3242  ;;  %v7783_v36 = vpop.xlane.xlu1 %3179 }
 0x7fe   : > { %v3599_v46 = vpop.xlane.xlu0 %3598  ;;  %v7785_v28 = vpop.xlane.xlu1 %3185 }
 0x7ff   : > { %v3731_v12 = vrot.slane %v3599_v46, %v8597_v52 }
 0x802   : > { %v3611_v51 = vpop.xlane.xlu0 %3610  ;;  %v7787_v16 = vpop.xlane.xlu1 %3191 }
 0x803   : > { %v3747_v15 = vrot.slane %v3611_v51, %v8597_v52 }
 0x806   : > { %v7789_v22 = vpop.xlane.xlu0 %3673  ;;  %v3593_v33 = vpop.xlane.xlu1 %3592 }
 0x807   : > { %v3723_v57 = vrot.slane %v3593_v33, %v8597_v52 }
 0x809   : > { %v3844_v47 = vsel %vm1375_vm0, %v3723_v57, %v3719_v8 }
 0x80a   : > { %v7796_v39 = vpop.xlane.xlu0 %3176  ;;  %v3845_v27 = vsel %vm1377_vm1, %v3727_v9, %v3844_v47  ;;  %v3605_v3 = vpop.xlane.xlu1 %3604 }
 0x80b   : > { %v3846_v45 = vsel %vm1379_vm2, %v3731_v12, %v3845_v27  ;;  %v3739_v60 = vrot.slane %v3605_v3, %v8597_v52 }
 0x80c   : > { %v3847_v42 = vsel %vm1381_vm3, %v3735_v14, %v3846_v45 }
 0x80d   : > { %v3848_v2 = vsel %vm8601_vm14, %v3739_v60, %v3847_v42 }
 0x80e   : > { %v7806_v63 = vpop.xlane.xlu0 %3182  ;;  %v3662_v30 = vpop.xlane.xlu1 %3661  ;;  %v3849_v17 = vsel %vm8602_vm15, %v3743_v49, %v3848_v2 }
 0x80f   : > { %v3850_v25 = vsel %vm8603_vm7, %v3747_v15, %v3849_v17 }
 0x810   : > { %3876 = vxpose.xlu1.b32.start [1/4] (short) (narrow) %v3850_v25, 8 }
 0x812   : > { %v7810_v53 = vpop.xlane.xlu0 %3188  ;;  %v3668_v38 = vpop.xlane.xlu1 %3667 }
 0x816   : > { %v7812_v13 = vpop.xlane.xlu0 %3194  ;;  %v3680_v7 = vpop.xlane.xlu1 %3679 }
 0x81a   : > { %v3620_v20 = vpop.xlane.xlu0 %3619  ;;  %v7814_v48 = vpop.xlane.xlu1 %3245 }
 0x81b   : > { %v3759_v60 = vrot.slane %v3620_v20, %v8597_v52 }
 0x81e   : > { %v3626_v55 = vpop.xlane.xlu0 %3625  ;;  %v7816_v24 = vpop.xlane.xlu1 %3251 }
 0x81f   : > { %v3767_v2 = vrot.slane %v3626_v55, %v8597_v52 }
 0x822   : > { %v3665_v56 = vpop.xlane.xlu0 %3664  ;;  %v3614_v62 = vpop.xlane.xlu1 %3613 }
 0x823   : > { %v3751_v47 = vrot.slane %v3614_v62, %v8597_v52  ;;  %v3819_v25 = vrot.slane %v3665_v56, %v8597_v52 }
 0x826   : > { %v3671_v23 = vpop.xlane.xlu0 %3670  ;;  %v3632_v35 = vpop.xlane.xlu1 %3631 }
 0x827   : > { %v3775_v55 = vrot.slane %v3632_v35, %v8597_v52 }
 0x82a   : > { %v3677_v58 = vpop.xlane.xlu0 %3676  ;;  %v7818_v32 = vpop.xlane.xlu1 %3197 }
 0x82e   : > { %v3683_v46 = vpop.xlane.xlu0 %3682  ;;  %v7820_v51 = vpop.xlane.xlu1 %3203 }
 0x832   : > { %v7822_v33 = vpop.xlane.xlu0 %3248  ;;  %v7826_v57 = vpop.xlane.xlu1 %3209 }
 0x836   : > { %v7824_v8 = vpop.xlane.xlu0 %3254  ;;  %v7830_v14 = vpop.xlane.xlu1 %3215 }
 0x83a   : > { %v3617_v9 = vpop.xlane.xlu0 %3616  ;;  %v3629_v17 = vpop.xlane.xlu1 %3628 }
 0x83b   : > { %v3755_v12 = vrot.slane %v3617_v9, %v8597_v52 }
 0x83d   : > { %v3851_v3 = vsel %vm1375_vm0, %v3755_v12, %v3751_v47  ;;  %v3815_v12 = vrot.slane %v3662_v30, %v8597_v52  ;;  %v3771_v47 = vrot.slane %v3629_v17, %v8597_v52  ;;  %v3831_v17 = vrot.slane %v7789_v22, %v8597_v52 }
 0x83e   : > { %v3623_v27 = vpop.xlane.xlu0 %3622  ;;  %v3852_v49 = vsel %vm1377_vm1, %v3759_v60, %v3851_v3 }
 0x83f   : > { %v3763_v45 = vrot.slane %v3623_v27, %v8597_v52  ;;  %v3865_v20 = vsel %vm1375_vm0, %v3819_v25, %v3815_v12  ;;  %v3827_v27 = vrot.slane %v3671_v23, %v8597_v52  ;;  %vm8606_vm0 = vmmov %vm8603_vm7  ;;  %v3843_v25 = vrot.slane %v3683_v46, %v8597_v52 }
 0x841   : > { %v3853_v15 = vsel %vm1379_vm2, %v3763_v45, %v3852_v49  ;;  %v3823_v45 = vrot.slane %v3668_v38, %v8597_v52 }
 0x842   : > { %v7836_v42 = vpop.xlane.xlu0 %3260  ;;  %v3854_v62 = vsel %vm1381_vm3, %v3767_v2, %v3853_v15  ;;  %v3835_v2 = vrot.slane %v3677_v58, %v8597_v52 }
 0x843   : > { %v3855_v3 = vsel %vm8604_vm9, %v3771_v47, %v3854_v62  ;;  %v3866_v49 = vsel %vm1377_vm1, %v3823_v45, %v3865_v20  ;;  %v3839_v62 = vrot.slane %v3680_v7, %v8597_v52  ;;  %vm8607_vm1 = vmmov %vm8605_vm5  ;;  %v7867_v47 = vld [vmem:[%s6789_s25 + $0x8] sm:$0xff] }
 0x844   : > { %v3856_v30 = vsel %vm8605_vm5, %v3775_v55, %v3855_v3  ;;  %v3867_v15 = vsel %vm1379_vm2, %v3827_v27, %v3866_v49  ;;  %vm8608_vm2 = vmmov %vm8606_vm0  ;;  %v218_v22 = vunpack.c.3.s8 %v7867_v47  ;;  %v215_v27 = vunpack.c.0.s8 %v7867_v47  ;;  %v7882_v49 = vpop.xlane.xlu1 %3257 }
 0x845   : > { %v3868_v38 = vsel %vm1381_vm3, %v3831_v17, %v3867_v15 }
 0x846   : > { %v7842_v9 = vpop.xlane.xlu0 %3266  ;;  %v3869_v35 = vsel %vm8598_vm4, %v3835_v2, %v3868_v38  ;;  %v226_v20 = vcvt.s32.f32 %v218_v22  ;;  %v223_v46 = vcvt.s32.f32 %v215_v27 }
 0x847   : > { %v3870_v12 = vsel %vm8607_vm1, %v3839_v62, %v3869_v35 }
 0x848   : > { %v3871_v58 = vsel %vm8608_vm2, %v3843_v25, %v3870_v12  ;;  %vm234_vm3 = vcmp.gt.f32.partialorder %v226_v20, 0.5  ;;  %vm231_vm8 = vcmp.gt.f32.partialorder %v223_v46, 0.5  ;;  %v7900_v62 = vpop.xlane.xlu1 %3263 }
 0x849   : > { %v242_v3 = vsel %vm234_vm3, 0.0, %v8587_v26 }
 0x84a   : > { %v3635_v60 = vpop.xlane.xlu0 %3634  ;;  %v4187_v7 = vcombine.high %v242_v3, %v242_v3 }
 0x84b   : > { %v3779_v56 = vrot.slane %v3635_v60, %v8597_v52  ;;  %v217_v52 = vunpack.c.2.s8 %v7867_v47 }
 0x84c   : > { %v7879_v60 = vrot.slane %v4187_v7, %v6798_v6 }
 0x84d   : > { %v3857_v23 = vsel %vm8606_vm0, %v3779_v56, %v3856_v30  ;;  %v225_v45 = vcvt.s32.f32 %v217_v52  ;;  %v239_v56 = vsel %vm231_vm8, 0.0, %v8587_v26 }
 0x84e   : > { %3877 = vxpose.xlu1.b32.cont [2/4] (short) (narrow) %v3857_v23, 8  ;;  %v4047_v30 = vrot.slane %v239_v56, %v6798_v6  ;;  %v4203_v2 = vcombine.high %v7879_v60, %v7879_v60 }
 0x84f   : > { %vm233_vm12 = vcmp.gt.f32.partialorder %v225_v45, 0.5 }
 0x850   : > { %v7891_v23 = vsel %vm233_vm12, 0.0, %v8587_v26  ;;  %v4055_v17 = vcombine.high %v4047_v30, %v4047_v30  ;;  %v4063_v35 = vrot.slane %v4047_v30, %v6798_v6  ;;  %v4231_v12 = vrot.slane %v4203_v2, %v6798_v6 }
 0x851   : > { %v7895_v38 = vrot.slane %v7891_v23, %v6798_v6  ;;  %v4040_v30 = vcombine.high %v239_v56, %v239_v56 }
 0x852   : > { %3878 = vxpose.xlu1.b32.cont [3/4] (short) (narrow) %v7777_v18, 8  ;;  %v7874_v18 = vrot.slane %v242_v3, %v6798_v6  ;;  %v4077_v22 = vrot.slane %v4055_v17, %v6798_v6  ;;  %v4239_v27 = vrot.slane %v4063_v35, %v6818_v54  ;;  %v4085_v46 = vcombine.high %v4063_v35, %v4063_v35 }
 0x853   : > { %v4355_v45 = vrot.slane %v4231_v12, %v6818_v54 }
 0x854   : > { %v4202_v55 = vcombine.high %v7874_v18, %v7874_v18  ;;  %v4243_v7 = vrot.slane %v4077_v22, %v6818_v54  ;;  %v4087_v59 = vcombine.high %v4077_v22, %v4077_v22 }
 0x856   : > { %3879 = vxpose.xlu1.b32.end [4/4] (short) (narrow) %v3871_v58, 8  ;;  %v7886_v15 = vrot.slane %v4202_v55, %v6798_v6  ;;  %v7905_v58 = vrot.slane %v7895_v38, %v6798_v6  ;;  %v4235_v55 = vcombine.high %v4231_v12, %v4231_v12 }
 0x858   : > { %v4234_v25 = vcombine.high %v7886_v15, %v7886_v15  ;;  %v4303_v20 = vrot.slane %v7905_v58, %v6818_v54 }
 0x85a   : > { %v4347_v3 = vrot.slane %v4234_v25, %v6818_v54 }
 0x8c6   : > { %v7912_v52 = vpop.trf.xlu1 }
 0x8c7   : > { %v3924_v2 = vadd.f32 %v7912_v52, %v7748_v61  ;;  %v3908_v17 = vadd.f32 %v7912_v52, %v7779_v41  ;;  %v3935_v21 = vadd.f32 %v7912_v52, %v7824_v8  ;;  %v3909_v35 = vadd.f32 %v7912_v52, %v7796_v39 }
 0x8c8   : > { %v3937_v25 = vadd.f32 %v7912_v52, %v7836_v42  ;;  %v3910_v5 = vadd.f32 %v7912_v52, %v7783_v36  ;;  %v3939_v56 = vadd.f32 %v7912_v52, %v7842_v9  ;;  %v3911_v61 = vadd.f32 %v7912_v52, %v7806_v63 }
 0x8c9   : > { %vm3956_vm14 = vcmp.ge.f32.partialorder %v3924_v2, 0.0  ;;  %v3988_v41 = vmul.f32 0.2, %v3924_v2  ;;  %vm3940_vm15 = vcmp.ge.f32.partialorder %v3908_v17, 0.0  ;;  %v3972_v12 = vmul.f32 0.2, %v3908_v17 }
 0x8ca   : > { %vm3967_vm7 = vcmp.ge.f32.partialorder %v3935_v21, 0.0  ;;  %v3999_v8 = vmul.f32 0.2, %v3935_v21  ;;  %vm3941_vm9 = vcmp.ge.f32.partialorder %v3909_v35, 0.0  ;;  %v3973_v39 = vmul.f32 0.2, %v3909_v35 }
 0x8cb   : > { %v4020_v29 = vsel %vm3956_vm14, %v3924_v2, %v3988_v41  ;;  %v4004_v19 = vsel %vm3940_vm15, %v3908_v17, %v3972_v12  ;;  %vm3969_vm5 = vcmp.ge.f32.partialorder %v3937_v25, 0.0  ;;  %v4001_v42 = vmul.f32 0.2, %v3937_v25 }
 0x8cc   : > { %v7932_v11 = vadd.f32 %v4303_v20, %v4020_v29  ;;  %v7934_v36 = vadd.f32 %v4239_v27, %v4004_v19  ;;  %v4031_v9 = vsel %vm3967_vm7, %v3935_v21, %v3999_v8  ;;  %v4005_v4 = vsel %vm3941_vm9, %v3909_v35, %v3973_v39 }
 0x8cd   : > { %v7936_v43 = vadd.f32 %v4347_v3, %v4031_v9  ;;  %vm3942_vm0 = vcmp.ge.f32.partialorder %v3910_v5, 0.0  ;;  %v4247_v63 = vrot.slane %v4085_v46, %v6818_v54  ;;  %v7943_v17 = vadd.f32 %v4243_v7, %v4005_v4 }
 0x8ce   : > { %v4476_v50 = vsel %vm1966_vm13, %v7932_v11, -inf  ;;  %v4428_v2 = vsel %vm1966_vm13, %v7934_v36, -inf  ;;  %v3974_v29 = vmul.f32 0.2, %v3910_v5  ;;  %v4033_v19 = vsel %vm3969_vm5, %v3937_v25, %v4001_v42 }
 0x8cf   : > { %4477 = vmax.xlane.f32.xlu1 %v4476_v50  ;;  %4429 = vmax.xlane.f32.xlu0 %v4428_v2  ;;  %v4003_v21 = vmul.f32 0.2, %v3939_v56  ;;  %v4054_v20 = vrot.slane %v4040_v30, %v6798_v6  ;;  %vm3971_vm4 = vcmp.ge.f32.partialorder %v3939_v56, 0.0  ;;  %vm3943_vm1 = vcmp.ge.f32.partialorder %v3911_v61, 0.0 }
 0x8d0   : > { %v4006_v27 = vsel %vm3942_vm0, %v3910_v5, %v3974_v29  ;;  %v3975_v22 = vmul.f32 0.2, %v3911_v61  ;;  %v4363_v3 = vrot.slane %v4235_v55, %v6818_v54  ;;  %v4251_v46 = vrot.slane %v4087_v59, %v6818_v54 }
 0x8d1   : > { %v3912_v4 = vadd.f32 %v7912_v52, %v7785_v28  ;;  %v4070_v7 = vrot.slane %v4054_v20, %v6798_v6  ;;  %v4509_v50 = vsel %vm1966_vm13, %v7936_v43, -inf  ;;  %v4431_v35 = vsel %vm1966_vm13, %v7943_v17, -inf }
 0x8d2   : > { %v7956_v30 = vadd.f32 %v4355_v45, %v4033_v19  ;;  %v7958_v5 = vadd.f32 %v4247_v63, %v4006_v27  ;;  %v4035_v55 = vsel %vm3971_vm4, %v3939_v56, %v4003_v21  ;;  %v4007_v25 = vsel %vm3943_vm1, %v3911_v61, %v3975_v22 }
 0x8d3   : > { %4510 = vmax.xlane.f32.xlu1 %v4509_v50  ;;  %4432 = vmax.xlane.f32.xlu0 %v4431_v35  ;;  %v3976_v59 = vmul.f32 0.2, %v3912_v4  ;;  %v3913_v28 = vadd.f32 %v7912_v52, %v7810_v53  ;;  %vm3944_vm2 = vcmp.ge.f32.partialorder %v3912_v4, 0.0  ;;  %v4056_v41 = vcombine.high %v4054_v20, %v4054_v20 }
 0x8d4   : > { %v216_v12 = vunpack.c.1.s8 %v7867_v47  ;;  %v4255_v8 = vrot.slane %v4070_v7, %v6818_v54  ;;  %v4515_v45 = vsel %vm1966_vm13, %v7956_v30, -inf  ;;  %v4434_v39 = vsel %vm1966_vm13, %v7958_v5, -inf }
 0x8d5   : > { %v7968_v42 = vadd.f32 %v4363_v3, %v4035_v55  ;;  %v7970_v56 = vadd.f32 %v4251_v46, %v4007_v25  ;;  %v4008_v61 = vsel %vm3944_vm2, %v3912_v4, %v3976_v59  ;;  %v3977_v53 = vmul.f32 0.2, %v3913_v28  ;;  %v3201_v59 = vpop.xlane.xlu0 %3200 }
 0x8d6   : > { %v3914_v9 = vadd.f32 %v7912_v52, %v7787_v16  ;;  %vm3945_vm3 = vcmp.ge.f32.partialorder %v3913_v28, 0.0  ;;  %v4084_v47 = vrot.slane %v4056_v41, %v6798_v6  ;;  %v224_v63 = vcvt.s32.f32 %v216_v12 }
 0x8d7   : > { %4516 = vmax.xlane.f32.xlu1 %v4515_v45  ;;  %4435 = vmax.xlane.f32.xlu0 %v4434_v39  ;;  %v4086_v2 = vcombine.high %v4070_v7, %v4070_v7  ;;  %v4521_v29 = vsel %vm1966_vm13, %v7968_v42, -inf  ;;  %v4437_v19 = vsel %vm1966_vm13, %v7970_v56, -inf  ;;  %v7979_v21 = vadd.f32 %v4255_v8, %v4008_v61 }
 0x8d8   : > { %v4259_v20 = vrot.slane %v4084_v47, %v6818_v54  ;;  %v4009_v27 = vsel %vm3945_vm3, %v3913_v28, %v3977_v53  ;;  %v3978_v22 = vmul.f32 0.2, %v3914_v9  ;;  %v3915_v16 = vadd.f32 %v7912_v52, %v7812_v13 }
 0x8d9   : > { %vm3946_vm8 = vcmp.ge.f32.partialorder %v3914_v9, 0.0  ;;  %vm232_vm12 = vcmp.gt.f32.partialorder %v224_v63, 0.5  ;;  %v4440_v3 = vsel %vm1966_vm13, %v7979_v21, -inf  ;;  %v4263_v4 = vrot.slane %v4086_v2, %v6818_v54 }
 0x8da   : > { %v7986_v46 = vadd.f32 %v4259_v20, %v4009_v27  ;;  %v4088_v7 = vcombine.high %v4084_v47, %v4084_v47  ;;  %v4010_v50 = vsel %vm3946_vm8, %v3914_v9, %v3978_v22  ;;  %v3979_v35 = vmul.f32 0.2, %v3915_v16 }
 0x8db   : > { %4522 = vmax.xlane.f32.xlu1 %v4521_v29  ;;  %4438 = vmax.xlane.f32.xlu0 %v4437_v19  ;;  %v240_v55 = vsel %vm232_vm12, 0.0, %v8587_v26  ;;  %v3916_v25 = vadd.f32 %v7912_v52, %v7818_v32  ;;  %vm3947_vm14 = vcmp.ge.f32.partialorder %v3915_v16, 0.0  ;;  %v7995_v41 = vadd.f32 %v4263_v4, %v4010_v50  ;;  %v3207_v19 = vpop.xlane.xlu0 %3206 }
 0x8dc   : > { %v4096_v13 = vrot.slane %v240_v55, %v6798_v6  ;;  %v4443_v28 = vsel %vm1966_vm13, %v7986_v46, -inf  ;;  %v4267_v12 = vrot.slane %v4088_v7, %v6818_v54  ;;  %v4011_v8 = vsel %vm3947_vm14, %v3915_v16, %v3979_v35 }
 0x8dd   : > { %v3980_v45 = vmul.f32 0.2, %v3916_v25  ;;  %v3917_v39 = vadd.f32 %v7912_v52, %v3201_v59  ;;  %vm3948_vm15 = vcmp.ge.f32.partialorder %v3916_v25, 0.0  ;;  %v4446_v61 = vsel %vm1966_vm13, %v7995_v41, -inf }
 0x8de   : > { %v4112_v26 = vrot.slane %v4096_v13, %v6798_v6  ;;  %v4104_v32 = vcombine.high %v4096_v13, %v4096_v13  ;;  %v8002_v53 = vadd.f32 %v4267_v12, %v4011_v8  ;;  %v3918_v2 = vadd.f32 %v7912_v52, %v7820_v51 }
 0x8df   : > { %4441 = vmax.xlane.f32.xlu0 %v4440_v3  ;;  %v4012_v47 = vsel %vm3948_vm15, %v3916_v25, %v3980_v45  ;;  %v3981_v63 = vmul.f32 0.2, %v3917_v39  ;;  %vm3949_vm7 = vcmp.ge.f32.partialorder %v3917_v39, 0.0  ;;  %v3919_v7 = vadd.f32 %v7912_v52, %v3207_v19  ;;  %v3213_v45 = vpop.xlane.xlu0 %3212 }
 0x8e0   : > { %v4271_v9 = vrot.slane %v4112_v26, %v6818_v54  ;;  %v4126_v29 = vrot.slane %v4104_v32, %v6798_v6  ;;  %v4449_v20 = vsel %vm1966_vm13, %v8002_v53, -inf  ;;  %v4134_v16 = vcombine.high %v4112_v26, %v4112_v26 }
 0x8e1   : > { %v4013_v3 = vsel %vm3949_vm7, %v3917_v39, %v3981_v63  ;;  %v3982_v4 = vmul.f32 0.2, %v3918_v2  ;;  %vm3950_vm9 = vcmp.ge.f32.partialorder %v3918_v2, 0.0  ;;  %v4089_v50 = vcombine.high %v240_v55, %v240_v55 }
 0x8e2   : > { %v8010_v27 = vadd.f32 %v4271_v9, %v4012_v47  ;;  %v4275_v22 = vrot.slane %v4126_v29, %v6818_v54  ;;  %v8016_v51 = vrot.slane %v7879_v60, %v6798_v6  ;;  %v4279_v13 = vrot.slane %v4134_v16, %v6818_v54 }
 0x8e3   : > { %4444 = vmax.xlane.f32.xlu0 %v4443_v28  ;;  %v4136_v59 = vcombine.high %v4126_v29, %v4126_v29  ;;  %v4014_v28 = vsel %vm3950_vm9, %v3918_v2, %v3982_v4  ;;  %v3983_v12 = vmul.f32 0.2, %v3919_v7  ;;  %v3920_v8 = vadd.f32 %v7912_v52, %v7826_v57 }
 0x8e4   : > { %v4452_v35 = vsel %vm1966_vm13, %v8010_v27, -inf  ;;  %v8020_v25 = vadd.f32 %v4275_v22, %v4013_v3  ;;  %vm3951_vm5 = vcmp.ge.f32.partialorder %v3919_v7, 0.0  ;;  %v4103_v55 = vrot.slane %v4089_v50, %v6798_v6 }
 0x8e5   : > { %v4233_v60 = vcombine.high %v8016_v51, %v8016_v51  ;;  %v8030_v26 = vadd.f32 %v4279_v13, %v4014_v28  ;;  %v4283_v32 = vrot.slane %v4136_v59, %v6818_v54  ;;  %v3984_v9 = vmul.f32 0.2, %v3920_v8  ;;  %v3219_v13 = vpop.xlane.xlu0 %3218 }
 0x8e6   : > { %v4455_v39 = vsel %vm1966_vm13, %v8020_v25, -inf  ;;  %v3921_v47 = vadd.f32 %v7912_v52, %v3213_v45  ;;  %v3938_v57 = vadd.f32 %v7912_v52, %v7900_v62  ;;  %vm3952_vm0 = vcmp.ge.f32.partialorder %v3920_v8, 0.0 }
 0x8e7   : > { %4447 = vmax.xlane.f32.xlu0 %v4446_v61  ;;  %v4015_v61 = vsel %vm3951_vm5, %v3919_v7, %v3983_v12  ;;  %v4119_v63 = vrot.slane %v4103_v55, %v6798_v6  ;;  %v4105_v2 = vcombine.high %v4103_v55, %v4103_v55  ;;  %v4359_v29 = vrot.slane %v4233_v60, %v6818_v54 }
 0x8e8   : > { %vm3970_vm4 = vcmp.ge.f32.partialorder %v3938_v57, 0.0  ;;  %v4002_v19 = vmul.f32 0.2, %v3938_v57  ;;  %v8040_v22 = vadd.f32 %v4283_v32, %v4015_v61  ;;  %v4016_v3 = vsel %vm3952_vm0, %v3920_v8, %v3984_v9 }
 0x8e9   : > { %v4287_v16 = vrot.slane %v4119_v63, %v6818_v54  ;;  %v3985_v4 = vmul.f32 0.2, %v3921_v47  ;;  %v3922_v62 = vadd.f32 %v7912_v52, %v7830_v14  ;;  %vm3953_vm1 = vcmp.ge.f32.partialorder %v3921_v47, 0.0 }
 0x8ea   : > { %v4034_v7 = vsel %vm3970_vm4, %v3938_v57, %v4002_v19  ;;  %v4133_v50 = vrot.slane %v4105_v2, %v6798_v6  ;;  %v4461_v59 = vsel %vm1966_vm13, %v8040_v22, -inf  ;;  %v4135_v55 = vcombine.high %v4119_v63, %v4119_v63 }
 0x8eb   : > { %4450 = vmax.xlane.f32.xlu0 %v4449_v20  ;;  %v4458_v20 = vsel %vm1966_vm13, %v8030_v26, -inf  ;;  %v8050_v28 = vadd.f32 %v4287_v16, %v4016_v3  ;;  %v4017_v8 = vsel %vm3953_vm1, %v3921_v47, %v3985_v4  ;;  %v3986_v60 = vmul.f32 0.2, %v3922_v62 }
 0x8ec   : > { %v4291_v12 = vrot.slane %v4133_v50, %v6818_v54  ;;  %v3923_v14 = vadd.f32 %v7912_v52, %v3219_v13  ;;  %vm3954_vm2 = vcmp.ge.f32.partialorder %v3922_v62, 0.0  ;;  %v4295_v32 = vrot.slane %v4135_v55, %v6818_v54 }
 0x8ed   : > { %v4464_v45 = vsel %vm1966_vm13, %v8050_v28, -inf  ;;  %v4137_v61 = vcombine.high %v4133_v50, %v4133_v50  ;;  %v4018_v9 = vsel %vm3954_vm2, %v3922_v62, %v3986_v60  ;;  %v3925_v63 = vadd.f32 %v7912_v52, %v7763_v40 }
 0x8ee   : > { %v3987_v57 = vmul.f32 0.2, %v3923_v14  ;;  %vm3955_vm3 = vcmp.ge.f32.partialorder %v3923_v14, 0.0  ;;  %v4153_v47 = vcombine.high %v7895_v38, %v7895_v38  ;;  %v3926_v3 = vadd.f32 %v7912_v52, %v7750_v37 }
 0x8ef   : > { %4453 = vmax.xlane.f32.xlu0 %v4452_v35  ;;  %v8046_v35 = vadd.f32 %v4359_v29, %v4034_v7  ;;  %v8065_v29 = vadd.f32 %v4295_v32, %v4018_v9  ;;  %v4299_v19 = vrot.slane %v4137_v61, %v6818_v54  ;;  %v3989_v16 = vmul.f32 0.2, %v3925_v63 }
 0x8f0   : > { %vm3957_vm8 = vcmp.ge.f32.partialorder %v3925_v63, 0.0  ;;  %v4175_v40 = vrot.slane %v4153_v47, %v6798_v6  ;;  %v4183_v7 = vcombine.high %v7905_v58, %v7905_v58  ;;  %v3990_v13 = vmul.f32 0.2, %v3926_v3 }
 0x8f1   : > { %v4470_v4 = vsel %vm1966_vm13, %v8065_v29, -inf  ;;  %v4021_v50 = vsel %vm3957_vm8, %v3925_v63, %v3989_v16  ;;  %vm3958_vm12 = vcmp.ge.f32.partialorder %v3926_v3, 0.0  ;;  %v4138_v37 = vcombine.high %v7891_v23, %v7891_v23 }
 0x8f2   : > { %v4307_v62 = vrot.slane %v4175_v40, %v6818_v54  ;;  %v4185_v60 = vcombine.high %v4175_v40, %v4175_v40  ;;  %v4022_v58 = vsel %vm3958_vm12, %v3926_v3, %v3990_v13  ;;  %v3929_v63 = vadd.f32 %v7912_v52, %v7774_v34 }
 0x8f3   : > { %4456 = vmax.xlane.f32.xlu0 %v4455_v39  ;;  %v8056_v39 = vadd.f32 %v4291_v12, %v4017_v8  ;;  %v4311_v8 = vrot.slane %v4183_v7, %v6818_v54  ;;  %v3930_v40 = vadd.f32 %v7912_v52, %v7754_v1 }
 0x8f4   : > { %v8084_v55 = vadd.f32 %v4307_v62, %v4021_v50  ;;  %v4315_v61 = vrot.slane %v4185_v60, %v6818_v54  ;;  %v3993_v3 = vmul.f32 0.2, %v3929_v63  ;;  %vm3961_vm7 = vcmp.ge.f32.partialorder %v3929_v63, 0.0 }
 0x8f5   : > { %v4467_v2 = vsel %vm1966_vm13, %v8056_v39, -inf  ;;  %v8092_v32 = vadd.f32 %v4311_v8, %v4022_v58  ;;  %vm3962_vm9 = vcmp.ge.f32.partialorder %v3930_v40, 0.0 }
 0x8f6   : > { %v4479_v23 = vsel %vm1966_vm13, %v8084_v55, -inf  ;;  %v4025_v13 = vsel %vm3961_vm7, %v3929_v63, %v3993_v3  ;;  %v4210_v63 = vrot.slane %v7874_v18, %v6798_v6 }
 0x8f7   : > { %4459 = vmax.xlane.f32.xlu0 %v4458_v20  ;;  %v4019_v20 = vsel %vm3955_vm3, %v3923_v14, %v3987_v57 }
 0x8f8   : > { %v8073_v38 = vadd.f32 %v4299_v19, %v4019_v20  ;;  %v4232_v18 = vcombine.high %v4210_v63, %v4210_v63 }
 0x8fa   : > { %v4473_v12 = vsel %vm1966_vm13, %v8073_v38, -inf }
 0x8fb   : > { %4462 = vmax.xlane.f32.xlu0 %v4461_v59  ;;  %v3927_v59 = vadd.f32 %v7912_v52, %v7769_v10  ;;  %v4152_v10 = vrot.slane %v4138_v37, %v6798_v6  ;;  %v3931_v37 = vadd.f32 %v7912_v52, %v7781_v0 }
 0x8fd   : > { %v3991_v14 = vmul.f32 0.2, %v3927_v59  ;;  %vm3959_vm14 = vcmp.ge.f32.partialorder %v3927_v59, 0.0  ;;  %v4168_v47 = vrot.slane %v4152_v10, %v6798_v6  ;;  %vm3963_vm5 = vcmp.ge.f32.partialorder %v3931_v37, 0.0 }
 0x8ff   : > { %4465 = vmax.xlane.f32.xlu0 %v4464_v45  ;;  %v3928_v45 = vadd.f32 %v7912_v52, %v7752_v31  ;;  %v4023_v9 = vsel %vm3959_vm14, %v3927_v59, %v3991_v14  ;;  %v4154_v31 = vcombine.high %v4152_v10, %v4152_v10  ;;  %v4319_v20 = vrot.slane %v4168_v47, %v6818_v54 }
 0x900   : > { %v8100_v19 = vadd.f32 %v4315_v61, %v4023_v9  ;;  %v4184_v50 = vcombine.high %v4168_v47, %v4168_v47  ;;  %v3994_v59 = vmul.f32 0.2, %v3930_v40  ;;  %v3995_v14 = vmul.f32 0.2, %v3931_v37 }
 0x901   : > { %v3992_v57 = vmul.f32 0.2, %v3928_v45  ;;  %vm3960_vm15 = vcmp.ge.f32.partialorder %v3928_v45, 0.0  ;;  %v4182_v34 = vrot.slane %v4154_v31, %v6798_v6  ;;  %v4335_v31 = vrot.slane %v4210_v63, %v6818_v54 }
 0x902   : > { %v4327_v8 = vrot.slane %v4184_v50, %v6818_v54  ;;  %v4026_v58 = vsel %vm3962_vm9, %v3930_v40, %v3994_v59  ;;  %v4027_v61 = vsel %vm3963_vm5, %v3931_v37, %v3995_v14  ;;  %v4339_v6 = vrot.slane %v7886_v15, %v6818_v54 }
 0x903   : > { %4468 = vmax.xlane.f32.xlu0 %v4467_v2  ;;  %v4482_v2 = vsel %vm1966_vm13, %v8092_v32, -inf  ;;  %v4024_v16 = vsel %vm3960_vm15, %v3928_v45, %v3992_v57  ;;  %v4323_v7 = vrot.slane %v4182_v34, %v6818_v54  ;;  %v4186_v60 = vcombine.high %v4182_v34, %v4182_v34 }
 0x904   : > { %v8108_v62 = vadd.f32 %v4319_v20, %v4024_v16  ;;  %v3932_v45 = vadd.f32 %v7912_v52, %v7814_v48  ;;  %v8122_v0 = vadd.f32 %v4327_v8, %v4026_v58  ;;  %v3933_v57 = vadd.f32 %v7912_v52, %v7822_v33 }
 0x905   : > { %v3934_v16 = vadd.f32 %v7912_v52, %v7816_v24  ;;  %v4343_v50 = vrot.slane %v4232_v18, %v6818_v54  ;;  %v4518_v58 = vsel %vm1966_vm13, %v8046_v35, -inf }
 0x906   : > { %v4488_v1 = vsel %vm1966_vm13, %v8108_v62, -inf  ;;  %v3996_v9 = vmul.f32 0.2, %v3932_v45  ;;  %vm3964_vm0 = vcmp.ge.f32.partialorder %v3932_v45, 0.0  ;;  %v4494_v48 = vsel %vm1966_vm13, %v8122_v0, -inf }
 0x907   : > { %4471 = vmax.xlane.f32.xlu0 %v4470_v4  ;;  %v4485_v4 = vsel %vm1966_vm13, %v8100_v19, -inf  ;;  %v3997_v20 = vmul.f32 0.2, %v3933_v57  ;;  %vm3965_vm4 = vcmp.ge.f32.partialorder %v3933_v57, 0.0  ;;  %v3998_v34 = vmul.f32 0.2, %v3934_v16 }
 0x908   : > { %vm3966_vm1 = vcmp.ge.f32.partialorder %v3934_v16, 0.0 }
 0x909   : > { %v4029_v40 = vsel %vm3965_vm4, %v3933_v57, %v3997_v20 }
 0x90b   : > { %4474 = vmax.xlane.f32.xlu0 %v4473_v12  ;;  %v8115_v12 = vadd.f32 %v4323_v7, %v4025_v13  ;;  %v8146_v7 = vadd.f32 %v4339_v6, %v4029_v40  ;;  %v4030_v13 = vsel %vm3966_vm1, %v3934_v16, %v3998_v34 }
 0x90c   : > { %v8151_v37 = vadd.f32 %v4343_v50, %v4030_v13 }
 0x90d   : > { %v4491_v10 = vsel %vm1966_vm13, %v8115_v12, -inf  ;;  %v4503_v15 = vsel %vm1966_vm13, %v8146_v7, -inf }
 0x90f   : > { %4480 = vmax.xlane.f32.xlu0 %v4479_v23  ;;  %v4331_v23 = vrot.slane %v4186_v60, %v6818_v54 }
 0x911   : > { %v8131_v47 = vadd.f32 %v4331_v23, %v4027_v61 }
 0x913   : > { %4483 = vmax.xlane.f32.xlu0 %v4482_v2  ;;  %v4028_v2 = vsel %vm3964_vm0, %v3932_v45, %v3996_v9  ;;  %v4497_v33 = vsel %vm1966_vm13, %v8131_v47, -inf }
 0x914   : > { %v8138_v3 = vadd.f32 %v4335_v31, %v4028_v2 }
 0x916   : > { %v4500_v24 = vsel %vm1966_vm13, %v8138_v3, -inf }
 0x917   : > { %4486 = vmax.xlane.f32.xlu0 %v4485_v4  ;;  %v3936_v4 = vadd.f32 %v7912_v52, %v7882_v49  ;;  %v4351_v49 = vrot.slane %v8016_v51, %v6818_v54 }
 0x919   : > { %v4000_v59 = vmul.f32 0.2, %v3936_v4  ;;  %vm3968_vm2 = vcmp.ge.f32.partialorder %v3936_v4, 0.0 }
 0x91b   : > { %4489 = vmax.xlane.f32.xlu0 %v4488_v1  ;;  %v4032_v52 = vsel %vm3968_vm2, %v3936_v4, %v4000_v59  ;;  %v4506_v1 = vsel %vm1966_vm13, %v8151_v37, -inf }
 0x91c   : > { %v8157_v8 = vadd.f32 %v4351_v49, %v4032_v52 }
 0x91e   : > { %v4512_v60 = vsel %vm1966_vm13, %v8157_v8, -inf }
 0x91f   : > { %4492 = vmax.xlane.f32.xlu0 %v4491_v10 }
 0x923   : > { %4495 = vmax.xlane.f32.xlu0 %v4494_v48 }
 0x927   : > { %4498 = vmax.xlane.f32.xlu0 %v4497_v33 }
 0x92b   : > { %4501 = vmax.xlane.f32.xlu0 %v4500_v24 }
 0x92f   : > { %4504 = vmax.xlane.f32.xlu0 %v4503_v15 }
 0x933   : > { %4507 = vmax.xlane.f32.xlu0 %v4506_v1 }
 0x937   : > { %4513 = vmax.xlane.f32.xlu0 %v4512_v60 }
 0x93b   : > { %4519 = vmax.xlane.f32.xlu0 %v4518_v58 }
 0x958   : > { %v4430_v14 = vpop.xlane.xlu0 %4429 }
 0x959   : > { %v4524_v45 = vsub.f32 %v7934_v36, %v4430_v14 }
 0x95b   : > { %v4556_v54 = vmul.f32 1.442695, %v4524_v45 }
 0x95c   : > { %v4433_v51 = vpop.xlane.xlu0 %4432 }
 0x95d   : > { %v4525_v10 = vsub.f32 %v7943_v17, %v4433_v51  ;;  %5945 = vpow2.f32 %v4556_v54 }
 0x95f   : > { %v4558_v23 = vmul.f32 1.442695, %v4525_v10 }
 0x960   : > { %v4436_v61 = vpop.xlane.xlu0 %4435 }
 0x961   : > { %v4526_v9 = vsub.f32 %v7958_v5, %v4436_v61  ;;  %5947 = vpow2.f32 %v4558_v23 }
 0x963   : > { %v4560_v57 = vmul.f32 1.442695, %v4526_v9 }
 0x964   : > { %v4439_v63 = vpop.xlane.xlu0 %4438 }
 0x965   : > { %v4527_v48 = vsub.f32 %v7970_v56, %v4439_v63  ;;  %5949 = vpow2.f32 %v4560_v57 }
 0x967   : > { %v4562_v31 = vmul.f32 1.442695, %v4527_v48 }
 0x968   : > { %v4442_v2 = vpop.xlane.xlu0 %4441 }
 0x969   : > { %v4528_v20 = vsub.f32 %v7979_v21, %v4442_v2  ;;  %5951 = vpow2.f32 %v4562_v31 }
 0x96a   : > { %v8168_v36 = vpop.eup %5945 }
 0x96b   : > { %v4564_v16 = vmul.f32 1.442695, %v4528_v20  ;;  %v4620_v17 = vsel %vm1966_vm13, %v8168_v36, 0.0 }
 0x96c   : > { %v4445_v33 = vpop.xlane.xlu0 %4444  ;;  %4621 = vadd.xlane.f32.xlu0 %v4620_v17  ;;  %v4478_v17 = vpop.xlane.xlu1 %4477 }
 0x96d   : > { %5953 = vpow2.f32 %v4564_v16  ;;  %v4529_v5 = vsub.f32 %v7986_v46, %v4445_v33 }
 0x96e   : > { %v8173_v6 = vpop.eup %5947 }
 0x96f   : > { %v4566_v56 = vmul.f32 1.442695, %v4529_v5  ;;  %v4623_v18 = vsel %vm1966_vm13, %v8173_v6, 0.0 }
 0x970   : > { %v4448_v40 = vpop.xlane.xlu0 %4447  ;;  %4624 = vadd.xlane.f32.xlu1 %v4623_v18 }
 0x971   : > { %5955 = vpow2.f32 %v4566_v56  ;;  %v4530_v21 = vsub.f32 %v7995_v41, %v4448_v40  ;;  %v4540_v56 = vsub.f32 %v7932_v11, %v4478_v17 }
 0x972   : > { %v8178_v34 = vpop.eup %5949 }
 0x973   : > { %v4568_v4 = vmul.f32 1.442695, %v4530_v21  ;;  %v4626_v24 = vsel %vm1966_vm13, %v8178_v34, 0.0 }
 0x974   : > { %v4451_v50 = vpop.xlane.xlu0 %4450  ;;  %4627 = vadd.xlane.f32.xlu0 %v4626_v24  ;;  %v4588_v24 = vmul.f32 1.442695, %v4540_v56 }
 0x975   : > { %5957 = vpow2.f32 %v4568_v4  ;;  %v4531_v46 = vsub.f32 %v8002_v53, %v4451_v50 }
 0x976   : > { %v8183_v13 = vpop.eup %5951 }
 0x977   : > { %v4570_v59 = vmul.f32 1.442695, %v4531_v46  ;;  %v4629_v15 = vsel %vm1966_vm13, %v8183_v13, 0.0 }
 0x978   : > { %v4454_v49 = vpop.xlane.xlu0 %4453  ;;  %4630 = vadd.xlane.f32.xlu1 %v4629_v15 }
 0x979   : > { %5959 = vpow2.f32 %v4570_v59  ;;  %v4532_v41 = vsub.f32 %v8010_v27, %v4454_v49 }
 0x97a   : > { %v8188_v52 = vpop.eup %5953 }
 0x97b   : > { %v4572_v1 = vmul.f32 1.442695, %v4532_v41  ;;  %v4632_v60 = vsel %vm1966_vm13, %v8188_v52, 0.0 }
 0x97c   : > { %4633 = vadd.xlane.f32.xlu0 %v4632_v60  ;;  %v4457_v58 = vpop.xlane.xlu0 %4456 }
 0x97d   : > { %5961 = vpow2.f32 %v4572_v1  ;;  %v4533_v53 = vsub.f32 %v8020_v25, %v4457_v58 }
 0x97e   : > { %v8193_v14 = vpop.eup %5955 }
 0x97f   : > { %v4574_v45 = vmul.f32 1.442695, %v4533_v53  ;;  %v4635_v54 = vsel %vm1966_vm13, %v8193_v14, 0.0 }
 0x980   : > { %4636 = vadd.xlane.f32.xlu1 %v4635_v54  ;;  %v4460_v51 = vpop.xlane.xlu0 %4459 }
 0x981   : > { %5963 = vpow2.f32 %v4574_v45  ;;  %v4534_v27 = vsub.f32 %v8030_v26, %v4460_v51 }
 0x982   : > { %v8198_v10 = vpop.eup %5957 }
 0x983   : > { %v4576_v23 = vmul.f32 1.442695, %v4534_v27  ;;  %v4638_v61 = vsel %vm1966_vm13, %v8198_v10, 0.0 }
 0x984   : > { %4639 = vadd.xlane.f32.xlu0 %v4638_v61  ;;  %v4463_v9 = vpop.xlane.xlu0 %4462 }
 0x985   : > { %5965 = vpow2.f32 %v4576_v23  ;;  %v4535_v25 = vsub.f32 %v8040_v22, %v4463_v9 }
 0x986   : > { %v8203_v57 = vpop.eup %5959 }
 0x987   : > { %v4578_v63 = vmul.f32 1.442695, %v4535_v25  ;;  %v4641_v48 = vsel %vm1966_vm13, %v8203_v57, 0.0 }
 0x988   : > { %4642 = vadd.xlane.f32.xlu1 %v4641_v48  ;;  %v4466_v31 = vpop.xlane.xlu0 %4465 }
 0x989   : > { %5967 = vpow2.f32 %v4578_v63  ;;  %v4536_v26 = vsub.f32 %v8050_v28, %v4466_v31 }
 0x98a   : > { %v8208_v2 = vpop.eup %5961 }
 0x98b   : > { %v4580_v20 = vmul.f32 1.442695, %v4536_v26  ;;  %v4644_v16 = vsel %vm1966_vm13, %v8208_v2, 0.0 }
 0x98c   : > { %4645 = vadd.xlane.f32.xlu0 %v4644_v16  ;;  %v4469_v22 = vpop.xlane.xlu0 %4468 }
 0x98d   : > { %5969 = vpow2.f32 %v4580_v20  ;;  %v4537_v33 = vsub.f32 %v8056_v39, %v4469_v22 }
 0x98e   : > { %v8213_v5 = vpop.eup %5963 }
 0x98f   : > { %v4582_v18 = vmul.f32 1.442695, %v4537_v33  ;;  %v4647_v28 = vsel %vm1966_vm13, %v8213_v5, 0.0 }
 0x990   : > { %4648 = vadd.xlane.f32.xlu1 %v4647_v28  ;;  %v4472_v40 = vpop.xlane.xlu0 %4471 }
 0x991   : > { %5971 = vpow2.f32 %v4582_v18  ;;  %v4538_v21 = vsub.f32 %v8065_v29, %v4472_v40 }
 0x992   : > { %v8219_v4 = vpop.eup %5965 }
 0x993   : > { %v4584_v50 = vmul.f32 1.442695, %v4538_v21  ;;  %v4650_v39 = vsel %vm1966_vm13, %v8219_v4, 0.0  ;;  %v4511_v21 = vpop.xlane.xlu1 %4510 }
 0x994   : > { %4651 = vadd.xlane.f32.xlu0 %v4650_v39  ;;  %v4475_v46 = vpop.xlane.xlu0 %4474 }
 0x995   : > { %5973 = vpow2.f32 %v4584_v50  ;;  %v4539_v11 = vsub.f32 %v8073_v38, %v4475_v46 }
 0x996   : > { %v8224_v59 = vpop.eup %5967  ;;  %5975 = vpow2.f32 %v4588_v24 }
 0x997   : > { %v4586_v15 = vmul.f32 1.442695, %v4539_v11  ;;  %v4653_v49 = vsel %vm1966_vm13, %v8224_v59, 0.0 }
 0x998   : > { %4654 = vadd.xlane.f32.xlu1 %v4653_v49  ;;  %v4481_v29 = vpop.xlane.xlu0 %4480  ;;  %v4551_v49 = vsub.f32 %v7936_v43, %v4511_v21 }
 0x999   : > { %5977 = vpow2.f32 %v4586_v15  ;;  %v4541_v41 = vsub.f32 %v8084_v55, %v4481_v29  ;;  %v4517_v29 = vpop.xlane.xlu1 %4516 }
 0x99a   : > { %v8229_v1 = vpop.eup %5969 }
 0x99b   : > { %v4590_v60 = vmul.f32 1.442695, %v4541_v41  ;;  %v4656_v58 = vsel %vm1966_vm13, %v8229_v1, 0.0 }
 0x99c   : > { %4657 = vadd.xlane.f32.xlu0 %v4656_v58  ;;  %v4484_v38 = vpop.xlane.xlu0 %4483 }
 0x99d   : > { %5979 = vpow2.f32 %v4590_v60  ;;  %v4542_v53 = vsub.f32 %v8092_v32, %v4484_v38  ;;  %v4523_v43 = vpop.xlane.xlu1 %4522 }
 0x99e   : > { %v8234_v45 = vpop.eup %5971 }
 0x99f   : > { %v4592_v54 = vmul.f32 1.442695, %v4542_v53  ;;  %v4659_v51 = vsel %vm1966_vm13, %v8234_v45, 0.0  ;;  %v4610_v53 = vmul.f32 1.442695, %v4551_v49 }
 0x9a0   : > { %4660 = vadd.xlane.f32.xlu1 %v4659_v51  ;;  %v4487_v27 = vpop.xlane.xlu0 %4486 }
 0x9a1   : > { %5981 = vpow2.f32 %v4592_v54  ;;  %v4543_v55 = vsub.f32 %v8100_v19, %v4487_v27  ;;  %v4553_v54 = vsub.f32 %v7956_v30, %v4517_v29 }
 0x9a2   : > { %v8239_v23 = vpop.eup %5973 }
 0x9a3   : > { %v4594_v61 = vmul.f32 1.442695, %v4543_v55  ;;  %v4662_v9 = vsel %vm1966_vm13, %v8239_v23, 0.0  ;;  %v8243_v25 = vpop.eup %5975 }
 0x9a4   : > { %4663 = vadd.xlane.f32.xlu0 %v4662_v9  ;;  %v4490_v32 = vpop.xlane.xlu0 %4489  ;;  %v4668_v26 = vsel %vm1966_vm13, %v8243_v25, 0.0  ;;  %v4614_v9 = vmul.f32 1.442695, %v4553_v54 }
 0x9a5   : > { %5983 = vpow2.f32 %v4594_v61  ;;  %v4544_v63 = vsub.f32 %v8108_v62, %v4490_v32 }
 0x9a6   : > { %v8246_v48 = vpop.eup %5977 }
 0x9a7   : > { %v4596_v31 = vmul.f32 1.442695, %v4544_v63  ;;  %v4665_v19 = vsel %vm1966_vm13, %v8246_v48, 0.0 }
 0x9a8   : > { %4669 = vadd.xlane.f32.xlu0 %v4668_v26  ;;  %4666 = vadd.xlane.f32.xlu1 %v4665_v19  ;;  %v4493_v20 = vpop.xlane.xlu0 %4492 }
 0x9a9   : > { %5985 = vpow2.f32 %v4596_v31  ;;  %v4545_v16 = vsub.f32 %v8115_v12, %v4493_v20 }
 0x9aa   : > { %v8253_v17 = vpop.eup %5979 }
 0x9ab   : > { %v4598_v22 = vmul.f32 1.442695, %v4545_v16  ;;  %v4671_v62 = vsel %vm1966_vm13, %v8253_v17, 0.0 }
 0x9ac   : > { %4672 = vadd.xlane.f32.xlu1 %v4671_v62  ;;  %v4496_v33 = vpop.xlane.xlu0 %4495 }
 0x9ad   : > { %5987 = vpow2.f32 %v4598_v22  ;;  %v4546_v56 = vsub.f32 %v8122_v0, %v4496_v33 }
 0x9ae   : > { %v8258_v18 = vpop.eup %5981 }
 0x9af   : > { %v4600_v28 = vmul.f32 1.442695, %v4546_v56  ;;  %v4674_v40 = vsel %vm1966_vm13, %v8258_v18, 0.0 }
 0x9b0   : > { %4675 = vadd.xlane.f32.xlu0 %v4674_v40  ;;  %v4499_v12 = vpop.xlane.xlu0 %4498 }
 0x9b1   : > { %5989 = vpow2.f32 %v4600_v28  ;;  %v4547_v24 = vsub.f32 %v8131_v47, %v4499_v12 }
 0x9b2   : > { %v8263_v50 = vpop.eup %5983 }
 0x9b3   : > { %v4602_v39 = vmul.f32 1.442695, %v4547_v24  ;;  %v4677_v46 = vsel %vm1966_vm13, %v8263_v50, 0.0 }
 0x9b4   : > { %4678 = vadd.xlane.f32.xlu1 %v4677_v46  ;;  %v4502_v0 = vpop.xlane.xlu0 %4501 }
 0x9b5   : > { %5991 = vpow2.f32 %v4602_v39  ;;  %v4548_v11 = vsub.f32 %v8138_v3, %v4502_v0 }
 0x9b6   : > { %v8268_v15 = vpop.eup %5985 }
 0x9b7   : > { %v4604_v41 = vmul.f32 1.442695, %v4548_v11  ;;  %v4680_v47 = vsel %vm1966_vm13, %v8268_v15, 0.0 }
 0x9b8   : > { %4681 = vadd.xlane.f32.xlu0 %v4680_v47  ;;  %v4505_v60 = vpop.xlane.xlu0 %4504 }
 0x9b9   : > { %5993 = vpow2.f32 %v4604_v41  ;;  %v4549_v58 = vsub.f32 %v8146_v7, %v4505_v60  ;;  %v4555_v7 = vsub.f32 %v7968_v42, %v4523_v43 }
 0x9ba   : > { %v8274_v38 = vpop.eup %5987 }
 0x9bb   : > { %v4606_v3 = vmul.f32 1.442695, %v4549_v58  ;;  %v4683_v51 = vsel %vm1966_vm13, %v8274_v38, 0.0  ;;  %v4618_v19 = vmul.f32 1.442695, %v4555_v7 }
 0x9bc   : > { %4684 = vadd.xlane.f32.xlu1 %v4683_v51  ;;  %v4508_v27 = vpop.xlane.xlu0 %4507 }
 0x9bd   : > { %5995 = vpow2.f32 %v4606_v3  ;;  %v4550_v55 = vsub.f32 %v8151_v37, %v4508_v27 }
 0x9be   : > { %v8280_v61 = vpop.eup %5989  ;;  %5997 = vpow2.f32 %v4610_v53 }
 0x9bf   : > { %v4608_v32 = vmul.f32 1.442695, %v4550_v55  ;;  %v4686_v30 = vsel %vm1966_vm13, %v8280_v61, 0.0 }
 0x9c0   : > { %4687 = vadd.xlane.f32.xlu0 %v4686_v30  ;;  %v4514_v63 = vpop.xlane.xlu0 %4513 }
 0x9c1   : > { %5999 = vpow2.f32 %v4608_v32  ;;  %v4552_v31 = vsub.f32 %v8157_v8, %v4514_v63 }
 0x9c2   : > { %v8286_v26 = vpop.eup %5991  ;;  %6001 = vpow2.f32 %v4614_v9 }
 0x9c3   : > { %v4612_v37 = vmul.f32 1.442695, %v4552_v31  ;;  %v4689_v20 = vsel %vm1966_vm13, %v8286_v26, 0.0 }
 0x9c4   : > { %4690 = vadd.xlane.f32.xlu1 %v4689_v20  ;;  %v4520_v16 = vpop.xlane.xlu0 %4519 }
 0x9c5   : > { %6003 = vpow2.f32 %v4612_v37  ;;  %v4554_v42 = vsub.f32 %v8046_v35, %v4520_v16 }
 0x9c6   : > { %v8291_v22 = vpop.eup %5993  ;;  %6005 = vpow2.f32 %v4618_v19 }
 0x9c7   : > { %v4616_v62 = vmul.f32 1.442695, %v4554_v42  ;;  %v4692_v8 = vsel %vm1966_vm13, %v8291_v22, 0.0 }
 0x9c8   : > { %4693 = vadd.xlane.f32.xlu0 %v4692_v8 }
 0x9c9   : > { %6007 = vpow2.f32 %v4616_v62 }
 0x9ca   : > { %v8295_v33 = vpop.eup %5995 }
 0x9cb   : > { %v8297_v56 = vpop.eup %5997  ;;  %v4695_v28 = vsel %vm1966_vm13, %v8295_v33, 0.0 }
 0x9cc   : > { %4696 = vadd.xlane.f32.xlu1 %v4695_v28  ;;  %v4701_v35 = vsel %vm1966_vm13, %v8297_v56, 0.0 }
 0x9ce   : > { %v8301_v40 = vpop.eup %5999 }
 0x9cf   : > { %v4698_v21 = vsel %vm1966_vm13, %v8301_v40, 0.0  ;;  %v8307_v12 = vpop.eup %6001 }
 0x9d0   : > { %4702 = vadd.xlane.f32.xlu1 %v4701_v35  ;;  %4699 = vadd.xlane.f32.xlu0 %v4698_v21  ;;  %v4707_v39 = vsel %vm1966_vm13, %v8307_v12, 0.0 }
 0x9d2   : > { %v8309_v24 = vpop.eup %6003 }
 0x9d3   : > { %v4704_v46 = vsel %vm1966_vm13, %v8309_v24, 0.0  ;;  %v8315_v0 = vpop.eup %6005 }
 0x9d4   : > { %4708 = vadd.xlane.f32.xlu1 %v4707_v39  ;;  %4705 = vadd.xlane.f32.xlu0 %v4704_v46  ;;  %v4713_v49 = vsel %vm1966_vm13, %v8315_v0, 0.0 }
 0x9d6   : > { %v8317_v11 = vpop.eup %6007 }
 0x9d7   : > { %v4710_v29 = vsel %vm1966_vm13, %v8317_v11, 0.0 }
 0x9d8   : > { %4714 = vadd.xlane.f32.xlu1 %v4713_v49  ;;  %4711 = vadd.xlane.f32.xlu0 %v4710_v29 }
 0x9f5   : > { %v4622_v41 = vpop.xlane.xlu0 %4621 }
 0x9f6   : > { %v4716_v43 = vmax.f32 %v4622_v41, 1e-30 }
 0x9f9   : > { %v4625_v47 = vpop.xlane.xlu1 %4624 }
 0x9fa   : > { %v4717_v54 = vmax.f32 %v4625_v47, 1e-30 }
 0x9fd   : > { %v4628_v60 = vpop.xlane.xlu0 %4627 }
 0x9fe   : > { %v4718_v51 = vmax.f32 %v4628_v60, 1e-30 }
 0xa01   : > { %v4631_v58 = vpop.xlane.xlu1 %4630 }
 0xa02   : > { %v4719_v53 = vmax.f32 %v4631_v58, 1e-30 }
 0xa04   : > { %6009 = vrcp.f32 %v4719_v53 }
 0xa05   : > { %v4634_v3 = vpop.xlane.xlu0 %4633  ;;  %6011 = vrcp.f32 %v4717_v54 }
 0xa06   : > { %v4720_v27 = vmax.f32 %v4634_v3, 1e-30  ;;  %6013 = vrcp.f32 %v4718_v51 }
 0xa07   : > { %6015 = vrcp.f32 %v4716_v43 }
 0xa08   : > { %6017 = vrcp.f32 %v4720_v27 }
 0xa09   : > { %v4637_v55 = vpop.xlane.xlu1 %4636 }
 0xa0a   : > { %v4721_v7 = vmax.f32 %v4637_v55, 1e-30 }
 0xa0d   : > { %v4640_v9 = vpop.xlane.xlu0 %4639 }
 0xa0e   : > { %v4722_v32 = vmax.f32 %v4640_v9, 1e-30 }
 0xa10   : > { %6019 = vrcp.f32 %v4722_v32 }
 0xa11   : > { %v4643_v30 = vpop.xlane.xlu1 %4642  ;;  %6021 = vrcp.f32 %v4721_v7  ;;  %v6010_v31 = vpop.eup %6009  ;;  %v8609_v7 = vld [vmem:[#allocation13_spill] sm:$0xff] }
 0xa12   : > { %v4723_v63 = vmax.f32 %v4643_v30, 1e-30  ;;  %v6012_v19 = vpop.eup %6011  ;;  %v4783_v16 = vmul.f32 %v6010_v31, %v8183_v13 }
 0xa13   : > { %v6014_v37 = vpop.eup %6013  ;;  %v4781_v8 = vmul.f32 %v6012_v19, %v8173_v6 }
 0xa14   : > { %6023 = vrcp.f32 %v4723_v63  ;;  %v6016_v20 = vpop.eup %6015  ;;  %v4782_v28 = vmul.f32 %v6014_v37, %v8178_v34 }
 0xa15   : > { %v6018_v42 = vpop.eup %6017  ;;  %v4780_v39 = vmul.f32 %v6016_v20, %v8168_v36  ;;  %v4820_v46 = vcombine.low %v4781_v8, %v4783_v16  ;;  %v4646_v41 = vpop.xlane.xlu0 %4645 }
 0xa16   : > { %v4784_v29 = vmul.f32 %v6018_v42, %v8188_v52  ;;  %v4724_v9 = vmax.f32 %v4646_v41, 1e-30 }
 0xa17   : > { %v4812_v60 = vcombine.low %v4780_v39, %v4782_v28  ;;  %v8332_v34 = vrot.slane %v4820_v46, %v6398_v44 }
 0xa19   : > { %v4649_v49 = vpop.xlane.xlu1 %4648  ;;  %v8335_v36 = vrot.slane %v4812_v60, %v6398_v44 }
 0xa1d   : > { %v6020_v62 = vpop.eup %6019  ;;  %v4652_v54 = vpop.xlane.xlu0 %4651 }
 0xa1e   : > { %v4786_v35 = vmul.f32 %v6020_v62, %v8198_v10  ;;  %v6022_v21 = vpop.eup %6021  ;;  %v4726_v43 = vmax.f32 %v4652_v54, 1e-30 }
 0xa1f   : > { %v4785_v13 = vmul.f32 %v6022_v21, %v8193_v14  ;;  %v4725_v14 = vmax.f32 %v4649_v49, 1e-30 }
 0xa20   : > { %v4828_v58 = vcombine.low %v4784_v29, %v4786_v35 }
 0xa21   : > { %v6024_v47 = vpop.eup %6023  ;;  %v4655_v6 = vpop.xlane.xlu1 %4654 }
 0xa22   : > { %v4787_v53 = vmul.f32 %v6024_v47, %v8203_v57  ;;  %v4727_v3 = vmax.f32 %v4655_v6, 1e-30  ;;  %v8338_v52 = vrot.slane %v4828_v58, %v6398_v44  ;;  %v4844_v57 = vcombine.low %v8335_v36, %v8332_v34 }
 0xa24   : > { %v4836_v10 = vcombine.low %v4785_v13, %v4787_v53  ;;  %6025 = vrcp.f32 %v4727_v3  ;;  %v8351_v31 = vrot.slane %v4844_v57, %v8609_v7 }
 0xa25   : > { %v4658_v27 = vpop.xlane.xlu0 %4657  ;;  %6027 = vrcp.f32 %v4725_v14 }
 0xa26   : > { %v8341_v51 = vrot.slane %v4836_v10, %v6398_v44  ;;  %v4728_v30 = vmax.f32 %v4658_v27, 1e-30  ;;  %6029 = vrcp.f32 %v4726_v43 }
 0xa27   : > { %6031 = vrcp.f32 %v4724_v9 }
 0xa28   : > { %v4860_v55 = vcombine.low %v8338_v52, %v8341_v51  ;;  %6033 = vrcp.f32 %v4728_v30 }
 0xa29   : > { %v4661_v63 = vpop.xlane.xlu1 %4660 }
 0xa2a   : > { %v8348_v32 = vrot.slane %v4860_v55, %v8609_v7  ;;  %v4729_v20 = vmax.f32 %v4661_v63, 1e-30 }
 0xa2c   : > { %v4876_v37 = vcombine.low %v8351_v31, %v8348_v32 }
 0xa2d   : > { %v4664_v19 = vpop.xlane.xlu0 %4663 }
 0xa2e   : > { %v4730_v16 = vmax.f32 %v4664_v19, 1e-30 }
 0xa30   : > { %6035 = vrcp.f32 %v4730_v16 }
 0xa31   : > { %v4667_v42 = vpop.xlane.xlu1 %4666  ;;  %6037 = vrcp.f32 %v4729_v20  ;;  %v6026_v8 = vpop.eup %6025 }
 0xa32   : > { %v4731_v62 = vmax.f32 %v4667_v42, 1e-30  ;;  %v6028_v28 = vpop.eup %6027  ;;  %v4791_v21 = vmul.f32 %v6026_v8, %v8224_v59  ;;  %v4670_v47 = vpop.xlane.xlu0 %4669 }
 0xa33   : > { %v6030_v35 = vpop.eup %6029  ;;  %v4789_v29 = vmul.f32 %v6028_v28, %v8213_v5  ;;  %v4732_v63 = vmax.f32 %v4670_v47, 1e-30 }
 0xa34   : > { %6039 = vrcp.f32 %v4731_v62  ;;  %v6032_v46 = vpop.eup %6031  ;;  %v4790_v41 = vmul.f32 %v6030_v35, %v8219_v4 }
 0xa35   : > { %v4673_v39 = vpop.xlane.xlu1 %4672  ;;  %v6034_v49 = vpop.eup %6033  ;;  %v4788_v13 = vmul.f32 %v6032_v46, %v8208_v2  ;;  %v4888_v58 = vcombine.low %v4789_v29, %v4791_v21  ;;  %v4877_v21 = vcombine.high %v8351_v31, %v8348_v32  ;;  %v252_v32 = vld [vmem:[#allocation2 + $0x48] sm:$0xff] }
 0xa36   : > { %v4792_v3 = vmul.f32 %v6034_v49, %v8229_v1  ;;  %v4733_v57 = vmax.f32 %v4673_v39, 1e-30 }
 0xa37   : > { %v4880_v54 = vcombine.low %v4788_v13, %v4790_v41  ;;  %v8364_v55 = vrot.slane %v4888_v58, %v6398_v44 }
 0xa39   : > { %v4676_v59 = vpop.xlane.xlu0 %4675  ;;  %v8367_v30 = vrot.slane %v4880_v54, %v6398_v44 }
 0xa3a   : > { %v4734_v2 = vmax.f32 %v4676_v59, 1e-30 }
 0xa3d   : > { %v6036_v60 = vpop.eup %6035  ;;  %v4679_v6 = vpop.xlane.xlu1 %4678 }
 0xa3e   : > { %v4794_v53 = vmul.f32 %v6036_v60, %v8239_v23  ;;  %v6038_v10 = vpop.eup %6037  ;;  %v4735_v43 = vmax.f32 %v4679_v6, 1e-30 }
 0xa3f   : > { %v4793_v5 = vmul.f32 %v6038_v10, %v8234_v45 }
 0xa40   : > { %v4896_v27 = vcombine.low %v4792_v3, %v4794_v53  ;;  %6041 = vrcp.f32 %v4735_v43 }
 0xa41   : > { %v6040_v14 = vpop.eup %6039  ;;  %v4682_v23 = vpop.xlane.xlu0 %4681  ;;  %6043 = vrcp.f32 %v4733_v57 }
 0xa42   : > { %v4795_v4 = vmul.f32 %v6040_v14, %v8246_v48  ;;  %v8370_v1 = vrot.slane %v4896_v27, %v6398_v44  ;;  %v4912_v48 = vcombine.low %v8367_v30, %v8364_v55  ;;  %6045 = vrcp.f32 %v4734_v2 }
 0xa43   : > { %v4736_v19 = vmax.f32 %v4682_v23, 1e-30  ;;  %6047 = vrcp.f32 %v4732_v63 }
 0xa44   : > { %v4904_v9 = vcombine.low %v4793_v5, %v4795_v4  ;;  %v8380_v28 = vrot.slane %v4912_v48, %v8609_v7 }
 0xa45   : > { %v4685_v20 = vpop.xlane.xlu1 %4684  ;;  %6049 = vrcp.f32 %v4736_v19 }
 0xa46   : > { %v8373_v45 = vrot.slane %v4904_v9, %v6398_v44  ;;  %v4737_v62 = vmax.f32 %v4685_v20, 1e-30 }
 0xa48   : > { %v4928_v16 = vcombine.low %v8370_v1, %v8373_v45 }
 0xa49   : > { %v4688_v42 = vpop.xlane.xlu0 %4687 }
 0xa4a   : > { %v4738_v8 = vmax.f32 %v4688_v42, 1e-30  ;;  %v8383_v35 = vrot.slane %v4928_v16, %v8609_v7 }
 0xa4c   : > { %6051 = vrcp.f32 %v4738_v8  ;;  %v4945_v39 = vcombine.high %v8380_v28, %v8383_v35  ;;  %v4944_v49 = vcombine.low %v8380_v28, %v8383_v35  ;;  %v253_v28 = vld [vmem:[#allocation2 + $0x50] sm:$0xff]  ;;  %v254_v35 = vld [vmem:[#allocation2 + $0x58] sm:$0xff] }
 0xa4d   : > { %v4691_v46 = vpop.xlane.xlu1 %4690  ;;  %6053 = vrcp.f32 %v4737_v62  ;;  %v6042_v47 = vpop.eup %6041 }
 0xa4e   : > { %v4739_v29 = vmax.f32 %v4691_v46, 1e-30  ;;  %v5787_v41 = vpack.i.bf16 %v4945_v39, %v4877_v21  ;;  %v6044_v60 = vpop.eup %6043  ;;  %v4799_v53 = vmul.f32 %v6042_v47, %v8263_v50 }
 0xa4f   : > { %v6046_v58 = vpop.eup %6045  ;;  %v4797_v3 = vmul.f32 %v6044_v60, %v8253_v17 }
 0xa50   : > { %6055 = vrcp.f32 %v4739_v29  ;;  %5788 = vrot.lane.b32.xlu0 %v5787_v41, %s6176_s26  ;;  %v6048_v10 = vpop.eup %6047  ;;  %v4798_v59 = vmul.f32 %v6046_v58, %v8258_v18 }
 0xa51   : > { %v4694_v13 = vpop.xlane.xlu0 %4693  ;;  %v4796_v5 = vmul.f32 %v6048_v10, %v8243_v25  ;;  %v4956_v27 = vcombine.low %v4797_v3, %v4799_v53 }
 0xa52   : > { %v4740_v54 = vmax.f32 %v4694_v13, 1e-30  ;;  %v6050_v57 = vpop.eup %6049 }
 0xa53   : > { %v4948_v48 = vcombine.low %v4796_v5, %v4798_v59  ;;  %v4800_v19 = vmul.f32 %v6050_v57, %v8268_v15  ;;  %v4963_v25 = vrot.slane %v4956_v27, %v6398_v44 }
 0xa54   : > { %6057 = vrcp.f32 %v4740_v54 }
 0xa55   : > { %v4697_v6 = vpop.xlane.xlu1 %4696  ;;  %v4955_v21 = vrot.slane %v4948_v48, %v6398_v44 }
 0xa56   : > { %v4741_v14 = vmax.f32 %v4697_v6, 1e-30 }
 0xa57   : > { %v4980_v41 = vcombine.low %v4955_v21, %v4963_v25 }
 0xa58   : > { %6059 = vrcp.f32 %v4741_v14 }
 0xa59   : > { %v6052_v43 = vpop.eup %6051  ;;  %v4703_v4 = vpop.xlane.xlu1 %4702 }
 0xa5a   : > { %v4700_v2 = vpop.xlane.xlu0 %4699  ;;  %v4802_v9 = vmul.f32 %v6052_v43, %v8280_v61  ;;  %v4743_v23 = vmax.f32 %v4703_v4, 1e-30  ;;  %v6054_v63 = vpop.eup %6053 }
 0xa5b   : > { %v4742_v50 = vmax.f32 %v4700_v2, 1e-30  ;;  %v4801_v42 = vmul.f32 %v6054_v63, %v8274_v38 }
 0xa5c   : > { %6061 = vrcp.f32 %v4743_v23  ;;  %v4964_v18 = vcombine.low %v4800_v19, %v4802_v9 }
 0xa5d   : > { %v6056_v17 = vpop.eup %6055  ;;  %6063 = vrcp.f32 %v4742_v50  ;;  %v4709_v20 = vpop.xlane.xlu1 %4708 }
 0xa5e   : > { %v4706_v16 = vpop.xlane.xlu0 %4705  ;;  %v4803_v61 = vmul.f32 %v6056_v17, %v8286_v26  ;;  %v4745_v62 = vmax.f32 %v4709_v20, 1e-30  ;;  %v4971_v29 = vrot.slane %v4964_v18, %v6398_v44  ;;  %v8405_v26 = vrot.slane %v4980_v41, %v8609_v7 }
 0xa5f   : > { %v4744_v8 = vmax.f32 %v4706_v16, 1e-30  ;;  %v4981_v18 = vcombine.high %v4955_v21, %v4963_v25  ;;  %v4929_v16 = vcombine.high %v8370_v1, %v8373_v45  ;;  %v4845_v21 = vcombine.high %v8335_v36, %v8332_v34 }
 0xa60   : > { %v4972_v39 = vcombine.low %v4801_v42, %v4803_v61  ;;  %6065 = vrcp.f32 %v4745_v62  ;;  %v4913_v61 = vcombine.high %v8367_v30, %v8364_v55 }
 0xa61   : > { %v4715_v46 = vpop.xlane.xlu1 %4714  ;;  %6067 = vrcp.f32 %v4744_v8  ;;  %v6058_v53 = vpop.eup %6057  ;;  %v4995_v25 = vrot.slane %v4981_v18, %v8609_v7  ;;  %v4943_v1 = vrot.slane %v4929_v16, %v8609_v7 }
 0xa62   : > { %v4712_v15 = vpop.xlane.xlu0 %4711  ;;  %v4747_v47 = vmax.f32 %v4715_v46, 1e-30  ;;  %v4979_v13 = vrot.slane %v4972_v39, %v6398_v44  ;;  %v4804_v57 = vmul.f32 %v6058_v53, %v8291_v22  ;;  %v4927_v30 = vrot.slane %v4913_v61, %v8609_v7 }
 0xa63   : > { %v4746_v60 = vmax.f32 %v4712_v15, 1e-30 }
 0xa64   : > { %6069 = vrcp.f32 %v4747_v47  ;;  %v4996_v38 = vcombine.low %v4971_v29, %v4979_v13 }
 0xa65   : > { %6071 = vrcp.f32 %v4746_v60  ;;  %v6060_v6 = vpop.eup %6059 }
 0xa66   : > { %v8408_v58 = vrot.slane %v4996_v38, %v8609_v7  ;;  %v4805_v43 = vmul.f32 %v6060_v6, %v8295_v33  ;;  %v4997_v33 = vcombine.high %v4971_v29, %v4979_v13  ;;  %v4859_v29 = vrot.slane %v4845_v21, %v8609_v7  ;;  %v262_v21 = vld [vmem:[#allocation2 + $0x98] sm:$0xff] }
 0xa67   : > { %v4946_v13 = vcombine.low %v4927_v30, %v4943_v1 }
 0xa68   : > { %v5012_v10 = vcombine.low %v8405_v26, %v8408_v58  ;;  %v5013_v15 = vcombine.high %v8405_v26, %v8408_v58 }
 0xa69   : > { %v6062_v54 = vpop.eup %6061 }
 0xa6a   : > { %v6064_v3 = vpop.eup %6063  ;;  %v4807_v59 = vmul.f32 %v6062_v54, %v8297_v56 }
 0xa6b   : > { %v4806_v14 = vmul.f32 %v6064_v3, %v8301_v40  ;;  %v4947_v3 = vcombine.high %v4927_v30, %v4943_v1 }
 0xa6c   : > { %v5024_v27 = vcombine.low %v4805_v43, %v4807_v59 }
 0xa6d   : > { %v6066_v5 = vpop.eup %6065  ;;  %v5016_v4 = vcombine.low %v4804_v57, %v4806_v14 }
 0xa6e   : > { %v6068_v2 = vpop.eup %6067  ;;  %v4809_v50 = vmul.f32 %v6066_v5, %v8307_v12  ;;  %v5031_v22 = vrot.slane %v5024_v27, %v6398_v44 }
 0xa6f   : > { %v4808_v48 = vmul.f32 %v6068_v2, %v8309_v24  ;;  %v5023_v40 = vrot.slane %v5016_v4, %v6398_v44  ;;  %v5011_v24 = vrot.slane %v4997_v33, %v8609_v7 }
 0xa71   : > { %v6070_v9 = vpop.eup %6069  ;;  %v5048_v42 = vcombine.low %v5023_v40, %v5031_v22  ;;  %v5015_v38 = vcombine.high %v4995_v25, %v5011_v24 }
 0xa72   : > { %v6072_v23 = vpop.eup %6071  ;;  %v4811_v63 = vmul.f32 %v6070_v9, %v8315_v0  ;;  %v5049_v0 = vcombine.high %v5023_v40, %v5031_v22 }
 0xa73   : > { %v4810_v56 = vmul.f32 %v6072_v23, %v8317_v11  ;;  %v4861_v11 = vcombine.high %v8338_v52, %v8341_v51  ;;  %v5056_v39 = vrot.slane %v5048_v42, %v8609_v7  ;;  %v5014_v51 = vcombine.low %v4995_v25, %v5011_v24 }
 0xa74   : > { %v5040_v19 = vcombine.low %v4809_v50, %v4811_v63  ;;  %v5234_v25 = vpack.c.bf16 %v254_v35, %v253_v28  ;;  %v5561_v28 = vld [vmem:[#allocation2 + $0xa7] ss:$0 sm:$0xff] }
 0xa75   : > { %v5032_v17 = vcombine.low %v4808_v48, %v4810_v56  ;;  %v4875_v55 = vrot.slane %v4861_v11, %v8609_v7 }
 0xa76   : > { %v5047_v20 = vrot.slane %v5040_v19, %v6398_v44  ;;  %5672 = vmatprep.subr.bf16.mxu1 %v5234_v25 }
 0xa77   : > { %v5039_v12 = vrot.slane %v5032_v17, %v6398_v44  ;;  %v5063_v44 = vrot.slane %v5049_v0, %v8609_v7  ;;  %v4878_v53 = vcombine.low %v4859_v29, %v4875_v55  ;;  %v4879_v59 = vcombine.high %v4859_v29, %v4875_v55  ;;  %v8612_v55 = vld [vmem:[#allocation16_spill] sm:$0xff] }
 0xa78   : > { %v8613_v30 = vmax.f32 %v8612_v55, 0.0 }
 0xa79   : > { %v5065_v62 = vcombine.high %v5039_v12, %v5047_v20  ;;  %v5064_v8 = vcombine.low %v5039_v12, %v5047_v20  ;;  %v5797_v54 = vpack.i.bf16 %v4946_v13, %v4878_v53  ;;  %v5807_v14 = vpack.i.bf16 %v4947_v3, %v4879_v59 }
 0xa7b   : > { %v5079_v45 = vrot.slane %v5065_v62, %v8609_v7  ;;  %v5072_v52 = vrot.slane %v5064_v8, %v8609_v7 }
 0xa7d   : > { %v5082_v46 = vcombine.low %v5063_v44, %v5079_v45  ;;  %v5081_v34 = vcombine.high %v5056_v39, %v5072_v52  ;;  %v5080_v36 = vcombine.low %v5056_v39, %v5072_v52  ;;  %v5083_v60 = vcombine.high %v5063_v44, %v5079_v45  ;;  %v8610_v39 = vld [vmem:[#allocation14_spill] sm:$0xff] }
 0xa7e   : > { %v8611_v52 = vmax.f32 %v8610_v39, 0.0 }
 0xa7f   : > { %v5802_v41 = vpack.i.bf16 %v5082_v46, %v5014_v51  ;;  %v5792_v47 = vpack.i.bf16 %v5081_v34, %v5013_v15  ;;  %v5812_v6 = vpack.i.bf16 %v5083_v60, %v5015_v38  ;;  %v5557_v34 = vld [vmem:[#allocation2 + $0xa5] ss:$0 sm:$0xff]  ;;  %v8616_v38 = vld [vmem:[#allocation17_spill] sm:$0xff] }
 0xa80   : > { %v8617_v53 = vmax.f32 %v8616_v38, 0.0 }
 0xa81   : > { %5803 = vrot.lane.b32.xlu0 %v5802_v41, %s6177_s27  ;;  %5793 = vrot.lane.b32.xlu1 %v5792_v47, %s6176_s26 }
 0xa85   : > { %5813 = vrot.lane.b32.xlu0 %v5812_v6, %s6178_s28  ;;  %5798 = vrot.lane.b32.xlu1 %v5797_v54, %s6177_s27 }
 0xa89   : > { %5808 = vrot.lane.b32.xlu1 %v5807_v14, %s6178_s28 }
 0xac2   : > { %v5789_v7 = vpop.permute.xlu0 %5788 }
 0xac3   : > { %v5791_v48 = vunpack.i.h.bf16 %v5789_v7  ;;  %v5790_v56 = vunpack.i.l.bf16 %v5789_v7 }
 0xac5   : > { %v5133_v16 = vsel %vm2671_vm6, %v4944_v49, %v5791_v48  ;;  %v5132_v12 = vsel %vm2671_vm6, %v4876_v37, %v5790_v56  ;;  %v251_v49 = vld [vmem:[#allocation2 + $0x40] sm:$0xff]  ;;  %v261_v37 = vld [vmem:[#allocation2 + $0x90] sm:$0xff]  ;;  %v256_v48 = vld [vmem:[#allocation2 + $0x68] sm:$0xff] }
 0xac6   : > { %v5233_v31 = vpack.c.bf16 %v252_v32, %v251_v49  ;;  %v5311_v1 = vpack.c.bf16 %v262_v21, %v261_v37 }
 0xac8   : > { %5680 = vmatprep.subr.bf16.mxu0 %v5311_v1 }
 0xac9   : > { %5681 = vmatpush3.bf16.msra.mxu0 %v5311_v1 }
 0xaf3   : > { %v5794_v57 = vpop.permute.xlu1 %5793  ;;  %v5804_v43 = vpop.permute.xlu0 %5803 }
 0xaf4   : > { %v5796_v5 = vunpack.i.h.bf16 %v5794_v57  ;;  %v5795_v27 = vunpack.i.l.bf16 %v5794_v57  ;;  %v5806_v4 = vunpack.i.h.bf16 %v5804_v43  ;;  %v5805_v2 = vunpack.i.l.bf16 %v5804_v43 }
 0xaf6   : > { %v5134_v9 = vsel %vm2671_vm6, %v5012_v10, %v5795_v27  ;;  %v5135_v23 = vsel %vm2671_vm6, %v5080_v36, %v5796_v5  ;;  %v8614_v36 = vld [vmem:[#allocation15_spill] sm:$0xff] }
 0xaf7   : > { %v5799_v50 = vpop.permute.xlu1 %5798  ;;  %v5814_v63 = vpop.permute.xlu0 %5813  ;;  %v5139_v19 = vsel %vm2676_vm10, %v5135_v23, %v5806_v4  ;;  %v5138_v33 = vsel %vm2676_vm10, %v5134_v9, %v5805_v2  ;;  %v8615_v29 = vmax.f32 %v8614_v36, 0.0  ;;  %v259_v27 = vld [vmem:[#allocation2 + $0x80] sm:$0xff]  ;;  %v260_v4 = vld [vmem:[#allocation2 + $0x88] sm:$0xff]  ;;  %v257_v9 = vld [vmem:[#allocation2 + $0x70] sm:$0xff] }
 0xaf8   : > { %v5816_v40 = vunpack.i.h.bf16 %v5814_v63  ;;  %v5815_v22 = vunpack.i.l.bf16 %v5814_v63  ;;  %v5801_v17 = vunpack.i.h.bf16 %v5799_v50  ;;  %v5800_v18 = vunpack.i.l.bf16 %v5799_v50  ;;  %v258_v23 = vld [vmem:[#allocation2 + $0x78] sm:$0xff]  ;;  %v255_v50 = vld [vmem:[#allocation2 + $0x60] sm:$0xff] }
 0xaf9   : > { %v5310_v2 = vpack.c.bf16 %v260_v4, %v259_v27  ;;  %v5309_v63 = vpack.c.bf16 %v258_v23, %v257_v9  ;;  %v5308_v56 = vpack.c.bf16 %v256_v48, %v255_v50 }
 0xafa   : > { %v5142_v20 = vsel %vm2681_vm11, %v5138_v33, %v5815_v22  ;;  %v5143_v26 = vsel %vm2681_vm11, %v5139_v19, %v5816_v40  ;;  %v5136_v24 = vsel %vm2676_vm10, %v5132_v12, %v5800_v18  ;;  %v5137_v11 = vsel %vm2676_vm10, %v5133_v16, %v5801_v17  ;;  %v5558_v22 = vld [vmem:[#allocation2 + $0xa6] ss:$0 sm:$0xff] }
 0xafb   : > { %v5161_v58 = vpack.c.bf16 %v5143_v26, %v5142_v20  ;;  %v5809_v10 = vpop.permute.xlu1 %5808  ;;  %5682 = vmatprep.subr.bf16.mxu0 %v5310_v2 }
 0xafc   : > { %v5811_v0 = vunpack.i.h.bf16 %v5809_v10  ;;  %v5810_v42 = vunpack.i.l.bf16 %v5809_v10  ;;  %5683 = vmatpush3.bf16.msra.mxu0 %v5310_v2 }
 0xafd   : > { %5684 = vmatprep.subr.bf16.mxu0 %v5309_v63 }
 0xafe   : > { %v5140_v61 = vsel %vm2681_vm11, %v5136_v24, %v5810_v42  ;;  %v5141_v62 = vsel %vm2681_vm11, %v5137_v11, %v5811_v0 }
 0xaff   : > { %v5160_v8 = vpack.c.bf16 %v5141_v62, %v5140_v61 }
 0xb00   : > { %5685 = vmatpush3.bf16.msra.mxu0 %v5309_v63 }
 0xb01   : > { %5668 = vmatprep.mubr.bf16.mxu1 %v5160_v8  ;;  %5686 = vmatprep.subr.bf16.mxu0 %v5308_v56 }
 0xb02   : > { %5669 = vmatmul.mubr.bf16.vlgmr.msra.gmra.mxu1 %v5161_v58 }
 0xb03   : > { %5673 = vmatpush3.bf16.msra.mxu1 %v5234_v25 }
 0xb04   : > { %5674 = vmatprep.subr.bf16.mxu1 %v5233_v31  ;;  %5687 = vmatpush3.bf16.msra.mxu0 %v5308_v56 }
 0xb07   : > { %5675 = vmatpush3.bf16.msra.mxu1 %v5233_v31 }
 0xbc2   : > { %v5670_v44 = vpop.f32.mrf.mxu1 }
 0xbc3   : > { %v5213_v46 = vadd.f32 %v5670_v44, %v8613_v30 }
 0xbc4   : > { %v5204_v45 = vpop.f32.mrf.mxu1 }
 0xbc5   : > { %v5205_v51 = vadd.f32 %v5204_v45, %v8611_v52  ;;  %v5225_v54 = vadd.f32 %v5557_v34, %v5213_v46 }
 0xbc6   : > { %v5671_v15 = vpop.f32.mrf.mxu1 }
 0xbc7   : > { %v5216_v41 = vadd.f32 %v5671_v15, %v8615_v29  ;;  %v5223_v60 = vadd.f32 %v5557_v34, %v5205_v51  ;;  %v5229_v57 = vmax.f32 %v5225_v54, 0.0 }
 0xbc8   : > { %v5207_v47 = vpop.f32.mrf.mxu1 }
 0xbc9   : > { %v5226_v13 = vadd.f32 %v5557_v34, %v5216_v41  ;;  %v5208_v6 = vadd.f32 %v5207_v47, %v8617_v53  ;;  %v5227_v14 = vmax.f32 %v5223_v60, 0.0 }
 0xbcb   : > { %v5224_v3 = vadd.f32 %v5557_v34, %v5208_v6  ;;  %v5230_v59 = vmax.f32 %v5226_v13, 0.0 }
 0xbcd   : > { %v5228_v7 = vmax.f32 %v5224_v3, 0.0  ;;  %v5232_v5 = vpack.c.bf16 %v5230_v59, %v5229_v57 }
 0xbcf   : > { %v5231_v43 = vpack.c.bf16 %v5228_v7, %v5227_v14 }
 0xbd1   : > { %5676 = vmatprep.mubr.msk.bf16.mxu1 %vm2671_vm6, %v5231_v43 }
 0xbd2   : > { %5677 = vmatmul.mubr.msk.bf16.vlgmr.msra.gmra.mxu1 %vm2671_vm6, %v5232_v5 }
 0xc92   : > { %v5678_v40 = vpop.f32.mrf.mxu1 }
 0xc93   : > { %v5288_v17 = vadd.f32 %v5678_v40, %v5558_v22 }
 0xc94   : > { %v5279_v19 = vpop.f32.mrf.mxu1 }
 0xc95   : > { %v5280_v33 = vadd.f32 %v5558_v22, %v5279_v19  ;;  %v5300_v12 = vmul.f32 0.01, %v5288_v17  ;;  %vm5296_vm3 = vcmp.ge.f32.partialorder %v5288_v17, 0.0 }
 0xc96   : > { %v5679_v18 = vpop.f32.mrf.mxu1 }
 0xc97   : > { %v5291_v20 = vadd.f32 %v5679_v18, %v5558_v22  ;;  %v5298_v58 = vmul.f32 0.01, %v5280_v33  ;;  %vm5294_vm11 = vcmp.ge.f32.partialorder %v5280_v33, 0.0  ;;  %v5304_v61 = vsel %vm5296_vm3, %v5288_v17, %v5300_v12 }
 0xc98   : > { %v5282_v26 = vpop.f32.mrf.mxu1 }
 0xc99   : > { %vm5297_vm13 = vcmp.ge.f32.partialorder %v5291_v20, 0.0  ;;  %v5301_v10 = vmul.f32 0.01, %v5291_v20  ;;  %v5283_v16 = vadd.f32 %v5558_v22, %v5282_v26  ;;  %v5302_v24 = vsel %vm5294_vm11, %v5280_v33, %v5298_v58 }
 0xc9b   : > { %vm5295_vm8 = vcmp.ge.f32.partialorder %v5283_v16, 0.0  ;;  %v5299_v0 = vmul.f32 0.01, %v5283_v16  ;;  %v5305_v42 = vsel %vm5297_vm13, %v5291_v20, %v5301_v10 }
 0xc9c   : > { %v5307_v8 = vpack.c.bf16 %v5305_v42, %v5304_v61 }
 0xc9d   : > { %v5303_v11 = vsel %vm5295_vm8, %v5283_v16, %v5299_v0 }
 0xc9e   : > { %v5306_v62 = vpack.c.bf16 %v5303_v11, %v5302_v24 }
 0xca0   : > { %5688 = vmatprep.mubr.msk.bf16.mxu0 %vm2676_vm10, %v5306_v62 }
 0xca1   : > { %5689 = vmatmul.mubr.msk.bf16.vlgmr.msra.gmra.mxu0 %vm2676_vm10, %v5307_v8 }
 0xd61   : > { %v5690_v35 = vpop.f32.mrf.mxu0 }
 0xd62   : > { %v5365_v49 = vadd.f32 %v5690_v35, %v5561_v28 }
 0xd63   : > { %v5356_v25 = vpop.f32.mrf.mxu0 }
 0xd64   : > { %vm5373_vm12 = vcmp.ge.f32.partialorder %v5365_v49, 0.0  ;;  %v5377_v32 = vmul.f32 0.01, %v5365_v49  ;;  %v5357_v31 = vadd.f32 %v5561_v28, %v5356_v25 }
 0xd65   : > { %v5691_v37 = vpop.f32.mrf.mxu0 }
 0xd66   : > { %v5381_v21 = vsel %vm5373_vm12, %v5365_v49, %v5377_v32  ;;  %vm5371_vm14 = vcmp.ge.f32.partialorder %v5357_v31, 0.0  ;;  %v5375_v1 = vmul.f32 0.01, %v5357_v31  ;;  %v5368_v44 = vadd.f32 %v5691_v37, %v5561_v28 }
 0xd67   : > { %5385 = vst.msk [vmem:[%s193_s4 + $0x10] sm:$0xff] %vm2671_vm6, %v5381_v21  ;;  %v5359_v45 = vpop.f32.mrf.mxu0 }
 0xd68   : > { %v5379_v39 = vsel %vm5371_vm14, %v5357_v31, %v5375_v1  ;;  %vm5374_vm10 = vcmp.ge.f32.partialorder %v5368_v44, 0.0  ;;  %v5378_v52 = vmul.f32 0.01, %v5368_v44  ;;  %v5360_v51 = vadd.f32 %v5561_v28, %v5359_v45 }
 0xd69   : > { %5383 = vst.msk [vmem:[%s193_s4] sm:$0xff] %vm2671_vm6, %v5379_v39 }
 0xd6a   : > { %v5382_v55 = vsel %vm5374_vm10, %v5368_v44, %v5378_v52  ;;  %vm5372_vm15 = vcmp.ge.f32.partialorder %v5360_v51, 0.0  ;;  %v5376_v30 = vmul.f32 0.01, %v5360_v51 }
 0xd6b   : > { %5386 = vst.msk [vmem:[%s193_s4 + $0x18] sm:$0xff] %vm2671_vm6, %v5382_v55 }
 0xd6c   : > { %v5380_v46 = vsel %vm5372_vm15, %v5360_v51, %v5376_v30 }
 0xd6d   : > { %5384 = vst.msk [vmem:[%s193_s4 + $0x8] sm:$0xff] %vm2671_vm6, %v5380_v46 }
 0xd6e   : > { %6112 = shalt.err (!%p6109_p0)
}
 0xd6f   : > { %s6113_s20 = scalar_lea.hbm %s8494_s9, 512  ;;  %s6117_s26 = scalar_lea.hbm %s8542_s3, 1024 }
 0xd70   : > { %p6114_p1 = scmp.ne.s32.totalorder %s8494_s9, %s6113_s20  ;;  %p6118_p4 = scmp.lt.s32.totalorder %s8494_s9, %s8542_s3 }
 0xd71   : > { %p6119_p7 = scmp.lt.s32.totalorder %s6117_s26, %s6113_s20 }
 0xd72   : > { %p6115_p2 = pnand %p6114_p1, %p6240_p5 }
 0xd73   : > { %p6120_p8 = por %p6119_p7, %p6118_p4 }
 0xd74   : > { %p6116_p3 = pneg %p6115_p2 }
 0xd76   : > { %p6121_p6 = pnand %p6120_p8, %p6116_p3 }
 0xd78   : > { %6124 = shalt.err (!%p6121_p6)
}
 0xd79   : > { %s6180_s29 = smov 128   ;;  %s6181_s30 = smov 8  }
 0xd7a   : > { %5696 = dma.vmem_to_hbm [thread:$0]  (%p6240_p5), %s8488_s5, 512, %s8494_s9, %s8499_s16, %s6180_s29, %s6180_s29, %s6181_s30  }
 0xd7b PF: > { %p5708_p9 = scmp.ge.s32.totalorder %s6163_s15, 2  ;;  %s5416_s4 = sand.u32 1, %s6151_s12  }
 0xd7c   : > { %p8618_p10 = scmp.ne.s32.totalorder %s8571_s23, 0  ;;  %s5417_s6 = scalar_lea.sflag [#allocation4], %s5416_s4 }
 0xd7e   : > { %p5703_p11 = pnand %p5708_p9, %p8618_p10 }
 0xd80   : > { %p5704_p12 = pneg %p5703_p11 }
 0xd82   : > { %6146 = dma.done.wait (%p5704_p12), %s5417_s6, 512  }
 0xd83   : > { %6148 = vsyncadd (%p5704_p12), %s5417_s6, 4294966784  ;;  %p14_p13 = scmp.ge.s32.totalorder %s6227_s18, 4   ;;  %s8619_s12 = smov %s6155_s13 }
 0xd84   : > { %s8620_s13 = smov %s6159_s14  ;;  %s8621_s14 = smov %s6238_s21 }
 0xd85   : > { %s8622_s15 = smov %s6227_s18  ;;  %16 = sbr.rel (!%p14_p13) target bundleno = 4 (0x4), region = 75 }
 0xd8a   :  { %5422 = vsyncpa [#allocation3], 1 }
 0xd8b   :  { %5424 = vsyncpa [#allocation3 + $0x1], 1 }
 0xd8c   :  { %5425 = vsyncpa [#allocation4], 1 }
 0xd8d   :  { %5427 = vsyncpa [#allocation4 + $0x1], 1 }

</bundles_post_ra>
